<compile_context>
chip_gen: v6e
topology: v6e:2x2x1
jax: 0.10.0
libtpu: 0.0.40
codegen_flags: <defaults>
</compile_context>

<pallas_src>
import functools

import jax
import jax.numpy as jnp
from jax.experimental import pallas as pl
from jax.experimental.pallas import tpu as pltpu


# ----------------------------------------------------------------------------
# Fused Conv2d(3x3, pad=1) + ReLU + MaxPool2d(2)  (one batch element per step)
# ----------------------------------------------------------------------------
def _conv_relu_pool_kernel(x_ref, w_ref, b_ref, o_ref, hpool_ref, *, H, W):
    """x_ref: (1, H+2, W+2, Cin) padded NHWC f32 input
       w_ref: (3, 3, Cin, Cout) bf16 weights
       b_ref: (1, Cout) f32 bias
       o_ref: (1, (H//2)*(W//2), Cout) pooled output, rows in (h, w) raster order
       hpool_ref: VMEM scratch ((H//2)*W, Cout) f32 for the row-pooled activation
    """
    Cout = o_ref.shape[-1]
    Hp, Wp = H // 2, W // 2

    # In-kernel im2col: accumulate the 9 shifted taps as bf16 MXU matmuls with
    # f32 accumulation.  No patch matrix ever touches HBM.
    acc = jnp.zeros((H * W, Cout), jnp.float32)
    for ky in range(3):
        for kx in range(3):
            patch = x_ref[0, ky:ky + H, kx:kx + W, :]            # (H, W, Cin)
            lhs = patch.reshape(H * W, -1).astype(w_ref.dtype)   # bf16 LHS
            acc = acc + jnp.dot(lhs, w_ref[ky, kx],
                                preferred_element_type=jnp.float32)

    acc = jnp.maximum(acc + b_ref[...], 0.0)                     # bias + ReLU (f32)

    # 2x2 max pool, step 1 (rows): rows 2i and 2i+1 land in the two sublane
    # halves after viewing the (H*W, Cout) raster as (Hp, 2W, Cout).
    acc = acc.reshape(Hp, 2 * W, Cout)
    hpool_ref[...] = jnp.maximum(acc[:, :W, :], acc[:, W:, :]).reshape(Hp * W, Cout)

    # step 2 (cols): adjacent sublane pairs via strided loads from VMEM scratch.
    even = hpool_ref[pl.ds(0, Hp * Wp, stride=2), :]
    odd = hpool_ref[pl.ds(1, Hp * Wp, stride=2), :]
    o_ref[0] = jnp.maximum(even, odd).astype(o_ref.dtype)


def conv_relu_pool(x_pad, w, b):
    """x_pad: (B, H+2, W+2, Cin) f32; w: (3,3,Cin,Cout) bf16; b: (1,Cout) f32.
    Returns (B, (H//2)*(W//2), Cout) f32 with rows in (h, w) raster order."""
    B, Hpad, Wpad, Cin = x_pad.shape
    H, W = Hpad - 2, Wpad - 2
    Cout = w.shape[-1]
    Hp, Wp = H // 2, W // 2
    kernel = functools.partial(_conv_relu_pool_kernel, H=H, W=W)
    return pl.pallas_call(
        kernel,
        out_shape=jax.ShapeDtypeStruct((B, Hp * Wp, Cout), jnp.float32),
        grid=(B,),
        in_specs=[
            pl.BlockSpec((1, Hpad, Wpad, Cin), lambda bb: (bb, 0, 0, 0)),
            pl.BlockSpec((3, 3, Cin, Cout), lambda bb: (0, 0, 0, 0)),
            pl.BlockSpec((1, Cout), lambda bb: (0, 0)),
        ],
        out_specs=pl.BlockSpec((1, Hp * Wp, Cout), lambda bb: (bb, 0, 0)),
        scratch_shapes=[pltpu.VMEM((Hp * W, Cout), jnp.float32)],
        compiler_params=pltpu.CompilerParams(
            dimension_semantics=("parallel",),        # shards batch on v7x 2 TCs
            vmem_limit_bytes=32 * 1024 * 1024,
        ),
    )(x_pad, w, b)


# ----------------------------------------------------------------------------
# Fused fc1 + ReLU + fc2, tiled over K with an f32 accumulator
# ----------------------------------------------------------------------------
def _fc_fused_kernel(x_ref, w1_ref, b1_ref, w2_ref, b2_ref, o_ref, acc_ref):
    k = pl.program_id(0)

    @pl.when(k == 0)
    def _():
        acc_ref[...] = jnp.zeros_like(acc_ref)

    acc_ref[...] += jnp.dot(x_ref[...].astype(w1_ref.dtype), w1_ref[...],
                            preferred_element_type=jnp.float32)

    @pl.when(k == pl.num_programs(0) - 1)
    def _():
        h = jnp.maximum(acc_ref[...] + b1_ref[...], 0.0)         # ReLU in f32
        out = jnp.dot(h.astype(w2_ref.dtype), w2_ref[...],
                      preferred_element_type=jnp.float32)
        o_ref[...] = (out + b2_ref[...]).astype(o_ref.dtype)


def fc_fused(x, w1, b1, w2, b2, *, block_k=512):
    B, K = x.shape
    K2, N1 = w1.shape
    N2 = w2.shape[-1]
    assert K == K2, (K, K2)
    tk = block_k if K % block_k == 0 else K
    return pl.pallas_call(
        _fc_fused_kernel,
        out_shape=jax.ShapeDtypeStruct((B, N2), jnp.float32),
        grid=(K // tk,),
        in_specs=[
            pl.BlockSpec((B, tk), lambda k: (0, k)),
            pl.BlockSpec((tk, N1), lambda k: (k, 0)),
            pl.BlockSpec((1, N1), lambda k: (0, 0)),
            pl.BlockSpec((N1, N2), lambda k: (0, 0)),
            pl.BlockSpec((1, N2), lambda k: (0, 0)),
        ],
        out_specs=pl.BlockSpec((B, N2), lambda k: (0, 0)),
        scratch_shapes=[pltpu.VMEM((B, N1), jnp.float32)],
        compiler_params=pltpu.CompilerParams(
            dimension_semantics=("arbitrary",),       # K is a reduction axis
            vmem_limit_bytes=32 * 1024 * 1024,
        ),
    )(x, w1, b1, w2, b2)


# ----------------------------------------------------------------------------
# Full forward pass (WallDetector)
# ----------------------------------------------------------------------------
def wall_detector_forward(x_nchw, params):
    B, _, H, W = x_nchw.shape
    x = jnp.transpose(x_nchw, (0, 2, 3, 1))                      # NCHW -> NHWC

    # conv1 + ReLU + pool (fused)
    xp = jnp.pad(x, ((0, 0), (1, 1), (1, 1), (0, 0)))
    y = conv_relu_pool(xp, params["conv1_w"], params["conv1_b"])
    H, W = H // 2, W // 2
    y = y.reshape(B, H, W, params["conv1_w"].shape[-1])

    # conv2 + ReLU + pool (fused)
    yp = jnp.pad(y, ((0, 0), (1, 1), (1, 1), (0, 0)))
    y = conv_relu_pool(yp, params["conv2_w"], params["conv2_b"])
    H, W = H // 2, W // 2
    c2 = params["conv2_w"].shape[-1]

    # Flatten in (h, w, c) order; fc1_w rows were permuted once at prep time so
    # this reproduces PyTorch's NCHW x.view(B, -1) semantics with no transpose.
    feats = y.reshape(B, H * W * c2)
    return fc_fused(feats, params["fc1_w"], params["fc1_b"],
                    params["fc2_w"], params["fc2_b"])


# ----------------------------------------------------------------------------
# Parameters: PyTorch layouts at init, one-time repack for the kernels
# ----------------------------------------------------------------------------
def init_params(key, spatial=16):
    hp = spatial // 4                        # spatial after two MaxPool2d(2)
    fc1_in = 64 * hp * hp
    ks = jax.random.split(key, 8)
    scale = 0.05
    return {
        "conv1_w": scale * jax.random.normal(ks[0], (32, 3, 3, 3), jnp.float32),
        "conv1_b": scale * jax.random.normal(ks[1], (32,), jnp.float32),
        "conv2_w": scale * jax.random.normal(ks[2], (64, 32, 3, 3), jnp.float32),
        "conv2_b": scale * jax.random.normal(ks[3], (64,), jnp.float32),
        "fc1_w": scale * jax.random.normal(ks[4], (1024, fc1_in), jnp.float32),
        "fc1_b": scale * jax.random.normal(ks[5], (1024,), jnp.float32),
        "fc2_w": scale * jax.random.normal(ks[6], (2, 1024), jnp.float32),
        "fc2_b": scale * jax.random.normal(ks[7], (2,), jnp.float32),
    }


def prepare_params(p, *, spatial):
    """One-time repack: conv weights to (KH,KW,Cin,Cout) bf16, fc weights to
    (in,out) bf16 with fc1 rows permuted from NCHW- to NHWC-flatten order."""
    hp = spatial // 4
    c2 = p["conv2_w"].shape[0]
    n1 = p["fc1_w"].shape[0]
    fc1 = (p["fc1_w"].reshape(n1, c2, hp, hp)
           .transpose(2, 3, 1, 0)                    # (h, w, c, out)
           .reshape(hp * hp * c2, n1))
    return {
        "conv1_w": jnp.transpose(p["conv1_w"], (2, 3, 1, 0)).astype(jnp.bfloat16),
        "conv1_b": p["conv1_b"].reshape(1, -1).astype(jnp.float32),
        "conv2_w": jnp.transpose(p["conv2_w"], (2, 3, 1, 0)).astype(jnp.bfloat16),
        "conv2_b": p["conv2_b"].reshape(1, -1).astype(jnp.float32),
        "fc1_w": fc1.astype(jnp.bfloat16),
        "fc1_b": p["fc1_b"].reshape(1, -1).astype(jnp.float32),
        "fc2_w": p["fc2_w"].T.astype(jnp.bfloat16),
        "fc2_b": p["fc2_b"].reshape(1, -1).astype(jnp.float32),
    }


if __name__ == "__main__":
    key = jax.random.PRNGKey(0)
    k_params, k_x = jax.random.split(key)

    B, C, H, W = 2, 3, 16, 16
    x = jax.random.normal(k_x, (B, C, H, W), jnp.float32)

    raw_params = init_params(k_params, spatial=H)        # PyTorch layouts
    params = prepare_params(raw_params, spatial=H)       # one-time repack

    fwd = jax.jit(wall_detector_forward)
    out = fwd(x, params)
    jax.block_until_ready(out)

    assert out.shape == (B, 2), out.shape
    assert out.dtype == jnp.float32
    print("KERNEL_OK")
</pallas_src>

<mosaic_0001>
module attributes {stable_mosaic.version = 11 : i64} {
  func.func @_conv_relu_pool_kernel(%arg0: i32, %arg1: memref<1x18x18x3xf32, #tpu.memory_space<vmem>>, %arg2: memref<3x3x3x32xbf16, #tpu.memory_space<vmem>>, %arg3: memref<1x32xf32, #tpu.memory_space<vmem>>, %arg4: memref<1x64x32xf32, #tpu.memory_space<vmem>>, %arg5: memref<128x32xf32, #tpu.memory_space<vmem>>) attributes {dimension_semantics = [#tpu.dimension_semantics<parallel>], iteration_bounds = array<i64: 2>, scalar_prefetch = 0 : i64, scratch_operands = 1 : i64, tpu.core_type = #tpu.core_type<tc>, window_params = [{transform_indices = @transform_0, window_bounds = array<i64: 1, 18, 18, 3>}, {pipeline_mode = #tpu.pipeline_mode<synchronous>, transform_indices = @transform_1, window_bounds = array<i64: 3, 3, 3, 32>}, {pipeline_mode = #tpu.pipeline_mode<synchronous>, transform_indices = @transform_2, window_bounds = array<i64: 1, 32>}, {transform_indices = @transform_3, window_bounds = array<i64: 1, 64, 32>}]} {
    %cst = arith.constant 0.000000e+00 : f32
    %0 = vector.broadcast %cst : f32 to vector<256x32xf32>
    %c0 = arith.constant 0 : index
    %c0_0 = arith.constant 0 : index
    %c0_1 = arith.constant 0 : index
    %c0_2 = arith.constant 0 : index
    %1 = vector.load %arg1[%c0, %c0_0, %c0_1, %c0_2] : memref<1x18x18x3xf32, #tpu.memory_space<vmem>>, vector<1x16x16x3xf32>
    %2 = vector.shape_cast %1 : vector<1x16x16x3xf32> to vector<16x16x3xf32>
    %3 = vector.shape_cast %2 : vector<16x16x3xf32> to vector<256x3xf32>
    %4 = arith.truncf %3 : vector<256x3xf32> to vector<256x3xbf16>
    %c0_3 = arith.constant 0 : index
    %c0_4 = arith.constant 0 : index
    %c0_5 = arith.constant 0 : index
    %c0_6 = arith.constant 0 : index
    %5 = vector.load %arg2[%c0_3, %c0_4, %c0_5, %c0_6] : memref<3x3x3x32xbf16, #tpu.memory_space<vmem>>, vector<1x1x3x32xbf16>
    %6 = vector.shape_cast %5 : vector<1x1x3x32xbf16> to vector<3x32xbf16>
    %cst_7 = arith.constant dense<0.000000e+00> : vector<256x32xf32>
    %7 = tpu.matmul %4, %6, %cst_7 {dimension_numbers = #tpu.dot_dimension_numbers<[1], [0], [0], [1], [0, 0, 1, 1], [], []>} : vector<256x3xbf16>, vector<3x32xbf16>, vector<256x32xf32> -> vector<256x32xf32>
    %8 = arith.addf %0, %7 : vector<256x32xf32>
    %c0_8 = arith.constant 0 : index
    %c0_9 = arith.constant 0 : index
    %c1 = arith.constant 1 : index
    %c0_10 = arith.constant 0 : index
    %9 = vector.load %arg1[%c0_8, %c0_9, %c1, %c0_10] : memref<1x18x18x3xf32, #tpu.memory_space<vmem>>, vector<1x16x16x3xf32>
    %10 = vector.shape_cast %9 : vector<1x16x16x3xf32> to vector<16x16x3xf32>
    %11 = vector.shape_cast %10 : vector<16x16x3xf32> to vector<256x3xf32>
    %12 = arith.truncf %11 : vector<256x3xf32> to vector<256x3xbf16>
    %c0_11 = arith.constant 0 : index
    %c1_12 = arith.constant 1 : index
    %c0_13 = arith.constant 0 : index
    %c0_14 = arith.constant 0 : index
    %13 = vector.load %arg2[%c0_11, %c1_12, %c0_13, %c0_14] : memref<3x3x3x32xbf16, #tpu.memory_space<vmem>>, vector<1x1x3x32xbf16>
    %14 = vector.shape_cast %13 : vector<1x1x3x32xbf16> to vector<3x32xbf16>
    %cst_15 = arith.constant dense<0.000000e+00> : vector<256x32xf32>
    %15 = tpu.matmul %12, %14, %cst_15 {dimension_numbers = #tpu.dot_dimension_numbers<[1], [0], [0], [1], [0, 0, 1, 1], [], []>} : vector<256x3xbf16>, vector<3x32xbf16>, vector<256x32xf32> -> vector<256x32xf32>
    %16 = arith.addf %8, %15 : vector<256x32xf32>
    %c0_16 = arith.constant 0 : index
    %c0_17 = arith.constant 0 : index
    %c2 = arith.constant 2 : index
    %c0_18 = arith.constant 0 : index
    %17 = vector.load %arg1[%c0_16, %c0_17, %c2, %c0_18] : memref<1x18x18x3xf32, #tpu.memory_space<vmem>>, vector<1x16x16x3xf32>
    %18 = vector.shape_cast %17 : vector<1x16x16x3xf32> to vector<16x16x3xf32>
    %19 = vector.shape_cast %18 : vector<16x16x3xf32> to vector<256x3xf32>
    %20 = arith.truncf %19 : vector<256x3xf32> to vector<256x3xbf16>
    %c0_19 = arith.constant 0 : index
    %c2_20 = arith.constant 2 : index
    %c0_21 = arith.constant 0 : index
    %c0_22 = arith.constant 0 : index
    %21 = vector.load %arg2[%c0_19, %c2_20, %c0_21, %c0_22] : memref<3x3x3x32xbf16, #tpu.memory_space<vmem>>, vector<1x1x3x32xbf16>
    %22 = vector.shape_cast %21 : vector<1x1x3x32xbf16> to vector<3x32xbf16>
    %cst_23 = arith.constant dense<0.000000e+00> : vector<256x32xf32>
    %23 = tpu.matmul %20, %22, %cst_23 {dimension_numbers = #tpu.dot_dimension_numbers<[1], [0], [0], [1], [0, 0, 1, 1], [], []>} : vector<256x3xbf16>, vector<3x32xbf16>, vector<256x32xf32> -> vector<256x32xf32>
    %24 = arith.addf %16, %23 : vector<256x32xf32>
    %c0_24 = arith.constant 0 : index
    %c1_25 = arith.constant 1 : index
    %c0_26 = arith.constant 0 : index
    %c0_27 = arith.constant 0 : index
    %25 = vector.load %arg1[%c0_24, %c1_25, %c0_26, %c0_27] : memref<1x18x18x3xf32, #tpu.memory_space<vmem>>, vector<1x16x16x3xf32>
    %26 = vector.shape_cast %25 : vector<1x16x16x3xf32> to vector<16x16x3xf32>
    %27 = vector.shape_cast %26 : vector<16x16x3xf32> to vector<256x3xf32>
    %28 = arith.truncf %27 : vector<256x3xf32> to vector<256x3xbf16>
    %c1_28 = arith.constant 1 : index
    %c0_29 = arith.constant 0 : index
    %c0_30 = arith.constant 0 : index
    %c0_31 = arith.constant 0 : index
    %29 = vector.load %arg2[%c1_28, %c0_29, %c0_30, %c0_31] : memref<3x3x3x32xbf16, #tpu.memory_space<vmem>>, vector<1x1x3x32xbf16>
    %30 = vector.shape_cast %29 : vector<1x1x3x32xbf16> to vector<3x32xbf16>
    %cst_32 = arith.constant dense<0.000000e+00> : vector<256x32xf32>
    %31 = tpu.matmul %28, %30, %cst_32 {dimension_numbers = #tpu.dot_dimension_numbers<[1], [0], [0], [1], [0, 0, 1, 1], [], []>} : vector<256x3xbf16>, vector<3x32xbf16>, vector<256x32xf32> -> vector<256x32xf32>
    %32 = arith.addf %24, %31 : vector<256x32xf32>
    %c0_33 = arith.constant 0 : index
    %c1_34 = arith.constant 1 : index
    %c1_35 = arith.constant 1 : index
    %c0_36 = arith.constant 0 : index
    %33 = vector.load %arg1[%c0_33, %c1_34, %c1_35, %c0_36] : memref<1x18x18x3xf32, #tpu.memory_space<vmem>>, vector<1x16x16x3xf32>
    %34 = vector.shape_cast %33 : vector<1x16x16x3xf32> to vector<16x16x3xf32>
    %35 = vector.shape_cast %34 : vector<16x16x3xf32> to vector<256x3xf32>
    %36 = arith.truncf %35 : vector<256x3xf32> to vector<256x3xbf16>
    %c1_37 = arith.constant 1 : index
    %c1_38 = arith.constant 1 : index
    %c0_39 = arith.constant 0 : index
    %c0_40 = arith.constant 0 : index
    %37 = vector.load %arg2[%c1_37, %c1_38, %c0_39, %c0_40] : memref<3x3x3x32xbf16, #tpu.memory_space<vmem>>, vector<1x1x3x32xbf16>
    %38 = vector.shape_cast %37 : vector<1x1x3x32xbf16> to vector<3x32xbf16>
    %cst_41 = arith.constant dense<0.000000e+00> : vector<256x32xf32>
    %39 = tpu.matmul %36, %38, %cst_41 {dimension_numbers = #tpu.dot_dimension_numbers<[1], [0], [0], [1], [0, 0, 1, 1], [], []>} : vector<256x3xbf16>, vector<3x32xbf16>, vector<256x32xf32> -> vector<256x32xf32>
    %40 = arith.addf %32, %39 : vector<256x32xf32>
    %c0_42 = arith.constant 0 : index
    %c1_43 = arith.constant 1 : index
    %c2_44 = arith.constant 2 : index
    %c0_45 = arith.constant 0 : index
    %41 = vector.load %arg1[%c0_42, %c1_43, %c2_44, %c0_45] : memref<1x18x18x3xf32, #tpu.memory_space<vmem>>, vector<1x16x16x3xf32>
    %42 = vector.shape_cast %41 : vector<1x16x16x3xf32> to vector<16x16x3xf32>
    %43 = vector.shape_cast %42 : vector<16x16x3xf32> to vector<256x3xf32>
    %44 = arith.truncf %43 : vector<256x3xf32> to vector<256x3xbf16>
    %c1_46 = arith.constant 1 : index
    %c2_47 = arith.constant 2 : index
    %c0_48 = arith.constant 0 : index
    %c0_49 = arith.constant 0 : index
    %45 = vector.load %arg2[%c1_46, %c2_47, %c0_48, %c0_49] : memref<3x3x3x32xbf16, #tpu.memory_space<vmem>>, vector<1x1x3x32xbf16>
    %46 = vector.shape_cast %45 : vector<1x1x3x32xbf16> to vector<3x32xbf16>
    %cst_50 = arith.constant dense<0.000000e+00> : vector<256x32xf32>
    %47 = tpu.matmul %44, %46, %cst_50 {dimension_numbers = #tpu.dot_dimension_numbers<[1], [0], [0], [1], [0, 0, 1, 1], [], []>} : vector<256x3xbf16>, vector<3x32xbf16>, vector<256x32xf32> -> vector<256x32xf32>
    %48 = arith.addf %40, %47 : vector<256x32xf32>
    %c0_51 = arith.constant 0 : index
    %c2_52 = arith.constant 2 : index
    %c0_53 = arith.constant 0 : index
    %c0_54 = arith.constant 0 : index
    %49 = vector.load %arg1[%c0_51, %c2_52, %c0_53, %c0_54] : memref<1x18x18x3xf32, #tpu.memory_space<vmem>>, vector<1x16x16x3xf32>
    %50 = vector.shape_cast %49 : vector<1x16x16x3xf32> to vector<16x16x3xf32>
    %51 = vector.shape_cast %50 : vector<16x16x3xf32> to vector<256x3xf32>
    %52 = arith.truncf %51 : vector<256x3xf32> to vector<256x3xbf16>
    %c2_55 = arith.constant 2 : index
    %c0_56 = arith.constant 0 : index
    %c0_57 = arith.constant 0 : index
    %c0_58 = arith.constant 0 : index
    %53 = vector.load %arg2[%c2_55, %c0_56, %c0_57, %c0_58] : memref<3x3x3x32xbf16, #tpu.memory_space<vmem>>, vector<1x1x3x32xbf16>
    %54 = vector.shape_cast %53 : vector<1x1x3x32xbf16> to vector<3x32xbf16>
    %cst_59 = arith.constant dense<0.000000e+00> : vector<256x32xf32>
    %55 = tpu.matmul %52, %54, %cst_59 {dimension_numbers = #tpu.dot_dimension_numbers<[1], [0], [0], [1], [0, 0, 1, 1], [], []>} : vector<256x3xbf16>, vector<3x32xbf16>, vector<256x32xf32> -> vector<256x32xf32>
    %56 = arith.addf %48, %55 : vector<256x32xf32>
    %c0_60 = arith.constant 0 : index
    %c2_61 = arith.constant 2 : index
    %c1_62 = arith.constant 1 : index
    %c0_63 = arith.constant 0 : index
    %57 = vector.load %arg1[%c0_60, %c2_61, %c1_62, %c0_63] : memref<1x18x18x3xf32, #tpu.memory_space<vmem>>, vector<1x16x16x3xf32>
    %58 = vector.shape_cast %57 : vector<1x16x16x3xf32> to vector<16x16x3xf32>
    %59 = vector.shape_cast %58 : vector<16x16x3xf32> to vector<256x3xf32>
    %60 = arith.truncf %59 : vector<256x3xf32> to vector<256x3xbf16>
    %c2_64 = arith.constant 2 : index
    %c1_65 = arith.constant 1 : index
    %c0_66 = arith.constant 0 : index
    %c0_67 = arith.constant 0 : index
    %61 = vector.load %arg2[%c2_64, %c1_65, %c0_66, %c0_67] : memref<3x3x3x32xbf16, #tpu.memory_space<vmem>>, vector<1x1x3x32xbf16>
    %62 = vector.shape_cast %61 : vector<1x1x3x32xbf16> to vector<3x32xbf16>
    %cst_68 = arith.constant dense<0.000000e+00> : vector<256x32xf32>
    %63 = tpu.matmul %60, %62, %cst_68 {dimension_numbers = #tpu.dot_dimension_numbers<[1], [0], [0], [1], [0, 0, 1, 1], [], []>} : vector<256x3xbf16>, vector<3x32xbf16>, vector<256x32xf32> -> vector<256x32xf32>
    %64 = arith.addf %56, %63 : vector<256x32xf32>
    %c0_69 = arith.constant 0 : index
    %c2_70 = arith.constant 2 : index
    %c2_71 = arith.constant 2 : index
    %c0_72 = arith.constant 0 : index
    %65 = vector.load %arg1[%c0_69, %c2_70, %c2_71, %c0_72] : memref<1x18x18x3xf32, #tpu.memory_space<vmem>>, vector<1x16x16x3xf32>
    %66 = vector.shape_cast %65 : vector<1x16x16x3xf32> to vector<16x16x3xf32>
    %67 = vector.shape_cast %66 : vector<16x16x3xf32> to vector<256x3xf32>
    %68 = arith.truncf %67 : vector<256x3xf32> to vector<256x3xbf16>
    %c2_73 = arith.constant 2 : index
    %c2_74 = arith.constant 2 : index
    %c0_75 = arith.constant 0 : index
    %c0_76 = arith.constant 0 : index
    %69 = vector.load %arg2[%c2_73, %c2_74, %c0_75, %c0_76] : memref<3x3x3x32xbf16, #tpu.memory_space<vmem>>, vector<1x1x3x32xbf16>
    %70 = vector.shape_cast %69 : vector<1x1x3x32xbf16> to vector<3x32xbf16>
    %cst_77 = arith.constant dense<0.000000e+00> : vector<256x32xf32>
    %71 = tpu.matmul %68, %70, %cst_77 {dimension_numbers = #tpu.dot_dimension_numbers<[1], [0], [0], [1], [0, 0, 1, 1], [], []>} : vector<256x3xbf16>, vector<3x32xbf16>, vector<256x32xf32> -> vector<256x32xf32>
    %72 = arith.addf %64, %71 : vector<256x32xf32>
    %c0_78 = arith.constant 0 : index
    %c0_79 = arith.constant 0 : index
    %73 = vector.load %arg3[%c0_78, %c0_79] : memref<1x32xf32, #tpu.memory_space<vmem>>, vector<1x32xf32>
    %74 = vector.broadcast %73 : vector<1x32xf32> to vector<256x32xf32>
    %75 = arith.addf %72, %74 : vector<256x32xf32>
    %cst_80 = arith.constant 0.000000e+00 : f32
    %76 = vector.broadcast %cst_80 : f32 to vector<256x32xf32>
    %77 = arith.maximumf %75, %76 : vector<256x32xf32>
    %78 = vector.shape_cast %77 : vector<256x32xf32> to vector<8x32x32xf32>
    %79 = vector.extract_strided_slice %78 {offsets = [0, 0, 0], sizes = [8, 16, 32], strides = [1, 1, 1]} : vector<8x32x32xf32> to vector<8x16x32xf32>
    %80 = vector.extract_strided_slice %78 {offsets = [0, 16, 0], sizes = [8, 16, 32], strides = [1, 1, 1]} : vector<8x32x32xf32> to vector<8x16x32xf32>
    %81 = arith.maximumf %79, %80 : vector<8x16x32xf32>
    %82 = vector.shape_cast %81 : vector<8x16x32xf32> to vector<128x32xf32>
    %c0_81 = arith.constant 0 : index
    %c0_82 = arith.constant 0 : index
    %83 = vector.load %arg5[%c0_81, %c0_82] : memref<128x32xf32, #tpu.memory_space<vmem>>, vector<128x32xf32>
    tpu.vector_store %arg5[%c0_81, %c0_82], %82 {strides = array<i32>} : memref<128x32xf32, #tpu.memory_space<vmem>>, vector<128x32xf32>,
    %c0_83 = arith.constant 0 : index
    %c0_84 = arith.constant 0 : index
    %84 = tpu.strided_load %arg5[%c0_83, %c0_84] {strides = array<i32: 2, 1>} : memref<128x32xf32, #tpu.memory_space<vmem>>, vector<64x32xf32>
    %c1_85 = arith.constant 1 : index
    %c0_86 = arith.constant 0 : index
    %85 = tpu.strided_load %arg5[%c1_85, %c0_86] {strides = array<i32: 2, 1>} : memref<128x32xf32, #tpu.memory_space<vmem>>, vector<64x32xf32>
    %86 = arith.maximumf %84, %85 : vector<64x32xf32>
    %c0_87 = arith.constant 0 : index
    %c0_88 = arith.constant 0 : index
    %c0_89 = arith.constant 0 : index
    %87 = vector.load %arg4[%c0_87, %c0_88, %c0_89] : memref<1x64x32xf32, #tpu.memory_space<vmem>>, vector<1x64x32xf32>
    %88 = vector.shape_cast %87 : vector<1x64x32xf32> to vector<64x32xf32>
    %89 = vector.shape_cast %86 : vector<64x32xf32> to vector<1x64x32xf32>
    tpu.vector_store %arg4[%c0_87, %c0_88, %c0_89], %89 {strides = array<i32>} : memref<1x64x32xf32, #tpu.memory_space<vmem>>, vector<1x64x32xf32>,
    return
  }
  func.func @transform_0(%arg0: i32) -> (i32, i32, i32, i32) {
    %c0_i32 = arith.constant 0 : i32
    %c0_i32_0 = arith.constant 0 : i32
    %c0_i32_1 = arith.constant 0 : i32
    %c0_i32_2 = arith.constant 0 : i32
    return %arg0, %c0_i32, %c0_i32_0, %c0_i32_1 : i32, i32, i32, i32
  }
  func.func @transform_1(%arg0: i32) -> (i32, i32, i32, i32) {
    %c0_i32 = arith.constant 0 : i32
    %c0_i32_0 = arith.constant 0 : i32
    %c0_i32_1 = arith.constant 0 : i32
    %c0_i32_2 = arith.constant 0 : i32
    %c0_i32_3 = arith.constant 0 : i32
    return %c0_i32, %c0_i32_0, %c0_i32_1, %c0_i32_2 : i32, i32, i32, i32
  }
  func.func @transform_2(%arg0: i32) -> (i32, i32) {
    %c0_i32 = arith.constant 0 : i32
    %c0_i32_0 = arith.constant 0 : i32
    %c0_i32_1 = arith.constant 0 : i32
    return %c0_i32, %c0_i32_0 : i32, i32
  }
  func.func @transform_3(%arg0: i32) -> (i32, i32, i32) {
    %c0_i32 = arith.constant 0 : i32
    %c0_i32_0 = arith.constant 0 : i32
    %c0_i32_1 = arith.constant 0 : i32
    return %arg0, %c0_i32, %c0_i32_0 : i32, i32, i32
  }
}

module attributes {stable_mosaic.version = 11 : i64} {
  func.func @_conv_relu_pool_kernel(%arg0: i32, %arg1: memref<1x10x10x32xf32, #tpu.memory_space<vmem>>, %arg2: memref<3x3x32x64xbf16, #tpu.memory_space<vmem>>, %arg3: memref<1x64xf32, #tpu.memory_space<vmem>>, %arg4: memref<1x16x64xf32, #tpu.memory_space<vmem>>, %arg5: memref<32x64xf32, #tpu.memory_space<vmem>>) attributes {dimension_semantics = [#tpu.dimension_semantics<parallel>], iteration_bounds = array<i64: 2>, scalar_prefetch = 0 : i64, scratch_operands = 1 : i64, tpu.core_type = #tpu.core_type<tc>, window_params = [{transform_indices = @transform_0, window_bounds = array<i64: 1, 10, 10, 32>}, {pipeline_mode = #tpu.pipeline_mode<synchronous>, transform_indices = @transform_1, window_bounds = array<i64: 3, 3, 32, 64>}, {pipeline_mode = #tpu.pipeline_mode<synchronous>, transform_indices = @transform_2, window_bounds = array<i64: 1, 64>}, {transform_indices = @transform_3, window_bounds = array<i64: 1, 16, 64>}]} {
    %cst = arith.constant 0.000000e+00 : f32
    %0 = vector.broadcast %cst : f32 to vector<64x64xf32>
    %c0 = arith.constant 0 : index
    %c0_0 = arith.constant 0 : index
    %c0_1 = arith.constant 0 : index
    %c0_2 = arith.constant 0 : index
    %1 = vector.load %arg1[%c0, %c0_0, %c0_1, %c0_2] : memref<1x10x10x32xf32, #tpu.memory_space<vmem>>, vector<1x8x8x32xf32>
    %2 = vector.shape_cast %1 : vector<1x8x8x32xf32> to vector<8x8x32xf32>
    %3 = vector.shape_cast %2 : vector<8x8x32xf32> to vector<64x32xf32>
    %4 = arith.truncf %3 : vector<64x32xf32> to vector<64x32xbf16>
    %c0_3 = arith.constant 0 : index
    %c0_4 = arith.constant 0 : index
    %c0_5 = arith.constant 0 : index
    %c0_6 = arith.constant 0 : index
    %5 = vector.load %arg2[%c0_3, %c0_4, %c0_5, %c0_6] : memref<3x3x32x64xbf16, #tpu.memory_space<vmem>>, vector<1x1x32x64xbf16>
    %6 = vector.shape_cast %5 : vector<1x1x32x64xbf16> to vector<32x64xbf16>
    %cst_7 = arith.constant dense<0.000000e+00> : vector<64x64xf32>
    %7 = tpu.matmul %4, %6, %cst_7 {dimension_numbers = #tpu.dot_dimension_numbers<[1], [0], [0], [1], [0, 0, 1, 1], [], []>} : vector<64x32xbf16>, vector<32x64xbf16>, vector<64x64xf32> -> vector<64x64xf32>
    %8 = arith.addf %0, %7 : vector<64x64xf32>
    %c0_8 = arith.constant 0 : index
    %c0_9 = arith.constant 0 : index
    %c1 = arith.constant 1 : index
    %c0_10 = arith.constant 0 : index
    %9 = vector.load %arg1[%c0_8, %c0_9, %c1, %c0_10] : memref<1x10x10x32xf32, #tpu.memory_space<vmem>>, vector<1x8x8x32xf32>
    %10 = vector.shape_cast %9 : vector<1x8x8x32xf32> to vector<8x8x32xf32>
    %11 = vector.shape_cast %10 : vector<8x8x32xf32> to vector<64x32xf32>
    %12 = arith.truncf %11 : vector<64x32xf32> to vector<64x32xbf16>
    %c0_11 = arith.constant 0 : index
    %c1_12 = arith.constant 1 : index
    %c0_13 = arith.constant 0 : index
    %c0_14 = arith.constant 0 : index
    %13 = vector.load %arg2[%c0_11, %c1_12, %c0_13, %c0_14] : memref<3x3x32x64xbf16, #tpu.memory_space<vmem>>, vector<1x1x32x64xbf16>
    %14 = vector.shape_cast %13 : vector<1x1x32x64xbf16> to vector<32x64xbf16>
    %cst_15 = arith.constant dense<0.000000e+00> : vector<64x64xf32>
    %15 = tpu.matmul %12, %14, %cst_15 {dimension_numbers = #tpu.dot_dimension_numbers<[1], [0], [0], [1], [0, 0, 1, 1], [], []>} : vector<64x32xbf16>, vector<32x64xbf16>, vector<64x64xf32> -> vector<64x64xf32>
    %16 = arith.addf %8, %15 : vector<64x64xf32>
    %c0_16 = arith.constant 0 : index
    %c0_17 = arith.constant 0 : index
    %c2 = arith.constant 2 : index
    %c0_18 = arith.constant 0 : index
    %17 = vector.load %arg1[%c0_16, %c0_17, %c2, %c0_18] : memref<1x10x10x32xf32, #tpu.memory_space<vmem>>, vector<1x8x8x32xf32>
    %18 = vector.shape_cast %17 : vector<1x8x8x32xf32> to vector<8x8x32xf32>
    %19 = vector.shape_cast %18 : vector<8x8x32xf32> to vector<64x32xf32>
    %20 = arith.truncf %19 : vector<64x32xf32> to vector<64x32xbf16>
    %c0_19 = arith.constant 0 : index
    %c2_20 = arith.constant 2 : index
    %c0_21 = arith.constant 0 : index
    %c0_22 = arith.constant 0 : index
    %21 = vector.load %arg2[%c0_19, %c2_20, %c0_21, %c0_22] : memref<3x3x32x64xbf16, #tpu.memory_space<vmem>>, vector<1x1x32x64xbf16>
    %22 = vector.shape_cast %21 : vector<1x1x32x64xbf16> to vector<32x64xbf16>
    %cst_23 = arith.constant dense<0.000000e+00> : vector<64x64xf32>
    %23 = tpu.matmul %20, %22, %cst_23 {dimension_numbers = #tpu.dot_dimension_numbers<[1], [0], [0], [1], [0, 0, 1, 1], [], []>} : vector<64x32xbf16>, vector<32x64xbf16>, vector<64x64xf32> -> vector<64x64xf32>
    %24 = arith.addf %16, %23 : vector<64x64xf32>
    %c0_24 = arith.constant 0 : index
    %c1_25 = arith.constant 1 : index
    %c0_26 = arith.constant 0 : index
    %c0_27 = arith.constant 0 : index
    %25 = vector.load %arg1[%c0_24, %c1_25, %c0_26, %c0_27] : memref<1x10x10x32xf32, #tpu.memory_space<vmem>>, vector<1x8x8x32xf32>
    %26 = vector.shape_cast %25 : vector<1x8x8x32xf32> to vector<8x8x32xf32>
    %27 = vector.shape_cast %26 : vector<8x8x32xf32> to vector<64x32xf32>
    %28 = arith.truncf %27 : vector<64x32xf32> to vector<64x32xbf16>
    %c1_28 = arith.constant 1 : index
    %c0_29 = arith.constant 0 : index
    %c0_30 = arith.constant 0 : index
    %c0_31 = arith.constant 0 : index
    %29 = vector.load %arg2[%c1_28, %c0_29, %c0_30, %c0_31] : memref<3x3x32x64xbf16, #tpu.memory_space<vmem>>, vector<1x1x32x64xbf16>
    %30 = vector.shape_cast %29 : vector<1x1x32x64xbf16> to vector<32x64xbf16>
    %cst_32 = arith.constant dense<0.000000e+00> : vector<64x64xf32>
    %31 = tpu.matmul %28, %30, %cst_32 {dimension_numbers = #tpu.dot_dimension_numbers<[1], [0], [0], [1], [0, 0, 1, 1], [], []>} : vector<64x32xbf16>, vector<32x64xbf16>, vector<64x64xf32> -> vector<64x64xf32>
    %32 = arith.addf %24, %31 : vector<64x64xf32>
    %c0_33 = arith.constant 0 : index
    %c1_34 = arith.constant 1 : index
    %c1_35 = arith.constant 1 : index
    %c0_36 = arith.constant 0 : index
    %33 = vector.load %arg1[%c0_33, %c1_34, %c1_35, %c0_36] : memref<1x10x10x32xf32, #tpu.memory_space<vmem>>, vector<1x8x8x32xf32>
    %34 = vector.shape_cast %33 : vector<1x8x8x32xf32> to vector<8x8x32xf32>
    %35 = vector.shape_cast %34 : vector<8x8x32xf32> to vector<64x32xf32>
    %36 = arith.truncf %35 : vector<64x32xf32> to vector<64x32xbf16>
    %c1_37 = arith.constant 1 : index
    %c1_38 = arith.constant 1 : index
    %c0_39 = arith.constant 0 : index
    %c0_40 = arith.constant 0 : index
    %37 = vector.load %arg2[%c1_37, %c1_38, %c0_39, %c0_40] : memref<3x3x32x64xbf16, #tpu.memory_space<vmem>>, vector<1x1x32x64xbf16>
    %38 = vector.shape_cast %37 : vector<1x1x32x64xbf16> to vector<32x64xbf16>
    %cst_41 = arith.constant dense<0.000000e+00> : vector<64x64xf32>
    %39 = tpu.matmul %36, %38, %cst_41 {dimension_numbers = #tpu.dot_dimension_numbers<[1], [0], [0], [1], [0, 0, 1, 1], [], []>} : vector<64x32xbf16>, vector<32x64xbf16>, vector<64x64xf32> -> vector<64x64xf32>
    %40 = arith.addf %32, %39 : vector<64x64xf32>
    %c0_42 = arith.constant 0 : index
    %c1_43 = arith.constant 1 : index
    %c2_44 = arith.constant 2 : index
    %c0_45 = arith.constant 0 : index
    %41 = vector.load %arg1[%c0_42, %c1_43, %c2_44, %c0_45] : memref<1x10x10x32xf32, #tpu.memory_space<vmem>>, vector<1x8x8x32xf32>
    %42 = vector.shape_cast %41 : vector<1x8x8x32xf32> to vector<8x8x32xf32>
    %43 = vector.shape_cast %42 : vector<8x8x32xf32> to vector<64x32xf32>
    %44 = arith.truncf %43 : vector<64x32xf32> to vector<64x32xbf16>
    %c1_46 = arith.constant 1 : index
    %c2_47 = arith.constant 2 : index
    %c0_48 = arith.constant 0 : index
    %c0_49 = arith.constant 0 : index
    %45 = vector.load %arg2[%c1_46, %c2_47, %c0_48, %c0_49] : memref<3x3x32x64xbf16, #tpu.memory_space<vmem>>, vector<1x1x32x64xbf16>
    %46 = vector.shape_cast %45 : vector<1x1x32x64xbf16> to vector<32x64xbf16>
    %cst_50 = arith.constant dense<0.000000e+00> : vector<64x64xf32>
    %47 = tpu.matmul %44, %46, %cst_50 {dimension_numbers = #tpu.dot_dimension_numbers<[1], [0], [0], [1], [0, 0, 1, 1], [], []>} : vector<64x32xbf16>, vector<32x64xbf16>, vector<64x64xf32> -> vector<64x64xf32>
    %48 = arith.addf %40, %47 : vector<64x64xf32>
    %c0_51 = arith.constant 0 : index
    %c2_52 = arith.constant 2 : index
    %c0_53 = arith.constant 0 : index
    %c0_54 = arith.constant 0 : index
    %49 = vector.load %arg1[%c0_51, %c2_52, %c0_53, %c0_54] : memref<1x10x10x32xf32, #tpu.memory_space<vmem>>, vector<1x8x8x32xf32>
    %50 = vector.shape_cast %49 : vector<1x8x8x32xf32> to vector<8x8x32xf32>
    %51 = vector.shape_cast %50 : vector<8x8x32xf32> to vector<64x32xf32>
    %52 = arith.truncf %51 : vector<64x32xf32> to vector<64x32xbf16>
    %c2_55 = arith.constant 2 : index
    %c0_56 = arith.constant 0 : index
    %c0_57 = arith.constant 0 : index
    %c0_58 = arith.constant 0 : index
    %53 = vector.load %arg2[%c2_55, %c0_56, %c0_57, %c0_58] : memref<3x3x32x64xbf16, #tpu.memory_space<vmem>>, vector<1x1x32x64xbf16>
    %54 = vector.shape_cast %53 : vector<1x1x32x64xbf16> to vector<32x64xbf16>
    %cst_59 = arith.constant dense<0.000000e+00> : vector<64x64xf32>
    %55 = tpu.matmul %52, %54, %cst_59 {dimension_numbers = #tpu.dot_dimension_numbers<[1], [0], [0], [1], [0, 0, 1, 1], [], []>} : vector<64x32xbf16>, vector<32x64xbf16>, vector<64x64xf32> -> vector<64x64xf32>
    %56 = arith.addf %48, %55 : vector<64x64xf32>
    %c0_60 = arith.constant 0 : index
    %c2_61 = arith.constant 2 : index
    %c1_62 = arith.constant 1 : index
    %c0_63 = arith.constant 0 : index
    %57 = vector.load %arg1[%c0_60, %c2_61, %c1_62, %c0_63] : memref<1x10x10x32xf32, #tpu.memory_space<vmem>>, vector<1x8x8x32xf32>
    %58 = vector.shape_cast %57 : vector<1x8x8x32xf32> to vector<8x8x32xf32>
    %59 = vector.shape_cast %58 : vector<8x8x32xf32> to vector<64x32xf32>
    %60 = arith.truncf %59 : vector<64x32xf32> to vector<64x32xbf16>
    %c2_64 = arith.constant 2 : index
    %c1_65 = arith.constant 1 : index
    %c0_66 = arith.constant 0 : index
    %c0_67 = arith.constant 0 : index
    %61 = vector.load %arg2[%c2_64, %c1_65, %c0_66, %c0_67] : memref<3x3x32x64xbf16, #tpu.memory_space<vmem>>, vector<1x1x32x64xbf16>
    %62 = vector.shape_cast %61 : vector<1x1x32x64xbf16> to vector<32x64xbf16>
    %cst_68 = arith.constant dense<0.000000e+00> : vector<64x64xf32>
    %63 = tpu.matmul %60, %62, %cst_68 {dimension_numbers = #tpu.dot_dimension_numbers<[1], [0], [0], [1], [0, 0, 1, 1], [], []>} : vector<64x32xbf16>, vector<32x64xbf16>, vector<64x64xf32> -> vector<64x64xf32>
    %64 = arith.addf %56, %63 : vector<64x64xf32>
    %c0_69 = arith.constant 0 : index
    %c2_70 = arith.constant 2 : index
    %c2_71 = arith.constant 2 : index
    %c0_72 = arith.constant 0 : index
    %65 = vector.load %arg1[%c0_69, %c2_70, %c2_71, %c0_72] : memref<1x10x10x32xf32, #tpu.memory_space<vmem>>, vector<1x8x8x32xf32>
    %66 = vector.shape_cast %65 : vector<1x8x8x32xf32> to vector<8x8x32xf32>
    %67 = vector.shape_cast %66 : vector<8x8x32xf32> to vector<64x32xf32>
    %68 = arith.truncf %67 : vector<64x32xf32> to vector<64x32xbf16>
    %c2_73 = arith.constant 2 : index
    %c2_74 = arith.constant 2 : index
    %c0_75 = arith.constant 0 : index
    %c0_76 = arith.constant 0 : index
    %69 = vector.load %arg2[%c2_73, %c2_74, %c0_75, %c0_76] : memref<3x3x32x64xbf16, #tpu.memory_space<vmem>>, vector<1x1x32x64xbf16>
    %70 = vector.shape_cast %69 : vector<1x1x32x64xbf16> to vector<32x64xbf16>
    %cst_77 = arith.constant dense<0.000000e+00> : vector<64x64xf32>
    %71 = tpu.matmul %68, %70, %cst_77 {dimension_numbers = #tpu.dot_dimension_numbers<[1], [0], [0], [1], [0, 0, 1, 1], [], []>} : vector<64x32xbf16>, vector<32x64xbf16>, vector<64x64xf32> -> vector<64x64xf32>
    %72 = arith.addf %64, %71 : vector<64x64xf32>
    %c0_78 = arith.constant 0 : index
    %c0_79 = arith.constant 0 : index
    %73 = vector.load %arg3[%c0_78, %c0_79] : memref<1x64xf32, #tpu.memory_space<vmem>>, vector<1x64xf32>
    %74 = vector.broadcast %73 : vector<1x64xf32> to vector<64x64xf32>
    %75 = arith.addf %72, %74 : vector<64x64xf32>
    %cst_80 = arith.constant 0.000000e+00 : f32
    %76 = vector.broadcast %cst_80 : f32 to vector<64x64xf32>
    %77 = arith.maximumf %75, %76 : vector<64x64xf32>
    %78 = vector.shape_cast %77 : vector<64x64xf32> to vector<4x16x64xf32>
    %79 = vector.extract_strided_slice %78 {offsets = [0, 0, 0], sizes = [4, 8, 64], strides = [1, 1, 1]} : vector<4x16x64xf32> to vector<4x8x64xf32>
    %80 = vector.extract_strided_slice %78 {offsets = [0, 8, 0], sizes = [4, 8, 64], strides = [1, 1, 1]} : vector<4x16x64xf32> to vector<4x8x64xf32>
    %81 = arith.maximumf %79, %80 : vector<4x8x64xf32>
    %82 = vector.shape_cast %81 : vector<4x8x64xf32> to vector<32x64xf32>
    %c0_81 = arith.constant 0 : index
    %c0_82 = arith.constant 0 : index
    %83 = vector.load %arg5[%c0_81, %c0_82] : memref<32x64xf32, #tpu.memory_space<vmem>>, vector<32x64xf32>
    tpu.vector_store %arg5[%c0_81, %c0_82], %82 {strides = array<i32>} : memref<32x64xf32, #tpu.memory_space<vmem>>, vector<32x64xf32>,
    %c0_83 = arith.constant 0 : index
    %c0_84 = arith.constant 0 : index
    %84 = tpu.strided_load %arg5[%c0_83, %c0_84] {strides = array<i32: 2, 1>} : memref<32x64xf32, #tpu.memory_space<vmem>>, vector<16x64xf32>
    %c1_85 = arith.constant 1 : index
    %c0_86 = arith.constant 0 : index
    %85 = tpu.strided_load %arg5[%c1_85, %c0_86] {strides = array<i32: 2, 1>} : memref<32x64xf32, #tpu.memory_space<vmem>>, vector<16x64xf32>
    %86 = arith.maximumf %84, %85 : vector<16x64xf32>
    %c0_87 = arith.constant 0 : index
    %c0_88 = arith.constant 0 : index
    %c0_89 = arith.constant 0 : index
    %87 = vector.load %arg4[%c0_87, %c0_88, %c0_89] : memref<1x16x64xf32, #tpu.memory_space<vmem>>, vector<1x16x64xf32>
    %88 = vector.shape_cast %87 : vector<1x16x64xf32> to vector<16x64xf32>
    %89 = vector.shape_cast %86 : vector<16x64xf32> to vector<1x16x64xf32>
    tpu.vector_store %arg4[%c0_87, %c0_88, %c0_89], %89 {strides = array<i32>} : memref<1x16x64xf32, #tpu.memory_space<vmem>>, vector<1x16x64xf32>,
    return
  }
  func.func @transform_0(%arg0: i32) -> (i32, i32, i32, i32) {
    %c0_i32 = arith.constant 0 : i32
    %c0_i32_0 = arith.constant 0 : i32
    %c0_i32_1 = arith.constant 0 : i32
    %c0_i32_2 = arith.constant 0 : i32
    return %arg0, %c0_i32, %c0_i32_0, %c0_i32_1 : i32, i32, i32, i32
  }
  func.func @transform_1(%arg0: i32) -> (i32, i32, i32, i32) {
    %c0_i32 = arith.constant 0 : i32
    %c0_i32_0 = arith.constant 0 : i32
    %c0_i32_1 = arith.constant 0 : i32
    %c0_i32_2 = arith.constant 0 : i32
    %c0_i32_3 = arith.constant 0 : i32
    return %c0_i32, %c0_i32_0, %c0_i32_1, %c0_i32_2 : i32, i32, i32, i32
  }
  func.func @transform_2(%arg0: i32) -> (i32, i32) {
    %c0_i32 = arith.constant 0 : i32
    %c0_i32_0 = arith.constant 0 : i32
    %c0_i32_1 = arith.constant 0 : i32
    return %c0_i32, %c0_i32_0 : i32, i32
  }
  func.func @transform_3(%arg0: i32) -> (i32, i32, i32) {
    %c0_i32 = arith.constant 0 : i32
    %c0_i32_0 = arith.constant 0 : i32
    %c0_i32_1 = arith.constant 0 : i32
    return %arg0, %c0_i32, %c0_i32_0 : i32, i32, i32
  }
}

module attributes {stable_mosaic.version = 11 : i64} {
  func.func @_fc_fused_kernel(%arg0: i32, %arg1: memref<2x512xf32, #tpu.memory_space<vmem>>, %arg2: memref<512x1024xbf16, #tpu.memory_space<vmem>>, %arg3: memref<1x1024xf32, #tpu.memory_space<vmem>>, %arg4: memref<1024x2xbf16, #tpu.memory_space<vmem>>, %arg5: memref<1x2xf32, #tpu.memory_space<vmem>>, %arg6: memref<2x2xf32, #tpu.memory_space<vmem>>, %arg7: memref<2x1024xf32, #tpu.memory_space<vmem>>) attributes {dimension_semantics = [#tpu.dimension_semantics<arbitrary>], iteration_bounds = array<i64: 2>, scalar_prefetch = 0 : i64, scratch_operands = 1 : i64, tpu.core_type = #tpu.core_type<tc>, window_params = [{transform_indices = @transform_0, window_bounds = array<i64: 2, 512>}, {transform_indices = @transform_1, window_bounds = array<i64: 512, 1024>}, {pipeline_mode = #tpu.pipeline_mode<synchronous>, transform_indices = @transform_2, window_bounds = array<i64: 1, 1024>}, {pipeline_mode = #tpu.pipeline_mode<synchronous>, transform_indices = @transform_3, window_bounds = array<i64: 1024, 2>}, {pipeline_mode = #tpu.pipeline_mode<synchronous>, transform_indices = @transform_4, window_bounds = array<i64: 1, 2>}, {pipeline_mode = #tpu.pipeline_mode<synchronous>, transform_indices = @transform_5, window_bounds = array<i64: 2, 2>}]} {
    %c0_i32 = arith.constant 0 : i32
    %0 = arith.cmpi eq, %arg0, %c0_i32 : i32
    %1 = arith.extui %0 : i1 to i32
    %c0_i32_0 = arith.constant 0 : i32
    %2 = arith.cmpi ne, %1, %c0_i32_0 : i32
    scf.if %2 {
      %cst_9 = arith.constant 0.000000e+00 : f32
      %13 = vector.broadcast %cst_9 : f32 to vector<2x1024xf32>
      %c0_10 = arith.constant 0 : index
      %c0_11 = arith.constant 0 : index
      %14 = vector.load %arg7[%c0_10, %c0_11] : memref<2x1024xf32, #tpu.memory_space<vmem>>, vector<2x1024xf32>
      tpu.vector_store %arg7[%c0_10, %c0_11], %13 {strides = array<i32>} : memref<2x1024xf32, #tpu.memory_space<vmem>>, vector<2x1024xf32>,
    } else {
    }
    %c0 = arith.constant 0 : index
    %c0_1 = arith.constant 0 : index
    %3 = vector.load %arg7[%c0, %c0_1] : memref<2x1024xf32, #tpu.memory_space<vmem>>, vector<2x1024xf32>
    %c0_2 = arith.constant 0 : index
    %c0_3 = arith.constant 0 : index
    %4 = vector.load %arg1[%c0_2, %c0_3] : memref<2x512xf32, #tpu.memory_space<vmem>>, vector<2x512xf32>
    %5 = arith.truncf %4 : vector<2x512xf32> to vector<2x512xbf16>
    %c0_4 = arith.constant 0 : index
    %c0_5 = arith.constant 0 : index
    %6 = vector.load %arg2[%c0_4, %c0_5] : memref<512x1024xbf16, #tpu.memory_space<vmem>>, vector<512x1024xbf16>
    %cst = arith.constant dense<0.000000e+00> : vector<2x1024xf32>
    %7 = tpu.matmul %5, %6, %cst {dimension_numbers = #tpu.dot_dimension_numbers<[1], [0], [0], [1], [0, 0, 1, 1], [], []>} : vector<2x512xbf16>, vector<512x1024xbf16>, vector<2x1024xf32> -> vector<2x1024xf32>
    %8 = arith.addf %3, %7 : vector<2x1024xf32>
    %c0_6 = arith.constant 0 : index
    %c0_7 = arith.constant 0 : index
    %9 = vector.load %arg7[%c0_6, %c0_7] : memref<2x1024xf32, #tpu.memory_space<vmem>>, vector<2x1024xf32>
    tpu.vector_store %arg7[%c0_6, %c0_7], %8 {strides = array<i32>} : memref<2x1024xf32, #tpu.memory_space<vmem>>, vector<2x1024xf32>,
    %c1_i32 = arith.constant 1 : i32
    %10 = arith.cmpi eq, %arg0, %c1_i32 : i32
    %11 = arith.extui %10 : i1 to i32
    %c0_i32_8 = arith.constant 0 : i32
    %12 = arith.cmpi ne, %11, %c0_i32_8 : i32
    scf.if %12 {
      %c0_9 = arith.constant 0 : index
      %c0_10 = arith.constant 0 : index
      %13 = vector.load %arg7[%c0_9, %c0_10] : memref<2x1024xf32, #tpu.memory_space<vmem>>, vector<2x1024xf32>
      %c0_11 = arith.constant 0 : index
      %c0_12 = arith.constant 0 : index
      %14 = vector.load %arg3[%c0_11, %c0_12] : memref<1x1024xf32, #tpu.memory_space<vmem>>, vector<1x1024xf32>
      %15 = vector.broadcast %14 : vector<1x1024xf32> to vector<2x1024xf32>
      %16 = arith.addf %13, %15 : vector<2x1024xf32>
      %cst_13 = arith.constant 0.000000e+00 : f32
      %17 = vector.broadcast %cst_13 : f32 to vector<2x1024xf32>
      %18 = arith.maximumf %16, %17 : vector<2x1024xf32>
      %19 = arith.truncf %18 : vector<2x1024xf32> to vector<2x1024xbf16>
      %c0_14 = arith.constant 0 : index
      %c0_15 = arith.constant 0 : index
      %20 = vector.load %arg4[%c0_14, %c0_15] : memref<1024x2xbf16, #tpu.memory_space<vmem>>, vector<1024x2xbf16>
      %cst_16 = arith.constant dense<0.000000e+00> : vector<2x2xf32>
      %21 = tpu.matmul %19, %20, %cst_16 {dimension_numbers = #tpu.dot_dimension_numbers<[1], [0], [0], [1], [0, 0, 1, 1], [], []>} : vector<2x1024xbf16>, vector<1024x2xbf16>, vector<2x2xf32> -> vector<2x2xf32>
      %c0_17 = arith.constant 0 : index
      %c0_18 = arith.constant 0 : index
      %22 = vector.load %arg5[%c0_17, %c0_18] : memref<1x2xf32, #tpu.memory_space<vmem>>, vector<1x2xf32>
      %23 = vector.broadcast %22 : vector<1x2xf32> to vector<2x2xf32>
      %24 = arith.addf %21, %23 : vector<2x2xf32>
      %c0_19 = arith.constant 0 : index
      %c0_20 = arith.constant 0 : index
      %25 = vector.load %arg6[%c0_19, %c0_20] : memref<2x2xf32, #tpu.memory_space<vmem>>, vector<2x2xf32>
      tpu.vector_store %arg6[%c0_19, %c0_20], %24 {strides = array<i32>} : memref<2x2xf32, #tpu.memory_space<vmem>>, vector<2x2xf32>,
    } else {
    }
    return
  }
  func.func @transform_0(%arg0: i32) -> (i32, i32) {
    %c0_i32 = arith.constant 0 : i32
    %c0_i32_0 = arith.constant 0 : i32
    return %c0_i32, %arg0 : i32, i32
  }
  func.func @transform_1(%arg0: i32) -> (i32, i32) {
    %c0_i32 = arith.constant 0 : i32
    %c0_i32_0 = arith.constant 0 : i32
    return %arg0, %c0_i32 : i32, i32
  }
  func.func @transform_2(%arg0: i32) -> (i32, i32) {
    %c0_i32 = arith.constant 0 : i32
    %c0_i32_0 = arith.constant 0 : i32
    %c0_i32_1 = arith.constant 0 : i32
    return %c0_i32, %c0_i32_0 : i32, i32
  }
  func.func @transform_3(%arg0: i32) -> (i32, i32) {
    %c0_i32 = arith.constant 0 : i32
    %c0_i32_0 = arith.constant 0 : i32
    %c0_i32_1 = arith.constant 0 : i32
    return %c0_i32, %c0_i32_0 : i32, i32
  }
  func.func @transform_4(%arg0: i32) -> (i32, i32) {
    %c0_i32 = arith.constant 0 : i32
    %c0_i32_0 = arith.constant 0 : i32
    %c0_i32_1 = arith.constant 0 : i32
    return %c0_i32, %c0_i32_0 : i32, i32
  }
  func.func @transform_5(%arg0: i32) -> (i32, i32) {
    %c0_i32 = arith.constant 0 : i32
    %c0_i32_0 = arith.constant 0 : i32
    %c0_i32_1 = arith.constant 0 : i32
    return %c0_i32, %c0_i32_0 : i32, i32
  }
}

</mosaic_0001>

<bundles_post_ra>
// kernel: wall_detector_forward.4
= control target key start
LH: loop header
LB: loop body
LE: loop exit
PB: predicated region body
PF: predicated region fallthrough
CT: control target
= control target key end

     0   :  { %8 = vsyncpa [#allocation4], 0  ;;  %s1997_s0 = inlined_call_operand.vmem [shape: f32[2,10,10,32], index: 0, kind: input, shape index: {}]   ;;  %s1998_s1 = inlined_call_operand.hbm [shape: bf16[3,3,32,64], index: 1, kind: input, shape index: {}]   ;;  %s1999_s2 = inlined_call_operand.hbm [shape: f32[1,64], index: 2, kind: input, shape index: {}]   ;;  %s2000_s3 = inlined_call_operand.vmem [shape: f32[2,16,64], index: 3, kind: output, shape index: {}]  }
   0x1   :  { %9 = vsyncpa [#allocation6], 0  ;;  %s1758_s12 = smov 0  }
   0x2 LB: > { %s1764_s13 = sadd.s32 4294967295, %s1732_s12   ;;  %p1334_p0 = scmp.ge.s32.totalorder %s1732_s12, 1  ;;  %s1732_s12 = sphi %s1758_s12, %s15_s12  }
   0x3   : > { %p114_p1 = scmp.lt.s32.totalorder %s1732_s12, 3  ;;  %s1734_s14 = smov [#allocation3]  }
   0x4   : > { %s126_s15 = sshll.u32 %s1734_s14, 4  ;;  %p1632_p3 = scmp.eq.s32.totalorder %s1764_s13, 0  ;;  %s127_s15 = int_to_ptr.vmem [resolvable:$true] %s126_s15 }
   0x5   : > { %p1768_p2 = pnand %p1334_p0, %p114_p1  ;;  %s1735_s17 = smov [#allocation5]  }
   0x6   : > { %s140_s18 = sshll.u32 %s1735_s17, 4  ;;  %s1677_s20 = scalar_lea.vmem %s127_s15, 2304  ;;  %s141_s18 = int_to_ptr.vmem [resolvable:$true] %s140_s18 }
   0x7   : > { %p1625_p4 = pneg %p1768_p2  ;;  %p1678_p7 = scmp.ne.s32.totalorder %s127_s15, %s1677_s20 }
   0x8   : > { %p1685_p10 = scmp.lt.s32.totalorder %s127_s15, %s127_s15  ;;  %p1686_p11 = scmp.lt.s32.totalorder %s1677_s20, %s1677_s20 }
   0x9   : > { %p1777_p5 = pnand %p1632_p3, %p1625_p4 }
   0xa   : > { %p1687_p12 = por %p1686_p11, %p1685_p10 }
   0xb   : > { %p1668_p6 = pneg %p1777_p5 }
   0xd   : > { %p1680_p8 = pnand %p1678_p7, %p1668_p6 }
   0xf   : > { %p1681_p9 = pneg %p1680_p8 }
  0x11   : > { %p1688_p13 = pnand %p1687_p12, %p1681_p9 }
  0x13   : > { %1691 = shalt.err (!%p1688_p13)
}
  0x14   : > { %s1736_s21 = smov 64   ;;  %s1737_s22 = smov 4  }
  0x15   : > { %1628 = dma.hbm_to_vmem [thread:$0]  (!%p1777_p5), %s1998_s1, 2304, %s127_s15, [#allocation4], %s1736_s21, %s1736_s21, %s1737_s22  }
  0x16   : > { %s1703_s25 = scalar_lea.vmem %s141_s18, 16  ;;  %s1710_s26 = scalar_lea.vmem %s141_s18, 32 }
  0x17   : > { %p1704_p0 = scmp.ne.s32.totalorder %s141_s18, %s1703_s25  ;;  %p1711_p7 = scmp.lt.s32.totalorder %s141_s18, %s141_s18 }
  0x18   : > { %p1712_p8 = scmp.lt.s32.totalorder %s1710_s26, %s1703_s25 }
  0x19   : > { %p1706_p1 = pnand %p1704_p0, %p1668_p6 }
  0x1a   : > { %p1713_p9 = por %p1712_p8, %p1711_p7 }
  0x1b   : > { %p1707_p4 = pneg %p1706_p1 }
  0x1d   : > { %p1714_p10 = pnand %p1713_p9, %p1707_p4 }
  0x1f   : > { %1717 = shalt.err (!%p1714_p10)
}
  0x20   : > { %1631 = dma.hbm_to_vmem [thread:$0]  (!%p1777_p5), %s1999_s2, 16, %s141_s18, [#allocation6]  }
  0x21   : > { %161 = sbr.rel (%p1768_p2) target bundleno = 337 (0x151), region = 32 }
  0x26   : > { %1723 = dma.done.wait (%p1632_p3), [#allocation4], 2304  }
  0x27   : > { %1725 = vsyncadd (%p1632_p3), [#allocation4], 4294964992 }
  0x28   : > { %1727 = dma.done.wait (%p1632_p3), [#allocation6], 16  }
  0x29   : > { %1729 = vsyncadd (%p1632_p3), [#allocation6], 4294967280  ;;  %p189_p6 = scmp.lt.s32.totalorder %s1764_s13, 1  ;;  %v1648_v0 = vld [vmem:[#allocation3 + $0x18] sm:$0xff]   ;;  %v1649_v1 = vld [vmem:[#allocation3 + $0x10] sm:$0xff]   ;;  %vm245_vm0 = vcmask 261120  }
  0x2a   : > { %1504 = vmatprep.subr.bf16.mxu0 %v1648_v0  ;;  %1612 = vmatprep.subr.bf16.mxu1 %v1648_v0  ;;  %v1650_v12 = vld [vmem:[#allocation3 + $0x8] sm:$0xff]   ;;  %v1652_v16 = vld [vmem:[#allocation3] sm:$0xff]   ;;  %v1654_v28 = vld [vmem:[#allocation3 + $0x38] sm:$0xff]   ;;  %vm1239_vm1 = vcmask 523264  }
  0x2b   : > { %s2004_s13 = smov (!%p189_p6, %s1764_s13), 1  ;;  %1505 = vmatpush3.bf16.msra.mxu0 %v1648_v0  ;;  %1614 = vmatpush3.bf16.msra.mxu1 %v1648_v0  ;;  %v1651_v15 = vld [vmem:[#allocation3 + $0x28] sm:$0xff]   ;;  %v1653_v17 = vld [vmem:[#allocation3 + $0x20] sm:$0xff]   ;;  %v1656_v38 = vld [vmem:[#allocation3 + $0x30] sm:$0xff]  }
  0x2c   : > { %s1616_s29 = smul.u32 160, %s2004_s13  ;;  %1506 = vmatprep.subr.bf16.mxu0 %v1649_v1  ;;  %1613 = vmatprep.subr.bf16.mxu1 %v1649_v1  ;;  %v1655_v29 = vld [vmem:[#allocation3 + $0x48] sm:$0xff]   ;;  %v1657_v41 = vld [vmem:[#allocation3 + $0x40] sm:$0xff]   ;;  %v1658_v44 = vld [vmem:[#allocation3 + $0x58] sm:$0xff]   ;;  %s1449_s6 = sshll.u32 %s2004_s13, 4 }
  0x2d   : > { %v1659_v45 = vld [vmem:[#allocation3 + $0x68] sm:$0xff]   ;;  %v1660_v54 = vld [vmem:[#allocation3 + $0x50] sm:$0xff]   ;;  %v1661_v55 = vld [vmem:[#allocation3 + $0x60] sm:$0xff]   ;;  %s198_s9 = scalar_lea.vmem %s2000_s3, %s1449_s6 }
  0x2e   : > { %s1817_s5 = scalar_lea.vmem %s1997_s0, %s1616_s29  ;;  %v1662_v58 = vld [vmem:[#allocation3 + $0x78] sm:$0xff]   ;;  %v1663_v59 = vld [vmem:[#allocation3 + $0x88] sm:$0xff]  }
  0x2f   : > { %v216_v2 = vld [vmem:[%s1817_s5 + $0x1] sm:$0xff]  ;;  %v1821_v3 = vld [vmem:[%s1817_s5 + $0x11] sm:$0xff]  ;;  %1507 = vmatpush3.bf16.msra.mxu0 %v1649_v1  ;;  %1615 = vmatpush3.bf16.msra.mxu1 %v1649_v1 }
  0x30   : > { %v1824_v4 = vld [vmem:[%s1817_s5 + $0x41] sm:$0xff]  ;;  %v224_v5 = vpack.c.bf16 %v1821_v3, %v216_v2  ;;  %v1828_v6 = vld [vmem:[%s1817_s5 + $0x51] sm:$0xff]  ;;  %1516 = vmatprep.subr.bf16.mxu1 %v1650_v12  ;;  %1528 = vmatprep.subr.bf16.mxu0 %v1651_v15 }
  0x31   : > { %v1831_v7 = vld [vmem:[%s1817_s5 + $0x21] sm:$0xff]  ;;  %v1834_v8 = vld [vmem:[%s1817_s5 + $0x31] sm:$0xff]  ;;  %v1838_v9 = vpack.c.bf16 %v1828_v6, %v1824_v4 }
  0x32   : > { %v1841_v10 = vld [vmem:[%s1817_s5 + $0x61] sm:$0xff]  ;;  %v1844_v11 = vld [vmem:[%s1817_s5 + $0x71] sm:$0xff]  ;;  %1508 = vmatprep.mubr.msk.bf16.mxu0 %vm245_vm0, %v224_v5  ;;  %v1851_v13 = vpack.c.bf16 %v1834_v8, %v1831_v7  ;;  %v649_v49 = vpack.c.bf16 %v1831_v7, %v1821_v3  ;;  %v650_v51 = vpack.c.bf16 %v1824_v4, %v1834_v8 }
  0x33   : > { %1512 = vmatprep.mubr.msk.bf16.mxu1 %vm245_vm0, %v1838_v9  ;;  %v1855_v14 = vpack.c.bf16 %v1844_v11, %v1841_v10  ;;  %v200_v18 = vld [vmem:[%s1817_s5] sm:$0xff]  ;;  %v201_v19 = vld [vmem:[%s1817_s5 + $0x10] sm:$0xff]  ;;  %v651_v53 = vpack.c.bf16 %v1841_v10, %v1828_v6 }
  0x34   : > { %v412_v20 = vld [vmem:[%s1817_s5 + $0x2] sm:$0xff]  ;;  %v1861_v21 = vld [vmem:[%s1817_s5 + $0x12] sm:$0xff]  ;;  %1509 = vmatmul.mubr.msk.bf16.vlgmr.msra.gmra.mxu0 %vm245_vm0, %v1851_v13  ;;  %v208_v22 = vpack.c.bf16 %v201_v19, %v200_v18 }
  0x35   : > { %1513 = vmatmul.mubr.msk.bf16.vlgmr.msra.gmra.mxu1 %vm245_vm0, %v1855_v14  ;;  %v420_v23 = vpack.c.bf16 %v1861_v21, %v412_v20  ;;  %v202_v24 = vld [vmem:[%s1817_s5 + $0x20] sm:$0xff]  ;;  %v203_v25 = vld [vmem:[%s1817_s5 + $0x30] sm:$0xff]  ;;  %1529 = vmatpush3.bf16.msra.mxu0 %v1651_v15 }
  0x36   : > { %v1871_v26 = vld [vmem:[%s1817_s5 + $0x22] sm:$0xff]  ;;  %1517 = vmatpush3.bf16.msra.mxu1 %v1650_v12  ;;  %v1874_v27 = vld [vmem:[%s1817_s5 + $0x32] sm:$0xff]  ;;  %1530 = vmatprep.subr.bf16.mxu0 %v1653_v17  ;;  %v1880_v32 = vpack.c.bf16 %v203_v25, %v202_v24  ;;  %v535_v48 = vpack.c.bf16 %v202_v24, %v201_v19 }
  0x37   : > { %1518 = vmatprep.subr.bf16.mxu1 %v1652_v16  ;;  %1520 = vmatprep.mubr.msk.bf16.mxu1 %vm245_vm0, %v208_v22  ;;  %v204_v30 = vld [vmem:[%s1817_s5 + $0x40] sm:$0xff]  ;;  %v205_v31 = vld [vmem:[%s1817_s5 + $0x50] sm:$0xff]  ;;  %v1884_v33 = vpack.c.bf16 %v1874_v27, %v1871_v26  ;;  %v763_v62 = vpack.c.bf16 %v1871_v26, %v1861_v21 }
  0x38   : > { %1532 = vmatprep.mubr.msk.bf16.mxu0 %vm245_vm0, %v420_v23  ;;  %v1887_v34 = vld [vmem:[%s1817_s5 + $0x42] sm:$0xff]  ;;  %v1890_v35 = vld [vmem:[%s1817_s5 + $0x52] sm:$0xff]  ;;  %v1892_v36 = vpack.c.bf16 %v205_v31, %v204_v30  ;;  %v536_v50 = vpack.c.bf16 %v204_v30, %v203_v25 }
  0x39   : > { %1531 = vmatpush3.bf16.msra.mxu0 %v1653_v17  ;;  %v1896_v37 = vpack.c.bf16 %v1890_v35, %v1887_v34  ;;  %v206_v39 = vld [vmem:[%s1817_s5 + $0x60] sm:$0xff]  ;;  %v207_v40 = vld [vmem:[%s1817_s5 + $0x70] sm:$0xff]  ;;  %v764_v63 = vpack.c.bf16 %v1887_v34, %v1874_v27 }
  0x3a   : > { %1519 = vmatpush3.bf16.msra.mxu1 %v1652_v16  ;;  %1552 = vmatprep.subr.bf16.mxu0 %v1655_v29  ;;  %v418_v42 = vld [vmem:[%s1817_s5 + $0x62] sm:$0xff]  ;;  %v1906_v43 = vld [vmem:[%s1817_s5 + $0x72] sm:$0xff]  ;;  %v211_v46 = vpack.c.bf16 %v207_v40, %v206_v39  ;;  %v537_v52 = vpack.c.bf16 %v206_v39, %v205_v31 }
  0x3b   : > { %1540 = vmatprep.subr.bf16.mxu1 %v1654_v28  ;;  %v1913_v47 = vpack.c.bf16 %v1906_v43, %v418_v42  ;;  %v1369_v56 = vld [vmem:[%s1817_s5 + $0x80] sm:$0xff]  ;;  %v765_v0 = vpack.c.bf16 %v418_v42, %v1890_v35  ;;  %v1664_v1 = vld [vmem:[#allocation3 + $0x70] sm:$0xff]  }
  0x3c   : > { %1533 = vmatmul.mubr.msk.bf16.vlgmr.msra.gmra.mxu0 %vm245_vm0, %v1884_v33  ;;  %v1383_v57 = vld [vmem:[%s1817_s5 + $0x81] sm:$0xff]  ;;  %v538_v60 = vpack.c.bf16 %v1369_v56, %v207_v40  ;;  %v1411_v4 = vld [vmem:[%s1817_s5 + $0x90] sm:$0xff] }
  0x3d   : > { %1521 = vmatmul.mubr.msk.bf16.vlgmr.msra.gmra.mxu1 %vm245_vm0, %v1880_v32  ;;  %1553 = vmatpush3.bf16.msra.mxu0 %v1655_v29  ;;  %v652_v61 = vpack.c.bf16 %v1383_v57, %v1844_v11  ;;  %v1665_v2 = vld [vmem:[#allocation3 + $0x80] sm:$0xff]   ;;  %v881_v6 = vpack.c.bf16 %v1411_v4, %v1369_v56  ;;  %v1425_v7 = vld [vmem:[%s1817_s5 + $0x91] sm:$0xff] }
  0x3e   : > { %1541 = vmatpush3.bf16.msra.mxu1 %v1654_v28  ;;  %1524 = vmatprep.mubr.msk.bf16.mxu1 %vm245_vm0, %v1892_v36  ;;  %v1397_v3 = vld [vmem:[%s1817_s5 + $0x82] sm:$0xff]  ;;  %v1439_v8 = vld [vmem:[%s1817_s5 + $0x92] sm:$0xff]  ;;  %v995_v10 = vpack.c.bf16 %v1425_v7, %v1383_v57 }
  0x3f   : > { %1536 = vmatprep.mubr.msk.bf16.mxu0 %vm245_vm0, %v1896_v37  ;;  %1542 = vmatprep.subr.bf16.mxu1 %v1656_v38  ;;  %v766_v5 = vpack.c.bf16 %v1397_v3, %v1906_v43  ;;  %v1109_v11 = vpack.c.bf16 %v1439_v8, %v1397_v3 }
  0x40   : > { %1554 = vmatprep.subr.bf16.mxu0 %v1657_v41 }
  0x41   : > { %1555 = vmatpush3.bf16.msra.mxu0 %v1657_v41 }
  0x42   : > { %1543 = vmatpush3.bf16.msra.mxu1 %v1656_v38  ;;  %1576 = vmatprep.subr.bf16.mxu0 %v1659_v45 }
  0x43   : > { %1564 = vmatprep.subr.bf16.mxu1 %v1658_v44 }
  0x44   : > { %1537 = vmatmul.mubr.msk.bf16.gmra.mxu0 %vm245_vm0, %v1913_v47 }
  0x45   : > { %1525 = vmatmul.mubr.msk.bf16.gmra.mxu1 %vm245_vm0, %v211_v46  ;;  %1556 = vmatprep.mubr.msk.bf16.mxu0 %vm245_vm0, %v649_v49 }
  0x46   : > { %1544 = vmatprep.mubr.msk.bf16.mxu1 %vm245_vm0, %v535_v48 }
  0x4c   : > { %1557 = vmatmul.mubr.msk.bf16.vlgmr.msra.gmra.mxu0 %vm245_vm0, %v650_v51 }
  0x4d   : > { %1545 = vmatmul.mubr.msk.bf16.vlgmr.msra.gmra.mxu1 %vm245_vm0, %v536_v50  ;;  %1577 = vmatpush3.bf16.msra.mxu0 %v1659_v45 }
  0x4e   : > { %1565 = vmatpush3.bf16.msra.mxu1 %v1658_v44  ;;  %1548 = vmatprep.mubr.msk.bf16.mxu1 %vm245_vm0, %v537_v52 }
  0x4f   : > { %1560 = vmatprep.mubr.msk.bf16.mxu0 %vm245_vm0, %v651_v53  ;;  %1566 = vmatprep.subr.bf16.mxu1 %v1660_v54 }
  0x50   : > { %1578 = vmatprep.subr.bf16.mxu0 %v1661_v55 }
  0x51   : > { %1579 = vmatpush3.bf16.msra.mxu0 %v1661_v55 }
  0x52   : > { %1567 = vmatpush3.bf16.msra.mxu1 %v1660_v54  ;;  %1600 = vmatprep.subr.bf16.mxu0 %v1663_v59 }
  0x53   : > { %1588 = vmatprep.subr.bf16.mxu1 %v1662_v58 }
  0x54   : > { %1561 = vmatmul.mubr.msk.bf16.gmra.mxu0 %vm245_vm0, %v652_v61 }
  0x55   : > { %1549 = vmatmul.mubr.msk.bf16.gmra.mxu1 %vm245_vm0, %v538_v60  ;;  %1580 = vmatprep.mubr.msk.bf16.mxu0 %vm245_vm0, %v1880_v32 }
  0x56   : > { %1568 = vmatprep.mubr.msk.bf16.mxu1 %vm245_vm0, %v763_v62 }
  0x5c   : > { %1581 = vmatmul.mubr.msk.bf16.vlgmr.msra.gmra.mxu0 %vm245_vm0, %v1892_v36 }
  0x5d   : > { %1569 = vmatmul.mubr.msk.bf16.vlgmr.msra.gmra.mxu1 %vm245_vm0, %v764_v63  ;;  %1601 = vmatpush3.bf16.msra.mxu0 %v1663_v59 }
  0x5e   : > { %1589 = vmatpush3.bf16.msra.mxu1 %v1662_v58  ;;  %1572 = vmatprep.mubr.msk.bf16.mxu1 %vm245_vm0, %v765_v0 }
  0x5f   : > { %1584 = vmatprep.mubr.msk.bf16.mxu0 %vm245_vm0, %v211_v46  ;;  %1590 = vmatprep.subr.bf16.mxu1 %v1664_v1 }
  0x60   : > { %1602 = vmatprep.subr.bf16.mxu0 %v1665_v2 }
  0x61   : > { %1603 = vmatpush3.bf16.msra.mxu0 %v1665_v2 }
  0x62   : > { %1591 = vmatpush3.bf16.msra.mxu1 %v1664_v1 }
  0x64   : > { %1585 = vmatmul.mubr.msk.bf16.gmra.mxu0 %vm245_vm0, %v881_v6 }
  0x65   : > { %1573 = vmatmul.mubr.msk.bf16.gmra.mxu1 %vm245_vm0, %v766_v5  ;;  %1604 = vmatprep.mubr.msk.bf16.mxu0 %vm245_vm0, %v1884_v33 }
  0x66   : > { %1592 = vmatprep.mubr.msk.bf16.mxu1 %vm245_vm0, %v1851_v13 }
  0x6c   : > { %1605 = vmatmul.mubr.msk.bf16.vlgmr.msra.gmra.mxu0 %vm245_vm0, %v1896_v37 }
  0x6d   : > { %1593 = vmatmul.mubr.msk.bf16.vlgmr.msra.gmra.mxu1 %vm245_vm0, %v1838_v9  ;;  %1608 = vmatprep.mubr.msk.bf16.mxu0 %vm245_vm0, %v1913_v47 }
  0x6e   : > { %1596 = vmatprep.mubr.msk.bf16.mxu1 %vm245_vm0, %v1855_v14 }
  0x74   : > { %1609 = vmatmul.mubr.msk.bf16.gmra.mxu0 %vm245_vm0, %v1109_v11 }
  0x75   : > { %1597 = vmatmul.mubr.msk.bf16.gmra.mxu1 %vm245_vm0, %v995_v10 }
  0xf4   : > { %v1510_v12 = vpop.f32.mrf.mxu0 }
  0xf5   : > { %v1514_v13 = vpop.f32.mrf.mxu1 }
  0xf6   : > { %v292_v9 = vpop.f32.mrf.mxu0 }
  0xf7   : > { %v308_v15 = vpop.f32.mrf.mxu1 }
  0xf8   : > { %v1511_v16 = vpop.f32.mrf.mxu0 }
  0xf9   : > { %v1969_v17 = vpop.f32.mrf.mxu1 }
  0xfa   : > { %v295_v18 = vpop.f32.mrf.mxu0 }
  0xfb   : > { %v1971_v14 = vpop.f32.mrf.mxu1 }
  0xfc   : > { %v1534_v20 = vpop.f32.mrf.mxu0 }
  0xfd   : > { %v1522_v19 = vpop.f32.mrf.mxu1 }
  0xfe   : > { %v487_v22 = vpop.f32.mrf.mxu0  ;;  %v390_v51 = vadd.f32 %v1522_v19, %v1510_v12 }
  0xff   : > { %v381_v21 = vpop.f32.mrf.mxu1 }
 0x100   : > { %v1535_v24 = vpop.f32.mrf.mxu0  ;;  %v382_v54 = vadd.f32 %v381_v21, %v292_v9  ;;  %v520_v57 = vadd.f32 %v1534_v20, %v390_v51 }
 0x101   : > { %v1523_v23 = vpop.f32.mrf.mxu1 }
 0x102   : > { %v490_v26 = vpop.f32.mrf.mxu0  ;;  %v393_v58 = vadd.f32 %v1523_v23, %v1511_v16  ;;  %v518_v61 = vadd.f32 %v487_v22, %v382_v54 }
 0x103   : > { %v384_v25 = vpop.f32.mrf.mxu1 }
 0x104   : > { %v1538_v28 = vpop.f32.mrf.mxu0  ;;  %v385_v62 = vadd.f32 %v384_v25, %v295_v18  ;;  %v521_v2 = vadd.f32 %v1535_v24, %v393_v58  ;;  %v1446_v58 = vld [vmem:[#allocation5] ss:$0 sm:$0xff] }
 0x105   : > { %v1526_v27 = vpop.f32.mrf.mxu1 }
 0x106   : > { %v503_v30 = vpop.f32.mrf.mxu0  ;;  %v406_v3 = vadd.f32 %v1526_v27, %v1514_v13  ;;  %v519_v8 = vadd.f32 %v490_v26, %v385_v62 }
 0x107   : > { %v397_v29 = vpop.f32.mrf.mxu1 }
 0x108   : > { %v1973_v32 = vpop.f32.mrf.mxu0  ;;  %v398_v5 = vadd.f32 %v397_v29, %v308_v15  ;;  %v524_v19 = vadd.f32 %v1538_v28, %v406_v3 }
 0x109   : > { %v1527_v31 = vpop.f32.mrf.mxu1 }
 0x10a   : > { %v506_v34 = vpop.f32.mrf.mxu0  ;;  %v522_v22 = vadd.f32 %v503_v30, %v398_v5  ;;  %v409_v18 = vadd.f32 %v1527_v31, %v1969_v17 }
 0x10b   : > { %v400_v33 = vpop.f32.mrf.mxu1 }
 0x10c   : > { %v1558_v36 = vpop.f32.mrf.mxu0  ;;  %v401_v23 = vadd.f32 %v400_v33, %v1971_v14  ;;  %v525_v28 = vadd.f32 %v1973_v32, %v409_v18 }
 0x10d   : > { %v1546_v35 = vpop.f32.mrf.mxu1 }
 0x10e   : > { %v716_v38 = vpop.f32.mrf.mxu0  ;;  %v635_v63 = vadd.f32 %v1546_v35, %v520_v57 }
 0x10f   : > { %v602_v37 = vpop.f32.mrf.mxu1 }
 0x110   : > { %v1559_v40 = vpop.f32.mrf.mxu0  ;;  %v633_v4 = vadd.f32 %v602_v37, %v518_v61  ;;  %v749_v10 = vadd.f32 %v1558_v36, %v635_v63 }
 0x111   : > { %v1547_v39 = vpop.f32.mrf.mxu1 }
 0x112   : > { %v719_v42 = vpop.f32.mrf.mxu0  ;;  %v636_v11 = vadd.f32 %v1547_v39, %v521_v2  ;;  %v747_v16 = vadd.f32 %v716_v38, %v633_v4  ;;  %v523_v38 = vadd.f32 %v506_v34, %v401_v23 }
 0x113   : > { %v605_v41 = vpop.f32.mrf.mxu1 }
 0x114   : > { %v1562_v44 = vpop.f32.mrf.mxu0  ;;  %v634_v20 = vadd.f32 %v605_v41, %v519_v8  ;;  %v750_v25 = vadd.f32 %v1559_v40, %v636_v11 }
 0x115   : > { %v1550_v43 = vpop.f32.mrf.mxu1 }
 0x116   : > { %v732_v46 = vpop.f32.mrf.mxu0  ;;  %v639_v15 = vadd.f32 %v1550_v43, %v524_v19  ;;  %v748_v36 = vadd.f32 %v719_v42, %v634_v20 }
 0x117   : > { %v618_v45 = vpop.f32.mrf.mxu1 }
 0x118   : > { %v1975_v48 = vpop.f32.mrf.mxu0  ;;  %v637_v29 = vadd.f32 %v618_v45, %v522_v22  ;;  %v753_v51 = vadd.f32 %v1562_v44, %v639_v15 }
 0x119   : > { %v1551_v47 = vpop.f32.mrf.mxu1 }
 0x11a   : > { %v1977_v50 = vpop.f32.mrf.mxu0  ;;  %v751_v33 = vadd.f32 %v732_v46, %v637_v29 }
 0x11b   : > { %v621_v49 = vpop.f32.mrf.mxu1 }
 0x11c   : > { %v1582_v53 = vpop.f32.mrf.mxu0  ;;  %v638_v40 = vadd.f32 %v621_v49, %v523_v38 }
 0x11d   : > { %v1570_v52 = vpop.f32.mrf.mxu1 }
 0x11e   : > { %v945_v56 = vpop.f32.mrf.mxu0  ;;  %v863_v21 = vadd.f32 %v1570_v52, %v749_v10  ;;  %v640_v52 = vadd.f32 %v1551_v47, %v525_v28 }
 0x11f   : > { %v830_v55 = vpop.f32.mrf.mxu1 }
 0x120   : > { %v1583_v60 = vpop.f32.mrf.mxu0  ;;  %v861_v27 = vadd.f32 %v830_v55, %v747_v16  ;;  %v978_v37 = vadd.f32 %v1582_v53, %v863_v21  ;;  %v754_v44 = vadd.f32 %v1975_v48, %v640_v52 }
 0x121   : > { %v1571_v59 = vpop.f32.mrf.mxu1 }
 0x122   : > { %v948_v1 = vpop.f32.mrf.mxu0  ;;  %v864_v39 = vadd.f32 %v1571_v59, %v750_v25  ;;  %v976_v17 = vadd.f32 %v945_v56, %v861_v27  ;;  %v752_v56 = vadd.f32 %v1977_v50, %v638_v40 }
 0x123   : > { %v833_v0 = vpop.f32.mrf.mxu1 }
 0x124   : > { %v1586_v7 = vpop.f32.mrf.mxu0  ;;  %v862_v31 = vadd.f32 %v833_v0, %v748_v36  ;;  %v979_v45 = vadd.f32 %v1583_v60, %v864_v39 }
 0x125   : > { %v1574_v6 = vpop.f32.mrf.mxu1 }
 0x126   : > { %v961_v9 = vpop.f32.mrf.mxu0  ;;  %v867_v55 = vadd.f32 %v1574_v6, %v753_v51  ;;  %v977_v34 = vadd.f32 %v948_v1, %v862_v31 }
 0x127   : > { %v846_v12 = vpop.f32.mrf.mxu1 }
 0x128   : > { %v1587_v13 = vpop.f32.mrf.mxu0  ;;  %v865_v53 = vadd.f32 %v846_v12, %v751_v33  ;;  %v982_v49 = vadd.f32 %v1586_v7, %v867_v55 }
 0x129   : > { %v1575_v24 = vpop.f32.mrf.mxu1 }
 0x12a   : > { %v964_v35 = vpop.f32.mrf.mxu0  ;;  %v980_v2 = vadd.f32 %v961_v9, %v865_v53  ;;  %v868_v3 = vadd.f32 %v1575_v24, %v754_v44 }
 0x12b   : > { %v849_v26 = vpop.f32.mrf.mxu1 }
 0x12c   : > { %v1606_v30 = vpop.f32.mrf.mxu0  ;;  %v866_v4 = vadd.f32 %v849_v26, %v752_v56  ;;  %v983_v21 = vadd.f32 %v1587_v13, %v868_v3 }
 0x12d   : > { %v1594_v41 = vpop.f32.mrf.mxu1 }
 0x12e   : > { %v1092_v14 = vadd.f32 %v1594_v41, %v978_v37  ;;  %v1173_v54 = vpop.f32.mrf.mxu0  ;;  %v981_v7 = vadd.f32 %v964_v35, %v866_v4 }
 0x12f   : > { %v1059_v43 = vpop.f32.mrf.mxu1 }
 0x130   : > { %v1206_v57 = vadd.f32 %v1606_v30, %v1092_v14  ;;  %v1090_v42 = vadd.f32 %v1059_v43, %v976_v17  ;;  %v1607_v32 = vpop.f32.mrf.mxu0 }
 0x131   : > { %v1595_v59 = vpop.f32.mrf.mxu1 }
 0x132   : > { %v1204_v61 = vadd.f32 %v1173_v54, %v1090_v42  ;;  %v1093_v62 = vadd.f32 %v1595_v59, %v979_v45  ;;  %v1176_v47 = vpop.f32.mrf.mxu0  ;;  %v1221_v63 = vadd.f32 %v1446_v58, %v1206_v57 }
 0x133   : > { %v1062_v46 = vpop.f32.mrf.mxu1 }
 0x134   : > { %v1207_v0 = vadd.f32 %v1607_v32, %v1093_v62  ;;  %v1091_v60 = vadd.f32 %v1062_v46, %v977_v34  ;;  %v1610_v6 = vpop.f32.mrf.mxu0  ;;  %v1219_v8 = vadd.f32 %v1446_v58, %v1204_v61  ;;  %v1229_v48 = vmax.f32 %v1221_v63, 0.0 }
 0x135   : > { %v1598_v5 = vpop.f32.mrf.mxu1 }
 0x136   : > { %v1222_v10 = vadd.f32 %v1446_v58, %v1207_v0  ;;  %v1205_v1 = vadd.f32 %v1176_v47, %v1091_v60  ;;  %v1096_v11 = vadd.f32 %v1598_v5, %v982_v49  ;;  %v1189_v19 = vpop.f32.mrf.mxu0  ;;  %v1227_v23 = vmax.f32 %v1219_v8, 0.0 }
 0x137   : > { %v1075_v12 = vpop.f32.mrf.mxu1 }
 0x138   : > { %v1230_v16 = vmax.f32 %v1222_v10, 0.0  ;;  %v1220_v50 = vadd.f32 %v1446_v58, %v1205_v1  ;;  %v1094_v20 = vadd.f32 %v1075_v12, %v980_v2  ;;  %v1210_v22 = vadd.f32 %v1610_v6, %v1096_v11  ;;  %v1611_v9 = vpop.f32.mrf.mxu0 }
 0x139   : > { %v1599_v18 = vpop.f32.mrf.mxu1 }
 0x13a   : > { %v1236_v24 = vmax.f32 %v1229_v48, %v1230_v16  ;;  %v1228_v25 = vmax.f32 %v1220_v50, 0.0  ;;  %v1208_v15 = vadd.f32 %v1189_v19, %v1094_v20  ;;  %v1097_v27 = vadd.f32 %v1599_v18, %v983_v21  ;;  %v1192_v28 = vpop.f32.mrf.mxu0 }
 0x13b   : > { %v1078_v29 = vpop.f32.mrf.mxu1  ;;  %v1225_v37 = vadd.f32 %v1446_v58, %v1210_v22 }
 0x13c   : > { %1241 = vst.msk [vmem:[#allocation2 + $0x8] sm:$0xff] %vm1239_vm1, %v1236_v24  ;;  %v1235_v26 = vmax.f32 %v1227_v23, %v1228_v25  ;;  %v1095_v36 = vadd.f32 %v1078_v29, %v981_v7  ;;  %v1211_v39 = vadd.f32 %v1611_v9, %v1097_v27  ;;  %v1223_v13 = vadd.f32 %v1446_v58, %v1208_v15 }
 0x13d   : > { %v1233_v30 = vmax.f32 %v1225_v37, 0.0 }
 0x13e   : > { %1240 = vst.msk [vmem:[#allocation2] sm:$0xff] %vm1239_vm1, %v1235_v26  ;;  %v1209_v35 = vadd.f32 %v1192_v28, %v1095_v36  ;;  %v1226_v38 = vadd.f32 %v1446_v58, %v1211_v39  ;;  %v1231_v17 = vmax.f32 %v1223_v13, 0.0 }
 0x140   : > { %v1224_v41 = vadd.f32 %v1446_v58, %v1209_v35  ;;  %v1234_v51 = vmax.f32 %v1226_v38, 0.0 }
 0x142   : > { %v1232_v31 = vmax.f32 %v1224_v41, 0.0  ;;  %v1238_v14 = vmax.f32 %v1233_v30, %v1234_v51 }
 0x144   : > { %v1237_v33 = vmax.f32 %v1231_v17, %v1232_v31  ;;  %1243 = vst.msk [vmem:[#allocation2 + $0x18] sm:$0xff] %vm1239_vm1, %v1238_v14 }
 0x145   : > { %v1244_v52 = vld [vmem:[#allocation2] ss:$2 sm:$0xff]  ;;  %v1248_v40 = vld [vmem:[#allocation2 + $0x1] ss:$2 sm:$0xff] }
 0x146   : > { %v1251_v43 = vmax.f32 %v1244_v52, %v1248_v40  ;;  %1242 = vst.msk [vmem:[#allocation2 + $0x10] sm:$0xff] %vm1239_vm1, %v1237_v33 }
 0x148   : > { %1253 = vst.msk [vmem:[%s198_s9] sm:$0xff] %vm1239_vm1, %v1251_v43 }
 0x14d   : > { %v1246_v54 = vld [vmem:[#allocation2 + $0x10] ss:$2 sm:$0xff]  ;;  %v1250_v45 = vld [vmem:[#allocation2 + $0x11] ss:$2 sm:$0xff] }
 0x14e   : > { %v1252_v55 = vmax.f32 %v1246_v54, %v1250_v45 }
 0x150   : > { %1254 = vst.msk [vmem:[%s198_s9 + $0x8] sm:$0xff] %vm1239_vm1, %v1252_v55 }
 0x151 PF: > { %s15_s12 = sadd.s32 1, %s1732_s12  }
 0x152   : > { %p12_p2 = scmp.ge.s32.totalorder %s15_s12, 4  }
 0x154   :  { %14 = sbr.rel (!%p12_p2) target bundleno = 2 (0x2), region = 84 }
 0x159   :  { %1276 = vsyncpa [#allocation4], 1 }
 0x15a   :  { %1278 = vsyncpa [#allocation4 + $0x1], 1 }
 0x15b   :  { %1279 = vsyncpa [#allocation6], 1 }

// kernel: wall_detector_forward.3
= control target key start
LH: loop header
LB: loop body
LE: loop exit
PB: predicated region body
PF: predicated region fallthrough
CT: control target
= control target key end

     0   :  { %8 = vsyncpa [#allocation4], 0  ;;  %s5068_s0 = inlined_call_operand.vmem [shape: f32[2,18,18,3], index: 0, kind: input, shape index: {}]   ;;  %s5069_s1 = inlined_call_operand.hbm [shape: bf16[3,3,3,32], index: 1, kind: input, shape index: {}]   ;;  %s5070_s2 = inlined_call_operand.hbm [shape: f32[1,32], index: 2, kind: input, shape index: {}]   ;;  %s5071_s3 = inlined_call_operand.vmem [shape: f32[2,64,32], index: 3, kind: output, shape index: {}]  }
   0x1   :  { %9 = vsyncpa [#allocation6], 0  ;;  %s3955_s12 = smov 0  }
   0x2 LB: > { %s3961_s13 = sadd.s32 4294967295, %s3928_s12   ;;  %p3018_p0 = scmp.ge.s32.totalorder %s3928_s12, 1  ;;  %s3928_s12 = sphi %s3955_s12, %s15_s12  }
   0x3   : > { %p114_p1 = scmp.lt.s32.totalorder %s3928_s12, 3  ;;  %s3930_s14 = smov [#allocation3]  }
   0x4   : > { %s126_s15 = sshll.u32 %s3930_s14, 4  ;;  %p3845_p3 = scmp.eq.s32.totalorder %s3961_s13, 0  ;;  %s127_s15 = int_to_ptr.vmem [resolvable:$true] %s126_s15 }
   0x5   : > { %p3965_p2 = pnand %p3018_p0, %p114_p1  ;;  %s3931_s17 = smov [#allocation5]  }
   0x6   : > { %s140_s18 = sshll.u32 %s3931_s17, 4  ;;  %s3873_s20 = scalar_lea.vmem %s127_s15, 288  ;;  %s141_s18 = int_to_ptr.vmem [resolvable:$true] %s140_s18 }
   0x7   : > { %p3838_p4 = pneg %p3965_p2  ;;  %p3874_p7 = scmp.ne.s32.totalorder %s127_s15, %s3873_s20 }
   0x8   : > { %p3881_p10 = scmp.lt.s32.totalorder %s127_s15, %s127_s15  ;;  %p3882_p11 = scmp.lt.s32.totalorder %s3873_s20, %s3873_s20 }
   0x9   : > { %p3974_p5 = pnand %p3845_p3, %p3838_p4 }
   0xa   : > { %p3883_p12 = por %p3882_p11, %p3881_p10 }
   0xb   : > { %p3864_p6 = pneg %p3974_p5 }
   0xd   : > { %p3876_p8 = pnand %p3874_p7, %p3864_p6 }
   0xf   : > { %p3877_p9 = pneg %p3876_p8 }
  0x11   : > { %p3884_p13 = pnand %p3883_p12, %p3877_p9 }
  0x13   : > { %3887 = shalt.err (!%p3884_p13)
}
  0x14   : > { %s3932_s21 = smov 32   ;;  %s3933_s22 = smov 2  }
  0x15   : > { %3841 = dma.hbm_to_vmem [thread:$0]  (!%p3974_p5), %s5069_s1, 288, %s127_s15, [#allocation4], %s3932_s21, %s3932_s21, %s3933_s22  }
  0x16   : > { %s3899_s25 = scalar_lea.vmem %s141_s18, 16  ;;  %s3906_s26 = scalar_lea.vmem %s141_s18, 32 }
  0x17   : > { %p3900_p0 = scmp.ne.s32.totalorder %s141_s18, %s3899_s25  ;;  %p3907_p7 = scmp.lt.s32.totalorder %s141_s18, %s141_s18 }
  0x18   : > { %p3908_p8 = scmp.lt.s32.totalorder %s3906_s26, %s3899_s25 }
  0x19   : > { %p3902_p1 = pnand %p3900_p0, %p3864_p6 }
  0x1a   : > { %p3909_p9 = por %p3908_p8, %p3907_p7 }
  0x1b   : > { %p3903_p4 = pneg %p3902_p1 }
  0x1d   : > { %p3910_p10 = pnand %p3909_p9, %p3903_p4 }
  0x1f   : > { %3913 = shalt.err (!%p3910_p10)
}
  0x20   : > { %3844 = dma.hbm_to_vmem [thread:$0]  (!%p3974_p5), %s5070_s2, 16, %s141_s18, [#allocation6]  }
  0x21   : > { %161 = sbr.rel (%p3965_p2) target bundleno = 553 (0x229), region = 32 }
  0x26   : > { %3919 = dma.done.wait (%p3845_p3), [#allocation4], 288  }
  0x27   : > { %3921 = vsyncadd (%p3845_p3), [#allocation4], 4294967008 }
  0x28   : > { %3923 = dma.done.wait (%p3845_p3), [#allocation6], 16  }
  0x29   : > { %3925 = vsyncadd (%p3845_p3), [#allocation6], 4294967280  ;;  %vm348_vm0 = vcmask 1040384   ;;  %p189_p6 = scmp.lt.s32.totalorder %s3961_s13, 1  ;;  %vm349_vm1 = vcmask 1041408   ;;  %v3934_v0 = vmov 65535  }
  0x2a   : > { %v350_v1 = vsel %vm348_vm0, 4294967295, %v3934_v0  ;;  %v298_v3 = vld [vmem:[#allocation3 + $0x2] sm:$0x3]  ;;  %vm299_vm2 = vcmask 23552   ;;  %v248_v17 = vld [vmem:[#allocation3] sm:$0x3] }
  0x2b   : > { %s5161_s13 = smov (!%p189_p6, %s3961_s13), 1  ;;  %v4011_v2 = vsel %vm349_vm1, %v350_v1, 0  ;;  %v777_v18 = vld [vmem:[#allocation3 + $0x4] sm:$0x3]  ;;  %v1072_v39 = vld [vmem:[#allocation3 + $0x6] sm:$0x3] }
  0x2c   : > { %s3829_s29 = smul.u32 432, %s5161_s13  ;;  %v353_v6 = vand.u32 %v4011_v2, %v298_v3  ;;  %v565_v20 = vand.u32 %v4011_v2, %v248_v17  ;;  %v827_v21 = vand.u32 %v777_v18, %v4011_v2  ;;  %v1366_v40 = vld [vmem:[#allocation3 + $0x8] sm:$0x3]  ;;  %v1122_v43 = vand.u32 %v1072_v39, %v4011_v2  ;;  %v1660_v17 = vld [vmem:[#allocation3 + $0xa] sm:$0x3]  ;;  %s3367_s6 = sshll.u32 %s5161_s13, 6 }
  0x2d   : > { %v1416_v44 = vand.u32 %v1366_v40, %v4011_v2  ;;  %v1955_v18 = vld [vmem:[#allocation3 + $0xc] sm:$0x3]  ;;  %vm2875_vm3 = vcmask 261120   ;;  %s4962_s9 = scalar_lea.vmem %s5071_s3, %s3367_s6 }
  0x2e   : > { %s4016_s5 = scalar_lea.vmem %s5068_s0, %s3829_s29  ;;  %3521 = vmatprep.subr.bf16.mxu0 %v353_v6  ;;  %3827 = vmatprep.subr.bf16.mxu1 %v353_v6 }
  0x2f   : > { %v249_v4 = vld [vmem:[%s4016_s5 + $0x1] sm:$0xff]  ;;  %v250_v5 = vld [vmem:[%s4016_s5 + $0x9] sm:$0xff]  ;;  %v251_v10 = vld [vmem:[%s4016_s5 + $0x19] sm:$0xff]  ;;  %3522 = vmatpush3.bf16.msra.mxu0 %v353_v6  ;;  %3828 = vmatpush3.bf16.msra.mxu1 %v353_v6 }
  0x30   : > { %v281_v7 = vpack.c.bf16 %v250_v5, %v249_v4  ;;  %v265_v8 = vld [vmem:[%s4016_s5 + $0xc1] sm:$0xff]  ;;  %v266_v9 = vld [vmem:[%s4016_s5 + $0xc9] sm:$0xff]  ;;  %v267_v13 = vld [vmem:[%s4016_s5 + $0xd9] sm:$0xff]  ;;  %3555 = vmatprep.subr.bf16.mxu1 %v565_v20  ;;  %3589 = vmatprep.subr.bf16.mxu0 %v827_v21 }
  0x31   : > { %v4024_v11 = vpack.c.bf16 %v266_v9, %v265_v8  ;;  %v252_v12 = vld [vmem:[%s4016_s5 + $0x21] sm:$0xff]  ;;  %v253_v19 = vld [vmem:[%s4016_s5 + $0x31] sm:$0xff]  ;;  %v254_v22 = vld [vmem:[%s4016_s5 + $0x39] sm:$0xff] }
  0x32   : > { %v268_v14 = vld [vmem:[%s4016_s5 + $0xe1] sm:$0xff]  ;;  %v4029_v15 = vpack.c.bf16 %v252_v12, %v251_v10  ;;  %v269_v23 = vld [vmem:[%s4016_s5 + $0xf1] sm:$0xff]  ;;  %v270_v24 = vld [vmem:[%s4016_s5 + $0xf9] sm:$0xff]  ;;  %3523 = vmatprep.mubr.msk.bf16.mxu0 %vm299_vm2, %v281_v7  ;;  %v4042_v25 = vpack.c.bf16 %v254_v22, %v253_v19  ;;  %v4142_v22 = vand.u32 %v1955_v18, %v4011_v2 }
  0x33   : > { %v4031_v16 = vpack.c.bf16 %v268_v14, %v267_v13  ;;  %3539 = vmatprep.mubr.msk.bf16.mxu1 %vm299_vm2, %v4024_v11  ;;  %v4044_v26 = vpack.c.bf16 %v270_v24, %v269_v23  ;;  %v255_v27 = vld [vmem:[%s4016_s5 + $0x49] sm:$0xff]  ;;  %v256_v28 = vld [vmem:[%s4016_s5 + $0x51] sm:$0xff]  ;;  %v257_v31 = vld [vmem:[%s4016_s5 + $0x61] sm:$0xff] }
  0x34   : > { %3524 = vmatmul.mubr.msk.bf16.vlgmr.msra.gmra.mxu0 %vm299_vm2, %v4029_v15  ;;  %v271_v29 = vld [vmem:[%s4016_s5 + $0x109] sm:$0xff]  ;;  %v272_v30 = vld [vmem:[%s4016_s5 + $0x111] sm:$0xff]  ;;  %v273_v33 = vld [vmem:[%s4016_s5 + $0x121] sm:$0xff]  ;;  %v4062_v35 = vpack.c.bf16 %v256_v28, %v255_v27 }
  0x35   : > { %3540 = vmatmul.mubr.msk.bf16.vlgmr.msra.gmra.mxu1 %vm299_vm2, %v4031_v16  ;;  %3590 = vmatpush3.bf16.msra.mxu0 %v827_v21  ;;  %v258_v32 = vld [vmem:[%s4016_s5 + $0x69] sm:$0xff]  ;;  %v4064_v36 = vpack.c.bf16 %v272_v30, %v271_v29  ;;  %v259_v41 = vld [vmem:[%s4016_s5 + $0x79] sm:$0xff]  ;;  %v260_v42 = vld [vmem:[%s4016_s5 + $0x81] sm:$0xff]  ;;  %v4139_v21 = vand.u32 %v1660_v17, %v4011_v2 }
  0x36   : > { %3556 = vmatpush3.bf16.msra.mxu1 %v565_v20  ;;  %3527 = vmatprep.mubr.msk.bf16.mxu0 %vm299_vm2, %v4042_v25  ;;  %v274_v34 = vld [vmem:[%s4016_s5 + $0x129] sm:$0xff]  ;;  %v4066_v37 = vpack.c.bf16 %v258_v32, %v257_v31  ;;  %v275_v45 = vld [vmem:[%s4016_s5 + $0x139] sm:$0xff]  ;;  %v276_v46 = vld [vmem:[%s4016_s5 + $0x141] sm:$0xff]  ;;  %v4088_v51 = vpack.c.bf16 %v260_v42, %v259_v41 }
  0x37   : > { %3543 = vmatprep.mubr.msk.bf16.mxu1 %vm299_vm2, %v4044_v26  ;;  %v4068_v38 = vpack.c.bf16 %v274_v34, %v273_v33  ;;  %v261_v47 = vld [vmem:[%s4016_s5 + $0x91] sm:$0xff]  ;;  %v262_v48 = vld [vmem:[%s4016_s5 + $0x99] sm:$0xff]  ;;  %3623 = vmatprep.subr.bf16.mxu1 %v1122_v43  ;;  %v4090_v52 = vpack.c.bf16 %v276_v46, %v275_v45  ;;  %v263_v55 = vld [vmem:[%s4016_s5 + $0xa9] sm:$0xff] }
  0x38   : > { %v277_v49 = vld [vmem:[%s4016_s5 + $0x151] sm:$0xff]  ;;  %v278_v50 = vld [vmem:[%s4016_s5 + $0x159] sm:$0xff]  ;;  %3657 = vmatprep.subr.bf16.mxu0 %v1416_v44  ;;  %v4092_v53 = vpack.c.bf16 %v262_v48, %v261_v47  ;;  %v279_v57 = vld [vmem:[%s4016_s5 + $0x169] sm:$0xff] }
  0x39   : > { %v4094_v54 = vpack.c.bf16 %v278_v50, %v277_v49  ;;  %v264_v56 = vld [vmem:[%s4016_s5 + $0xb1] sm:$0xff]  ;;  %v200_v59 = vld [vmem:[%s4016_s5] sm:$0xff]  ;;  %v201_v60 = vld [vmem:[%s4016_s5 + $0x8] sm:$0xff] }
  0x3a   : > { %v280_v58 = vld [vmem:[%s4016_s5 + $0x171] sm:$0xff]  ;;  %v728_v61 = vld [vmem:[%s4016_s5 + $0x2] sm:$0xff]  ;;  %v4112_v63 = vpack.c.bf16 %v264_v56, %v263_v55  ;;  %v232_v1 = vpack.c.bf16 %v201_v60, %v200_v59  ;;  %v730_v6 = vld [vmem:[%s4016_s5 + $0x1a] sm:$0xff] }
  0x3b   : > { %v729_v62 = vld [vmem:[%s4016_s5 + $0xa] sm:$0xff]  ;;  %v4114_v0 = vpack.c.bf16 %v280_v58, %v279_v57  ;;  %v202_v4 = vld [vmem:[%s4016_s5 + $0x18] sm:$0xff]  ;;  %v203_v5 = vld [vmem:[%s4016_s5 + $0x20] sm:$0xff] }
  0x3c   : > { %3528 = vmatmul.mubr.msk.bf16.gmra.mxu0 %vm299_vm2, %v4062_v35  ;;  %v760_v3 = vpack.c.bf16 %v729_v62, %v728_v61  ;;  %v731_v7 = vld [vmem:[%s4016_s5 + $0x22] sm:$0xff]  ;;  %v204_v8 = vld [vmem:[%s4016_s5 + $0x30] sm:$0xff]  ;;  %v205_v9 = vld [vmem:[%s4016_s5 + $0x38] sm:$0xff]  ;;  %v4130_v13 = vpack.c.bf16 %v203_v5, %v202_v4 }
  0x3d   : > { %3544 = vmatmul.mubr.msk.bf16.gmra.mxu1 %vm299_vm2, %v4064_v36  ;;  %3531 = vmatprep.mubr.msk.bf16.mxu0 %vm299_vm2, %v4066_v37  ;;  %v732_v10 = vld [vmem:[%s4016_s5 + $0x32] sm:$0xff]  ;;  %v733_v12 = vld [vmem:[%s4016_s5 + $0x3a] sm:$0xff]  ;;  %v4132_v14 = vpack.c.bf16 %v731_v7, %v730_v6  ;;  %v4134_v19 = vpack.c.bf16 %v205_v9, %v204_v8  ;;  %v206_v23 = vld [vmem:[%s4016_s5 + $0x48] sm:$0xff] }
  0x3e   : > { %3547 = vmatprep.mubr.msk.bf16.mxu1 %vm299_vm2, %v4068_v38  ;;  %v4136_v20 = vpack.c.bf16 %v733_v12, %v732_v10  ;;  %v207_v24 = vld [vmem:[%s4016_s5 + $0x50] sm:$0xff]  ;;  %v208_v29 = vld [vmem:[%s4016_s5 + $0x60] sm:$0xff]  ;;  %v209_v30 = vld [vmem:[%s4016_s5 + $0x68] sm:$0xff] }
  0x3f   : > { %v734_v27 = vld [vmem:[%s4016_s5 + $0x4a] sm:$0xff]  ;;  %v735_v28 = vld [vmem:[%s4016_s5 + $0x52] sm:$0xff]  ;;  %v736_v31 = vld [vmem:[%s4016_s5 + $0x62] sm:$0xff]  ;;  %v4162_v33 = vpack.c.bf16 %v207_v24, %v206_v23  ;;  %v4166_v39 = vpack.c.bf16 %v209_v30, %v208_v29 }
  0x40   : > { %v737_v32 = vld [vmem:[%s4016_s5 + $0x6a] sm:$0xff]  ;;  %v4164_v34 = vpack.c.bf16 %v735_v28, %v734_v27  ;;  %v210_v41 = vld [vmem:[%s4016_s5 + $0x78] sm:$0xff]  ;;  %v211_v42 = vld [vmem:[%s4016_s5 + $0x80] sm:$0xff] }
  0x41   : > { %v4168_v40 = vpack.c.bf16 %v737_v32, %v736_v31  ;;  %v212_v45 = vld [vmem:[%s4016_s5 + $0x90] sm:$0xff]  ;;  %v213_v46 = vld [vmem:[%s4016_s5 + $0x98] sm:$0xff]  ;;  %v4186_v49 = vpack.c.bf16 %v211_v42, %v210_v41  ;;  %v214_v57 = vld [vmem:[%s4016_s5 + $0xa8] sm:$0xff] }
  0x42   : > { %v740_v47 = vld [vmem:[%s4016_s5 + $0x92] sm:$0xff]  ;;  %v741_v48 = vld [vmem:[%s4016_s5 + $0x9a] sm:$0xff]  ;;  %v4190_v55 = vpack.c.bf16 %v213_v46, %v212_v45  ;;  %v742_v59 = vld [vmem:[%s4016_s5 + $0xaa] sm:$0xff] }
  0x43   : > { %v4192_v56 = vpack.c.bf16 %v741_v48, %v740_v47  ;;  %v215_v58 = vld [vmem:[%s4016_s5 + $0xb0] sm:$0xff]  ;;  %v216_v61 = vld [vmem:[%s4016_s5 + $0xc0] sm:$0xff]  ;;  %v217_v62 = vld [vmem:[%s4016_s5 + $0xc8] sm:$0xff] }
  0x44   : > { %3532 = vmatmul.mubr.msk.bf16.gmra.mxu0 %vm299_vm2, %v4088_v51  ;;  %v743_v60 = vld [vmem:[%s4016_s5 + $0xb2] sm:$0xff]  ;;  %v4210_v4 = vpack.c.bf16 %v215_v58, %v214_v57  ;;  %v4214_v6 = vpack.c.bf16 %v217_v62, %v216_v61  ;;  %v219_v9 = vld [vmem:[%s4016_s5 + $0xe0] sm:$0xff]  ;;  %v222_v31 = vld [vmem:[%s4016_s5 + $0x108] sm:$0xff] }
  0x45   : > { %3548 = vmatmul.mubr.msk.bf16.gmra.mxu1 %vm299_vm2, %v4090_v52  ;;  %3535 = vmatprep.mubr.msk.bf16.mxu0 %vm299_vm2, %v4092_v53  ;;  %v4212_v5 = vpack.c.bf16 %v743_v60, %v742_v59  ;;  %v218_v8 = vld [vmem:[%s4016_s5 + $0xd8] sm:$0xff]  ;;  %v747_v12 = vld [vmem:[%s4016_s5 + $0xe2] sm:$0xff]  ;;  %v220_v17 = vld [vmem:[%s4016_s5 + $0xf0] sm:$0xff] }
  0x46   : > { %3551 = vmatprep.mubr.msk.bf16.mxu1 %vm299_vm2, %v4094_v54  ;;  %v746_v10 = vld [vmem:[%s4016_s5 + $0xda] sm:$0xff]  ;;  %v748_v23 = vld [vmem:[%s4016_s5 + $0xf2] sm:$0xff]  ;;  %v4234_v27 = vpack.c.bf16 %v219_v9, %v218_v8  ;;  %v750_v41 = vld [vmem:[%s4016_s5 + $0x10a] sm:$0xff] }
  0x47   : > { %v221_v18 = vld [vmem:[%s4016_s5 + $0xf8] sm:$0xff]  ;;  %v4236_v28 = vpack.c.bf16 %v747_v12, %v746_v10  ;;  %v223_v32 = vld [vmem:[%s4016_s5 + $0x110] sm:$0xff]  ;;  %v752_v45 = vld [vmem:[%s4016_s5 + $0x122] sm:$0xff] }
  0x48   : > { %v749_v24 = vld [vmem:[%s4016_s5 + $0xfa] sm:$0xff]  ;;  %v4238_v29 = vpack.c.bf16 %v221_v18, %v220_v17  ;;  %v751_v42 = vld [vmem:[%s4016_s5 + $0x112] sm:$0xff]  ;;  %v753_v46 = vld [vmem:[%s4016_s5 + $0x12a] sm:$0xff]  ;;  %v4258_v47 = vpack.c.bf16 %v223_v32, %v222_v31 }
  0x49   : > { %v4240_v30 = vpack.c.bf16 %v749_v24, %v748_v23  ;;  %v4260_v48 = vpack.c.bf16 %v751_v42, %v750_v41  ;;  %v4264_v58 = vpack.c.bf16 %v753_v46, %v752_v45  ;;  %v226_v59 = vld [vmem:[%s4016_s5 + $0x138] sm:$0xff]  ;;  %v227_v60 = vld [vmem:[%s4016_s5 + $0x140] sm:$0xff]  ;;  %v230_v23 = vld [vmem:[%s4016_s5 + $0x168] sm:$0xff] }
  0x4a   : > { %v754_v61 = vld [vmem:[%s4016_s5 + $0x13a] sm:$0xff]  ;;  %v755_v62 = vld [vmem:[%s4016_s5 + $0x142] sm:$0xff]  ;;  %v756_v8 = vld [vmem:[%s4016_s5 + $0x152] sm:$0xff]  ;;  %v4282_v10 = vpack.c.bf16 %v227_v60, %v226_v59 }
  0x4b   : > { %v757_v9 = vld [vmem:[%s4016_s5 + $0x15a] sm:$0xff]  ;;  %v4284_v12 = vpack.c.bf16 %v755_v62, %v754_v61  ;;  %v231_v24 = vld [vmem:[%s4016_s5 + $0x170] sm:$0xff] }
  0x4c   : > { %3536 = vmatmul.mubr.msk.bf16.gmra.mxu0 %vm299_vm2, %v4112_v63  ;;  %v4288_v18 = vpack.c.bf16 %v757_v9, %v756_v8  ;;  %v758_v31 = vld [vmem:[%s4016_s5 + $0x16a] sm:$0xff]  ;;  %v759_v32 = vld [vmem:[%s4016_s5 + $0x172] sm:$0xff]  ;;  %v4302_v41 = vpack.c.bf16 %v231_v24, %v230_v23  ;;  %v3251_v59 = vld [vmem:[%s4016_s5 + $0x1a0] sm:$0xff] }
  0x4d   : > { %3552 = vmatmul.mubr.msk.bf16.gmra.mxu1 %vm299_vm2, %v4114_v0  ;;  %3591 = vmatprep.mubr.msk.bf16.mxu0 %vm299_vm2, %v760_v3  ;;  %v745_v3 = vld [vmem:[%s4016_s5 + $0xca] sm:$0xff]  ;;  %v4304_v42 = vpack.c.bf16 %v759_v32, %v758_v31 }
  0x4e   : > { %3557 = vmatprep.mubr.msk.bf16.mxu1 %vm299_vm2, %v232_v1  ;;  %v744_v1 = vld [vmem:[%s4016_s5 + $0xc2] sm:$0xff] }
  0x4f   : > { %v4216_v7 = vpack.c.bf16 %v745_v3, %v744_v1  ;;  %v228_v1 = vld [vmem:[%s4016_s5 + $0x150] sm:$0xff]  ;;  %v229_v3 = vld [vmem:[%s4016_s5 + $0x158] sm:$0xff] }
  0x50   : > { %v4286_v17 = vpack.c.bf16 %v229_v3, %v228_v1 }
  0x54   : > { %3592 = vmatmul.mubr.msk.bf16.vlgmr.msra.gmra.mxu0 %vm299_vm2, %v4132_v14 }
  0x55   : > { %3558 = vmatmul.mubr.msk.bf16.vlgmr.msra.gmra.mxu1 %vm299_vm2, %v4130_v13  ;;  %3658 = vmatpush3.bf16.msra.mxu0 %v1416_v44  ;;  %v739_v44 = vld [vmem:[%s4016_s5 + $0x82] sm:$0xff] }
  0x56   : > { %3624 = vmatpush3.bf16.msra.mxu1 %v1122_v43  ;;  %3561 = vmatprep.mubr.msk.bf16.mxu1 %vm299_vm2, %v4134_v19  ;;  %v738_v43 = vld [vmem:[%s4016_s5 + $0x7a] sm:$0xff] }
  0x57   : > { %3595 = vmatprep.mubr.msk.bf16.mxu0 %vm299_vm2, %v4136_v20  ;;  %3691 = vmatprep.subr.bf16.mxu1 %v4139_v21  ;;  %v4188_v50 = vpack.c.bf16 %v739_v44, %v738_v43  ;;  %v224_v43 = vld [vmem:[%s4016_s5 + $0x120] sm:$0xff]  ;;  %v225_v44 = vld [vmem:[%s4016_s5 + $0x128] sm:$0xff] }
  0x58   : > { %3725 = vmatprep.subr.bf16.mxu0 %v4142_v22  ;;  %v4262_v57 = vpack.c.bf16 %v225_v44, %v224_v43  ;;  %v2249_v43 = vld [vmem:[#allocation3 + $0xe] sm:$0x3]  ;;  %v2543_v44 = vld [vmem:[#allocation3 + $0x10] sm:$0x3] }
  0x59   : > { %v2299_v45 = vand.u32 %v2249_v43, %v4011_v2  ;;  %v2593_v46 = vand.u32 %v2543_v44, %v4011_v2  ;;  %v3106_v2 = vld [vmem:[%s4016_s5 + $0x180] sm:$0xff] }
  0x5c   : > { %3596 = vmatmul.mubr.msk.bf16.gmra.mxu0 %vm299_vm2, %v4164_v34 }
  0x5d   : > { %3562 = vmatmul.mubr.msk.bf16.gmra.mxu1 %vm299_vm2, %v4162_v33  ;;  %3599 = vmatprep.mubr.msk.bf16.mxu0 %vm299_vm2, %v4168_v40 }
  0x5e   : > { %3565 = vmatprep.mubr.msk.bf16.mxu1 %vm299_vm2, %v4166_v39 }
  0x64   : > { %3600 = vmatmul.mubr.msk.bf16.gmra.mxu0 %vm299_vm2, %v4188_v50 }
  0x65   : > { %3566 = vmatmul.mubr.msk.bf16.gmra.mxu1 %vm299_vm2, %v4186_v49  ;;  %3603 = vmatprep.mubr.msk.bf16.mxu0 %vm299_vm2, %v4192_v56 }
  0x66   : > { %3569 = vmatprep.mubr.msk.bf16.mxu1 %vm299_vm2, %v4190_v55 }
  0x6c   : > { %3604 = vmatmul.mubr.msk.bf16.gmra.mxu0 %vm299_vm2, %v4212_v5 }
  0x6d   : > { %3570 = vmatmul.mubr.msk.bf16.gmra.mxu1 %vm299_vm2, %v4210_v4  ;;  %3607 = vmatprep.mubr.msk.bf16.mxu0 %vm299_vm2, %v4216_v7 }
  0x6e   : > { %3573 = vmatprep.mubr.msk.bf16.mxu1 %vm299_vm2, %v4214_v6 }
  0x74   : > { %3608 = vmatmul.mubr.msk.bf16.gmra.mxu0 %vm299_vm2, %v4236_v28 }
  0x75   : > { %3574 = vmatmul.mubr.msk.bf16.gmra.mxu1 %vm299_vm2, %v4234_v27  ;;  %3611 = vmatprep.mubr.msk.bf16.mxu0 %vm299_vm2, %v4240_v30 }
  0x76   : > { %3577 = vmatprep.mubr.msk.bf16.mxu1 %vm299_vm2, %v4238_v29 }
  0x7c   : > { %3612 = vmatmul.mubr.msk.bf16.gmra.mxu0 %vm299_vm2, %v4260_v48 }
  0x7d   : > { %3578 = vmatmul.mubr.msk.bf16.gmra.mxu1 %vm299_vm2, %v4258_v47  ;;  %3615 = vmatprep.mubr.msk.bf16.mxu0 %vm299_vm2, %v4264_v58 }
  0x7e   : > { %3581 = vmatprep.mubr.msk.bf16.mxu1 %vm299_vm2, %v4262_v57 }
  0x84   : > { %3616 = vmatmul.mubr.msk.bf16.gmra.mxu0 %vm299_vm2, %v4284_v12 }
  0x85   : > { %3582 = vmatmul.mubr.msk.bf16.gmra.mxu1 %vm299_vm2, %v4282_v10  ;;  %3619 = vmatprep.mubr.msk.bf16.mxu0 %vm299_vm2, %v4288_v18 }
  0x86   : > { %3585 = vmatprep.mubr.msk.bf16.mxu1 %vm299_vm2, %v4286_v17 }
  0x8c   : > { %3620 = vmatmul.mubr.msk.bf16.gmra.mxu0 %vm299_vm2, %v4304_v42 }
  0x8d   : > { %3586 = vmatmul.mubr.msk.bf16.gmra.mxu1 %vm299_vm2, %v4302_v41  ;;  %3659 = vmatprep.mubr.msk.bf16.mxu0 %vm299_vm2, %v4029_v15  ;;  %v3154_v15 = vld [vmem:[%s4016_s5 + $0x181] sm:$0xff] }
  0x8e   : > { %3625 = vmatprep.mubr.msk.bf16.mxu1 %vm299_vm2, %v4130_v13 }
  0x94   : > { %3660 = vmatmul.mubr.msk.bf16.vlgmr.msra.gmra.mxu0 %vm299_vm2, %v4042_v25 }
  0x95   : > { %3626 = vmatmul.mubr.msk.bf16.vlgmr.msra.gmra.mxu1 %vm299_vm2, %v4134_v19  ;;  %3726 = vmatpush3.bf16.msra.mxu0 %v4142_v22 }
  0x96   : > { %3692 = vmatpush3.bf16.msra.mxu1 %v4139_v21  ;;  %3629 = vmatprep.mubr.msk.bf16.mxu1 %vm299_vm2, %v4162_v33 }
  0x97   : > { %3663 = vmatprep.mubr.msk.bf16.mxu0 %vm299_vm2, %v4062_v35  ;;  %3759 = vmatprep.subr.bf16.mxu1 %v2299_v45 }
  0x98   : > { %3793 = vmatprep.subr.bf16.mxu0 %v2593_v46 }
  0x9c   : > { %3664 = vmatmul.mubr.msk.bf16.gmra.mxu0 %vm299_vm2, %v4066_v37 }
  0x9d   : > { %3630 = vmatmul.mubr.msk.bf16.gmra.mxu1 %vm299_vm2, %v4166_v39  ;;  %3667 = vmatprep.mubr.msk.bf16.mxu0 %vm299_vm2, %v4088_v51 }
  0x9e   : > { %3633 = vmatprep.mubr.msk.bf16.mxu1 %vm299_vm2, %v4186_v49 }
  0xa4   : > { %3668 = vmatmul.mubr.msk.bf16.gmra.mxu0 %vm299_vm2, %v4092_v53 }
  0xa5   : > { %3634 = vmatmul.mubr.msk.bf16.gmra.mxu1 %vm299_vm2, %v4190_v55  ;;  %3671 = vmatprep.mubr.msk.bf16.mxu0 %vm299_vm2, %v4112_v63 }
  0xa6   : > { %3637 = vmatprep.mubr.msk.bf16.mxu1 %vm299_vm2, %v4210_v4 }
  0xac   : > { %3672 = vmatmul.mubr.msk.bf16.gmra.mxu0 %vm299_vm2, %v4024_v11  ;;  %v3107_v11 = vld [vmem:[%s4016_s5 + $0x188] sm:$0xff] }
  0xad   : > { %3638 = vmatmul.mubr.msk.bf16.gmra.mxu1 %vm299_vm2, %v4214_v6  ;;  %3675 = vmatprep.mubr.msk.bf16.mxu0 %vm299_vm2, %v4031_v16  ;;  %v3155_v16 = vld [vmem:[%s4016_s5 + $0x189] sm:$0xff] }
  0xae   : > { %3641 = vmatprep.mubr.msk.bf16.mxu1 %vm299_vm2, %v4234_v27 }
  0xb4   : > { %3676 = vmatmul.mubr.msk.bf16.gmra.mxu0 %vm299_vm2, %v4044_v26  ;;  %v1070_v26 = vpack.c.bf16 %v3107_v11, %v3106_v2  ;;  %v3276_v2 = vld [vmem:[%s4016_s5 + $0x91] sm:$0xff]  ;;  %v3277_v11 = vld [vmem:[%s4016_s5 + $0x99] sm:$0xff] }
  0xb5   : > { %3642 = vmatmul.mubr.msk.bf16.gmra.mxu1 %vm299_vm2, %v4238_v29  ;;  %3679 = vmatprep.mubr.msk.bf16.mxu0 %vm299_vm2, %v4064_v36  ;;  %v4378_v36 = vpack.c.bf16 %v3155_v16, %v3154_v15 }
  0xb6   : > { %3645 = vmatprep.mubr.msk.bf16.mxu1 %vm299_vm2, %v4258_v47 }
  0xbc   : > { %3680 = vmatmul.mubr.msk.bf16.gmra.mxu0 %vm299_vm2, %v4068_v38 }
  0xbd   : > { %3646 = vmatmul.mubr.msk.bf16.gmra.mxu1 %vm299_vm2, %v4262_v57  ;;  %3683 = vmatprep.mubr.msk.bf16.mxu0 %vm299_vm2, %v4090_v52 }
  0xbe   : > { %3649 = vmatprep.mubr.msk.bf16.mxu1 %vm299_vm2, %v4282_v10 }
  0xc4   : > { %3684 = vmatmul.mubr.msk.bf16.gmra.mxu0 %vm299_vm2, %v4094_v54 }
  0xc5   : > { %3650 = vmatmul.mubr.msk.bf16.gmra.mxu1 %vm299_vm2, %v4286_v17  ;;  %3687 = vmatprep.mubr.msk.bf16.mxu0 %vm299_vm2, %v4114_v0 }
  0xc6   : > { %3653 = vmatprep.mubr.msk.bf16.mxu1 %vm299_vm2, %v4302_v41 }
  0xcc   : > { %3688 = vmatmul.mubr.msk.bf16.gmra.mxu0 %vm299_vm2, %v4378_v36 }
  0xcd   : > { %3654 = vmatmul.mubr.msk.bf16.gmra.mxu1 %vm299_vm2, %v1070_v26  ;;  %3727 = vmatprep.mubr.msk.bf16.mxu0 %vm299_vm2, %v4134_v19 }
  0xce   : > { %3693 = vmatprep.mubr.msk.bf16.mxu1 %vm299_vm2, %v4132_v14 }
  0xd4   : > { %3728 = vmatmul.mubr.msk.bf16.vlgmr.msra.gmra.mxu0 %vm299_vm2, %v4162_v33 }
  0xd5   : > { %3694 = vmatmul.mubr.msk.bf16.vlgmr.msra.gmra.mxu1 %vm299_vm2, %v4136_v20  ;;  %3794 = vmatpush3.bf16.msra.mxu0 %v2593_v46 }
  0xd6   : > { %3760 = vmatpush3.bf16.msra.mxu1 %v2299_v45  ;;  %3697 = vmatprep.mubr.msk.bf16.mxu1 %vm299_vm2, %v4164_v34 }
  0xd7   : > { %3731 = vmatprep.mubr.msk.bf16.mxu0 %vm299_vm2, %v4166_v39 }
  0xdc   : > { %3732 = vmatmul.mubr.msk.bf16.gmra.mxu0 %vm299_vm2, %v4186_v49 }
  0xdd   : > { %3698 = vmatmul.mubr.msk.bf16.gmra.mxu1 %vm299_vm2, %v4168_v40  ;;  %3735 = vmatprep.mubr.msk.bf16.mxu0 %vm299_vm2, %v4190_v55 }
  0xde   : > { %3701 = vmatprep.mubr.msk.bf16.mxu1 %vm299_vm2, %v4188_v50 }
  0xe4   : > { %3736 = vmatmul.mubr.msk.bf16.gmra.mxu0 %vm299_vm2, %v4210_v4 }
  0xe5   : > { %3702 = vmatmul.mubr.msk.bf16.gmra.mxu1 %vm299_vm2, %v4192_v56  ;;  %3739 = vmatprep.mubr.msk.bf16.mxu0 %vm299_vm2, %v4214_v6 }
  0xe6   : > { %3705 = vmatprep.mubr.msk.bf16.mxu1 %vm299_vm2, %v4212_v5 }
  0xec   : > { %3740 = vmatmul.mubr.msk.bf16.gmra.mxu0 %vm299_vm2, %v4234_v27 }
  0xed   : > { %3706 = vmatmul.mubr.msk.bf16.gmra.mxu1 %vm299_vm2, %v4216_v7  ;;  %3743 = vmatprep.mubr.msk.bf16.mxu0 %vm299_vm2, %v4238_v29  ;;  %v3202_v29 = vld [vmem:[%s4016_s5 + $0x182] sm:$0xff] }
  0xee   : > { %3709 = vmatprep.mubr.msk.bf16.mxu1 %vm299_vm2, %v4236_v28 }
  0xf4   : > { %v3525_v38 = vpop.f32.mrf.mxu0  ;;  %3744 = vmatmul.mubr.msk.bf16.gmra.mxu0 %vm299_vm2, %v4258_v47  ;;  %v3203_v47 = vld [vmem:[%s4016_s5 + $0x18a] sm:$0xff] }
  0xf5   : > { %v4419_v52 = vpop.f32.mrf.mxu1  ;;  %3710 = vmatmul.mubr.msk.bf16.gmra.mxu1 %vm299_vm2, %v4240_v30  ;;  %3747 = vmatprep.mubr.msk.bf16.mxu0 %vm299_vm2, %v4262_v57  ;;  %v3250_v57 = vld [vmem:[%s4016_s5 + $0x198] sm:$0xff]  ;;  %v4484_v3 = vpack.c.bf16 %v3203_v47, %v3202_v29 }
  0xf6   : > { %3713 = vmatprep.mubr.msk.bf16.mxu1 %vm299_vm2, %v4260_v48  ;;  %v389_v53 = vpop.f32.mrf.mxu0  ;;  %v1953_v8 = vpack.c.bf16 %v3251_v59, %v3250_v57 }
  0xf7   : > { %v4429_v54 = vpop.f32.mrf.mxu1 }
  0xf8   : > { %v3526_v63 = vpop.f32.mrf.mxu0 }
  0xf9   : > { %v4431_v0 = vpop.f32.mrf.mxu1 }
  0xfa   : > { %v4433_v13 = vpop.f32.mrf.mxu0 }
  0xfb   : > { %v4435_v14 = vpop.f32.mrf.mxu1 }
  0xfc   : > { %v4437_v19 = vpop.f32.mrf.mxu0  ;;  %3748 = vmatmul.mubr.msk.bf16.gmra.mxu0 %vm299_vm2, %v4282_v10 }
  0xfd   : > { %v4439_v21 = vpop.f32.mrf.mxu1  ;;  %3714 = vmatmul.mubr.msk.bf16.gmra.mxu1 %vm299_vm2, %v4264_v58  ;;  %3751 = vmatprep.mubr.msk.bf16.mxu0 %vm299_vm2, %v4286_v17 }
  0xfe   : > { %3717 = vmatprep.mubr.msk.bf16.mxu1 %vm299_vm2, %v4284_v12  ;;  %v4449_v22 = vpop.f32.mrf.mxu0 }
  0xff   : > { %v4451_v33 = vpop.f32.mrf.mxu1 }
 0x100   : > { %v4453_v39 = vpop.f32.mrf.mxu0 }
 0x101   : > { %v4455_v49 = vpop.f32.mrf.mxu1 }
 0x102   : > { %v4457_v55 = vpop.f32.mrf.mxu0 }
 0x103   : > { %v4459_v4 = vpop.f32.mrf.mxu1 }
 0x104   : > { %v4461_v6 = vpop.f32.mrf.mxu0  ;;  %3752 = vmatmul.mubr.msk.bf16.gmra.mxu0 %vm299_vm2, %v4302_v41 }
 0x105   : > { %v4463_v27 = vpop.f32.mrf.mxu1  ;;  %3718 = vmatmul.mubr.msk.bf16.gmra.mxu1 %vm299_vm2, %v4288_v18  ;;  %3755 = vmatprep.mubr.msk.bf16.mxu0 %vm299_vm2, %v1070_v26 }
 0x106   : > { %3721 = vmatprep.mubr.msk.bf16.mxu1 %vm299_vm2, %v4304_v42  ;;  %v4476_v60 = vpop.f32.mrf.mxu0 }
 0x107   : > { %v4478_v61 = vpop.f32.mrf.mxu1 }
 0x108   : > { %v4480_v62 = vpop.f32.mrf.mxu0 }
 0x109   : > { %v4482_v1 = vpop.f32.mrf.mxu1 }
 0x10a   : > { %v4486_v9 = vpop.f32.mrf.mxu0 }
 0x10b   : > { %v4488_v10 = vpop.f32.mrf.mxu1 }
 0x10c   : > { %v4490_v17 = vpop.f32.mrf.mxu0  ;;  %3756 = vmatmul.mubr.msk.bf16.gmra.mxu0 %vm299_vm2, %v1953_v8 }
 0x10d   : > { %v4492_v23 = vpop.f32.mrf.mxu1  ;;  %3722 = vmatmul.mubr.msk.bf16.gmra.mxu1 %vm299_vm2, %v4484_v3  ;;  %3795 = vmatprep.mubr.msk.bf16.mxu0 %vm299_vm2, %v4136_v20 }
 0x10e   : > { %3761 = vmatprep.mubr.msk.bf16.mxu1 %vm299_vm2, %v4042_v25  ;;  %v4501_v24 = vpop.f32.mrf.mxu0 }
 0x10f   : > { %v4503_v31 = vpop.f32.mrf.mxu1 }
 0x110   : > { %v4505_v32 = vpop.f32.mrf.mxu0 }
 0x111   : > { %v4507_v41 = vpop.f32.mrf.mxu1 }
 0x112   : > { %v4509_v42 = vpop.f32.mrf.mxu0 }
 0x113   : > { %v4511_v43 = vpop.f32.mrf.mxu1 }
 0x114   : > { %v3593_v45 = vpop.f32.mrf.mxu0  ;;  %3796 = vmatmul.mubr.msk.bf16.vlgmr.msra.gmra.mxu0 %vm299_vm2, %v4164_v34 }
 0x115   : > { %v3559_v44 = vpop.f32.mrf.mxu1  ;;  %3762 = vmatmul.mubr.msk.bf16.vlgmr.msra.gmra.mxu1 %vm299_vm2, %v4062_v35  ;;  %3799 = vmatprep.mubr.msk.bf16.mxu0 %vm299_vm2, %v4168_v40 }
 0x116   : > { %v610_v25 = vadd.f32 %v3559_v44, %v3525_v38  ;;  %3765 = vmatprep.mubr.msk.bf16.mxu1 %vm299_vm2, %v4066_v37  ;;  %v863_v46 = vpop.f32.mrf.mxu0  ;;  %v2236_v38 = vpack.c.bf16 %v3277_v11, %v3276_v2  ;;  %v3278_v44 = vld [vmem:[%s4016_s5 + $0xa9] sm:$0xff] }
 0x117   : > { %v601_v20 = vpop.f32.mrf.mxu1 }
 0x118   : > { %v4523_v15 = vadd.f32 %v3593_v45, %v610_v25  ;;  %v602_v16 = vadd.f32 %v601_v20, %v389_v53  ;;  %v3594_v29 = vpop.f32.mrf.mxu0  ;;  %v3279_v45 = vld [vmem:[%s4016_s5 + $0xb1] sm:$0xff]  ;;  %v3280_v20 = vld [vmem:[%s4016_s5 + $0xc1] sm:$0xff] }
 0x119   : > { %v3560_v26 = vpop.f32.mrf.mxu1 }
 0x11a   : > { %v4525_v35 = vadd.f32 %v863_v46, %v602_v16  ;;  %v613_v34 = vadd.f32 %v3560_v26, %v3526_v63  ;;  %v866_v37 = vpop.f32.mrf.mxu0  ;;  %v3281_v46 = vld [vmem:[%s4016_s5 + $0xc9] sm:$0xff]  ;;  %v2237_v16 = vpack.c.bf16 %v3279_v45, %v3278_v44  ;;  %v3284_v44 = vld [vmem:[%s4016_s5 + $0xf1] sm:$0xff]  ;;  %v3285_v45 = vld [vmem:[%s4016_s5 + $0xf9] sm:$0xff] }
 0x11b   : > { %v604_v47 = vpop.f32.mrf.mxu1 }
 0x11c   : > { %v4527_v40 = vadd.f32 %v3594_v29, %v613_v34  ;;  %v605_v57 = vadd.f32 %v604_v47, %v4433_v13  ;;  %v3597_v8 = vpop.f32.mrf.mxu0  ;;  %3800 = vmatmul.mubr.msk.bf16.gmra.mxu0 %vm299_vm2, %v4188_v50 }
 0x11d   : > { %v3563_v59 = vpop.f32.mrf.mxu1  ;;  %3766 = vmatmul.mubr.msk.bf16.gmra.mxu1 %vm299_vm2, %v4088_v51  ;;  %3803 = vmatprep.mubr.msk.bf16.mxu0 %vm299_vm2, %v4192_v56  ;;  %v2238_v56 = vpack.c.bf16 %v3281_v46, %v3280_v20 }
 0x11e   : > { %v4534_v53 = vadd.f32 %v866_v37, %v605_v57  ;;  %v626_v63 = vadd.f32 %v3563_v59, %v4437_v19  ;;  %3769 = vmatprep.mubr.msk.bf16.mxu1 %vm299_vm2, %v2236_v38  ;;  %v879_v25 = vpop.f32.mrf.mxu0  ;;  %v3282_v59 = vld [vmem:[%s4016_s5 + $0xd9] sm:$0xff] }
 0x11f   : > { %v617_v13 = vpop.f32.mrf.mxu1 }
 0x120   : > { %v4544_v2 = vadd.f32 %v3597_v8, %v626_v63  ;;  %v618_v51 = vadd.f32 %v617_v13, %v4449_v22  ;;  %v3598_v11 = vpop.f32.mrf.mxu0  ;;  %v3283_v8 = vld [vmem:[%s4016_s5 + $0xe1] sm:$0xff] }
 0x121   : > { %v3564_v50 = vpop.f32.mrf.mxu1  ;;  %v2239_v46 = vpack.c.bf16 %v3283_v8, %v3282_v59 }
 0x122   : > { %v4547_v19 = vadd.f32 %v879_v25, %v618_v51  ;;  %v629_v26 = vadd.f32 %v3564_v50, %v4453_v39  ;;  %v882_v34 = vpop.f32.mrf.mxu0 }
 0x123   : > { %v620_v29 = vpop.f32.mrf.mxu1 }
 0x124   : > { %v4550_v38 = vadd.f32 %v3598_v11, %v629_v26  ;;  %v621_v47 = vadd.f32 %v620_v29, %v4457_v55  ;;  %v3601_v22 = vpop.f32.mrf.mxu0  ;;  %3804 = vmatmul.mubr.msk.bf16.gmra.mxu0 %vm299_vm2, %v4212_v5 }
 0x125   : > { %v3567_v37 = vpop.f32.mrf.mxu1  ;;  %3770 = vmatmul.mubr.msk.bf16.gmra.mxu1 %vm299_vm2, %v2237_v16  ;;  %3807 = vmatprep.mubr.msk.bf16.mxu0 %vm299_vm2, %v4216_v7  ;;  %v2240_v7 = vpack.c.bf16 %v3285_v45, %v3284_v44 }
 0x126   : > { %v4556_v57 = vadd.f32 %v882_v34, %v621_v47  ;;  %v642_v39 = vadd.f32 %v3567_v37, %v4461_v6  ;;  %3773 = vmatprep.mubr.msk.bf16.mxu1 %vm299_vm2, %v2238_v56  ;;  %v895_v55 = vpop.f32.mrf.mxu0  ;;  %v3286_v34 = vld [vmem:[%s4016_s5 + $0x109] sm:$0xff]  ;;  %v3287_v47 = vld [vmem:[%s4016_s5 + $0x111] sm:$0xff] }
 0x127   : > { %v633_v63 = vpop.f32.mrf.mxu1 }
 0x128   : > { %v4566_v13 = vadd.f32 %v3601_v22, %v642_v39  ;;  %v634_v25 = vadd.f32 %v633_v63, %v4476_v60  ;;  %v3602_v20 = vpop.f32.mrf.mxu0  ;;  %v3288_v22 = vld [vmem:[%s4016_s5 + $0x121] sm:$0xff]  ;;  %v3289_v39 = vld [vmem:[%s4016_s5 + $0x129] sm:$0xff] }
 0x129   : > { %v3568_v5 = vpop.f32.mrf.mxu1 }
 0x12a   : > { %v4569_v6 = vadd.f32 %v895_v55, %v634_v25  ;;  %v645_v51 = vadd.f32 %v3568_v5, %v4480_v62  ;;  %v898_v11 = vpop.f32.mrf.mxu0  ;;  %v2241_v55 = vpack.c.bf16 %v3287_v47, %v3286_v34 }
 0x12b   : > { %v636_v50 = vpop.f32.mrf.mxu1 }
 0x12c   : > { %v4572_v16 = vadd.f32 %v3602_v20, %v645_v51  ;;  %v637_v26 = vadd.f32 %v636_v50, %v4486_v9  ;;  %v3605_v60 = vpop.f32.mrf.mxu0  ;;  %3808 = vmatmul.mubr.msk.bf16.gmra.mxu0 %vm299_vm2, %v4236_v28  ;;  %v3291_v50 = vld [vmem:[%s4016_s5 + $0x141] sm:$0xff] }
 0x12d   : > { %v3571_v56 = vpop.f32.mrf.mxu1  ;;  %3774 = vmatmul.mubr.msk.bf16.gmra.mxu1 %vm299_vm2, %v2239_v46  ;;  %3811 = vmatprep.mubr.msk.bf16.mxu0 %vm299_vm2, %v4240_v30  ;;  %v2242_v30 = vpack.c.bf16 %v3289_v39, %v3288_v22 }
 0x12e   : > { %v4578_v29 = vadd.f32 %v898_v11, %v637_v26  ;;  %v658_v62 = vadd.f32 %v3571_v56, %v4490_v17  ;;  %3777 = vmatprep.mubr.msk.bf16.mxu1 %vm299_vm2, %v2240_v7  ;;  %v911_v9 = vpop.f32.mrf.mxu0  ;;  %v3290_v7 = vld [vmem:[%s4016_s5 + $0x139] sm:$0xff]  ;;  %v3292_v26 = vld [vmem:[%s4016_s5 + $0x151] sm:$0xff] }
 0x12f   : > { %v649_v37 = vpop.f32.mrf.mxu1  ;;  %v3293_v56 = vld [vmem:[%s4016_s5 + $0x159] sm:$0xff]  ;;  %v2243_v47 = vpack.c.bf16 %v3291_v50, %v3290_v7 }
 0x130   : > { %v4588_v59 = vadd.f32 %v3605_v60, %v658_v62  ;;  %v650_v8 = vadd.f32 %v649_v37, %v4501_v24  ;;  %v3606_v63 = vpop.f32.mrf.mxu0 }
 0x131   : > { %v3572_v28 = vpop.f32.mrf.mxu1 }
 0x132   : > { %v4591_v17 = vadd.f32 %v911_v9, %v650_v8  ;;  %v661_v44 = vadd.f32 %v3572_v28, %v4505_v32  ;;  %v914_v25 = vpop.f32.mrf.mxu0 }
 0x133   : > { %v652_v45 = vpop.f32.mrf.mxu1 }
 0x134   : > { %v4594_v5 = vadd.f32 %v3606_v63, %v661_v44  ;;  %v653_v20 = vadd.f32 %v652_v45, %v4509_v42  ;;  %v3609_v24 = vpop.f32.mrf.mxu0  ;;  %3812 = vmatmul.mubr.msk.bf16.gmra.mxu0 %vm299_vm2, %v4260_v48  ;;  %v3295_v44 = vld [vmem:[%s4016_s5 + $0x171] sm:$0xff] }
 0x135   : > { %v3575_v46 = vpop.f32.mrf.mxu1  ;;  %3778 = vmatmul.mubr.msk.bf16.gmra.mxu1 %vm299_vm2, %v2241_v55  ;;  %3815 = vmatprep.mubr.msk.bf16.mxu0 %vm299_vm2, %v4264_v58  ;;  %v2244_v58 = vpack.c.bf16 %v3293_v56, %v3292_v26 }
 0x136   : > { %v4600_v51 = vadd.f32 %v914_v25, %v653_v20  ;;  %v674_v32 = vadd.f32 %v3575_v46, %v4419_v52  ;;  %3781 = vmatprep.mubr.msk.bf16.mxu1 %vm299_vm2, %v2242_v30  ;;  %v927_v42 = vpop.f32.mrf.mxu0  ;;  %v3342_v30 = vld [vmem:[%s4016_s5 + $0x16a] sm:$0xff] }
 0x137   : > { %v665_v11 = vpop.f32.mrf.mxu1 }
 0x138   : > { %v4610_v60 = vadd.f32 %v3609_v24, %v674_v32  ;;  %v666_v48 = vadd.f32 %v665_v11, %v4429_v54  ;;  %v3610_v34 = vpop.f32.mrf.mxu0  ;;  %v3294_v54 = vld [vmem:[%s4016_s5 + $0x169] sm:$0xff] }
 0x139   : > { %v3576_v62 = vpop.f32.mrf.mxu1  ;;  %v2245_v32 = vpack.c.bf16 %v3295_v44, %v3294_v54 }
 0x13a   : > { %v4613_v52 = vadd.f32 %v927_v42, %v666_v48  ;;  %v677_v37 = vadd.f32 %v3576_v62, %v4431_v0  ;;  %v930_v22 = vpop.f32.mrf.mxu0 }
 0x13b   : > { %v668_v9 = vpop.f32.mrf.mxu1 }
 0x13c   : > { %v4616_v39 = vadd.f32 %v3610_v34, %v677_v37  ;;  %v669_v8 = vadd.f32 %v668_v9, %v4435_v14  ;;  %v3613_v63 = vpop.f32.mrf.mxu0  ;;  %3816 = vmatmul.mubr.msk.bf16.gmra.mxu0 %vm299_vm2, %v4284_v12  ;;  %v3343_v14 = vld [vmem:[%s4016_s5 + $0x172] sm:$0xff] }
 0x13d   : > { %v3579_v28 = vpop.f32.mrf.mxu1  ;;  %3782 = vmatmul.mubr.msk.bf16.gmra.mxu1 %vm299_vm2, %v2243_v47  ;;  %3819 = vmatprep.mubr.msk.bf16.mxu0 %vm299_vm2, %v4288_v18  ;;  %v2539_v7 = vpack.c.bf16 %v3343_v14, %v3342_v30  ;;  %v3346_v47 = vld [vmem:[%s4016_s5 + $0x19a] sm:$0xff] }
 0x13e   : > { %v4623_v55 = vadd.f32 %v930_v22, %v669_v8  ;;  %v690_v0 = vadd.f32 %v3579_v28, %v4439_v21  ;;  %3785 = vmatprep.mubr.msk.bf16.mxu1 %vm299_vm2, %v2244_v58  ;;  %v943_v25 = vpop.f32.mrf.mxu0 }
 0x13f   : > { %v681_v45 = vpop.f32.mrf.mxu1 }
 0x140   : > { %v4632_v20 = vadd.f32 %v3613_v63, %v690_v0  ;;  %v682_v12 = vadd.f32 %v681_v45, %v4451_v33  ;;  %v3614_v24 = vpop.f32.mrf.mxu0  ;;  %v3298_v33 = vld [vmem:[%s4016_s5 + $0x199] sm:$0xff] }
 0x141   : > { %v3580_v46 = vpop.f32.mrf.mxu1 }
 0x142   : > { %v4635_v21 = vadd.f32 %v943_v25, %v682_v12  ;;  %v693_v18 = vadd.f32 %v3580_v46, %v4455_v49  ;;  %v946_v11 = vpop.f32.mrf.mxu0  ;;  %v3299_v49 = vld [vmem:[%s4016_s5 + $0x1a1] sm:$0xff] }
 0x143   : > { %v684_v50 = vpop.f32.mrf.mxu1  ;;  %v2247_v63 = vpack.c.bf16 %v3299_v49, %v3298_v33 }
 0x144   : > { %v4638_v42 = vadd.f32 %v3614_v24, %v693_v18  ;;  %v685_v26 = vadd.f32 %v684_v50, %v4459_v4  ;;  %v3617_v48 = vpop.f32.mrf.mxu0  ;;  %3820 = vmatmul.mubr.msk.bf16.gmra.mxu0 %vm299_vm2, %v2539_v7  ;;  %v3347_v4 = vld [vmem:[%s4016_s5 + $0x1a2] sm:$0xff] }
 0x145   : > { %v3583_v56 = vpop.f32.mrf.mxu1  ;;  %3786 = vmatmul.mubr.msk.bf16.gmra.mxu1 %vm299_vm2, %v2245_v32  ;;  %3823 = vmatprep.mubr.msk.bf16.mxu0 %vm299_vm2, %v4484_v3  ;;  %v2541_v54 = vpack.c.bf16 %v3347_v4, %v3346_v47 }
 0x146   : > { %v4644_v62 = vadd.f32 %v946_v11, %v685_v26  ;;  %v706_v34 = vadd.f32 %v3583_v56, %v4463_v27  ;;  %3789 = vmatprep.mubr.msk.bf16.mxu1 %vm299_vm2, %v4378_v36  ;;  %v959_v58 = vpop.f32.mrf.mxu0 }
 0x147   : > { %v697_v37 = vpop.f32.mrf.mxu1 }
 0x148   : > { %v4654_v9 = vadd.f32 %v3617_v48, %v706_v34  ;;  %v698_v22 = vadd.f32 %v697_v37, %v4478_v61  ;;  %v3618_v28 = vpop.f32.mrf.mxu0 }
 0x149   : > { %v3584_v8 = vpop.f32.mrf.mxu1 }
 0x14a   : > { %v4657_v27 = vadd.f32 %v959_v58, %v698_v22  ;;  %v709_v36 = vadd.f32 %v3584_v8, %v4482_v1  ;;  %v962_v44 = vpop.f32.mrf.mxu0 }
 0x14b   : > { %v700_v0 = vpop.f32.mrf.mxu1 }
 0x14c   : > { %v4660_v3 = vadd.f32 %v3618_v28, %v709_v36  ;;  %v701_v30 = vadd.f32 %v700_v0, %v4488_v10  ;;  %v3621_v45 = vpop.f32.mrf.mxu0  ;;  %3824 = vmatmul.mubr.msk.bf16.gmra.mxu0 %vm299_vm2, %v2541_v54 }
 0x14d   : > { %v3587_v14 = vpop.f32.mrf.mxu1  ;;  %3790 = vmatmul.mubr.msk.bf16.gmra.mxu1 %vm299_vm2, %v2247_v63 }
 0x14e   : > { %v4665_v61 = vadd.f32 %v962_v44, %v701_v30  ;;  %v722_v25 = vadd.f32 %v3587_v14, %v4492_v23  ;;  %v975_v46 = vpop.f32.mrf.mxu0 }
 0x14f   : > { %v713_v12 = vpop.f32.mrf.mxu1 }
 0x150   : > { %v4668_v24 = vadd.f32 %v3621_v45, %v722_v25  ;;  %v714_v1 = vadd.f32 %v713_v12, %v4503_v31  ;;  %v3622_v7 = vpop.f32.mrf.mxu0 }
 0x151   : > { %v3588_v32 = vpop.f32.mrf.mxu1 }
 0x152   : > { %v4671_v18 = vadd.f32 %v975_v46, %v714_v1  ;;  %v725_v10 = vadd.f32 %v3588_v32, %v4507_v41  ;;  %v978_v11 = vpop.f32.mrf.mxu0 }
 0x153   : > { %v716_v50 = vpop.f32.mrf.mxu1 }
 0x154   : > { %v4674_v26 = vadd.f32 %v3622_v7, %v725_v10  ;;  %v717_v56 = vadd.f32 %v716_v50, %v4511_v43  ;;  %v3661_v23 = vpop.f32.mrf.mxu0 }
 0x155   : > { %v3627_v48 = vpop.f32.mrf.mxu1 }
 0x156   : > { %v4677_v33 = vadd.f32 %v978_v11, %v717_v56  ;;  %v1287_v34 = vadd.f32 %v3627_v48, %v4523_v15  ;;  %v1452_v31 = vpop.f32.mrf.mxu0 }
 0x157   : > { %v1158_v49 = vpop.f32.mrf.mxu1 }
 0x158   : > { %v4680_v47 = vadd.f32 %v3661_v23, %v1287_v34  ;;  %v1285_v4 = vadd.f32 %v1158_v49, %v4525_v35  ;;  %v3662_v41 = vpop.f32.mrf.mxu0 }
 0x159   : > { %v3628_v37 = vpop.f32.mrf.mxu1 }
 0x15a   : > { %v4683_v58 = vadd.f32 %v1452_v31, %v1285_v4  ;;  %v1288_v22 = vadd.f32 %v3628_v37, %v4527_v40  ;;  %v1455_v43 = vpop.f32.mrf.mxu0 }
 0x15b   : > { %v1161_v8 = vpop.f32.mrf.mxu1 }
 0x15c   : > { %v4686_v28 = vadd.f32 %v3662_v41, %v1288_v22  ;;  %v1286_v63 = vadd.f32 %v1161_v8, %v4534_v53  ;;  %v3665_v15 = vpop.f32.mrf.mxu0 }
 0x15d   : > { %v3631_v54 = vpop.f32.mrf.mxu1 }
 0x15e   : > { %v4689_v36 = vadd.f32 %v1455_v43, %v1286_v63  ;;  %v1291_v0 = vadd.f32 %v3631_v54, %v4544_v2  ;;  %v1468_v35 = vpop.f32.mrf.mxu0 }
 0x15f   : > { %v1174_v44 = vpop.f32.mrf.mxu1 }
 0x160   : > { %v4692_v30 = vadd.f32 %v3665_v15, %v1291_v0  ;;  %v1289_v14 = vadd.f32 %v1174_v44, %v4547_v19  ;;  %v3666_v40 = vpop.f32.mrf.mxu0 }
 0x161   : > { %v3632_v45 = vpop.f32.mrf.mxu1 }
 0x162   : > { %v4695_v25 = vadd.f32 %v1468_v35, %v1289_v14  ;;  %v1292_v12 = vadd.f32 %v3632_v45, %v4550_v38  ;;  %v1471_v53 = vpop.f32.mrf.mxu0 }
 0x163   : > { %v1177_v46 = vpop.f32.mrf.mxu1 }
 0x164   : > { %v4698_v1 = vadd.f32 %v3666_v40, %v1292_v12  ;;  %v1290_v32 = vadd.f32 %v1177_v46, %v4556_v57  ;;  %v3669_v2 = vpop.f32.mrf.mxu0 }
 0x165   : > { %v3635_v7 = vpop.f32.mrf.mxu1 }
 0x166   : > { %v4701_v10 = vadd.f32 %v1471_v53, %v1290_v32  ;;  %v1295_v50 = vadd.f32 %v3635_v7, %v4566_v13  ;;  %v1484_v19 = vpop.f32.mrf.mxu0 }
 0x167   : > { %v1190_v11 = vpop.f32.mrf.mxu1 }
 0x168   : > { %v4704_v56 = vadd.f32 %v3669_v2, %v1295_v50  ;;  %v1293_v48 = vadd.f32 %v1190_v11, %v4569_v6  ;;  %v3670_v38 = vpop.f32.mrf.mxu0 }
 0x169   : > { %v3636_v23 = vpop.f32.mrf.mxu1 }
 0x16a   : > { %v4707_v34 = vadd.f32 %v1484_v19, %v1293_v48  ;;  %v1296_v49 = vadd.f32 %v3636_v23, %v4572_v16  ;;  %v1487_v57 = vpop.f32.mrf.mxu0 }
 0x16b   : > { %v1193_v31 = vpop.f32.mrf.mxu1 }
 0x16c   : > { %v4710_v4 = vadd.f32 %v3670_v38, %v1296_v49  ;;  %v1294_v37 = vadd.f32 %v1193_v31, %v4578_v29  ;;  %v3673_v13 = vpop.f32.mrf.mxu0 }
 0x16d   : > { %v3639_v41 = vpop.f32.mrf.mxu1 }
 0x16e   : > { %v4713_v22 = vadd.f32 %v1487_v57, %v1294_v37  ;;  %v1299_v8 = vadd.f32 %v3639_v41, %v4588_v59  ;;  %v1500_v6 = vpop.f32.mrf.mxu0 }
 0x16f   : > { %v1206_v43 = vpop.f32.mrf.mxu1 }
 0x170   : > { %v4716_v63 = vadd.f32 %v3673_v13, %v1299_v8  ;;  %v1297_v54 = vadd.f32 %v1206_v43, %v4591_v17  ;;  %v3674_v16 = vpop.f32.mrf.mxu0 }
 0x171   : > { %v3640_v15 = vpop.f32.mrf.mxu1 }
 0x172   : > { %v4719_v0 = vadd.f32 %v1500_v6, %v1297_v54  ;;  %v1300_v44 = vadd.f32 %v3640_v15, %v4594_v5  ;;  %v1503_v29 = vpop.f32.mrf.mxu0 }
 0x173   : > { %v1209_v35 = vpop.f32.mrf.mxu1 }
 0x174   : > { %v4722_v14 = vadd.f32 %v3674_v16, %v1300_v44  ;;  %v1298_v45 = vadd.f32 %v1209_v35, %v4600_v51  ;;  %v3677_v59 = vpop.f32.mrf.mxu0 }
 0x175   : > { %v3643_v40 = vpop.f32.mrf.mxu1 }
 0x176   : > { %v4725_v12 = vadd.f32 %v1503_v29, %v1298_v45  ;;  %v1303_v46 = vadd.f32 %v3643_v40, %v4610_v60  ;;  %v1516_v17 = vpop.f32.mrf.mxu0 }
 0x177   : > { %v1222_v53 = vpop.f32.mrf.mxu1 }
 0x178   : > { %v4728_v32 = vadd.f32 %v3677_v59, %v1303_v46  ;;  %v1301_v7 = vadd.f32 %v1222_v53, %v4613_v52  ;;  %v3678_v5 = vpop.f32.mrf.mxu0 }
 0x179   : > { %v3644_v2 = vpop.f32.mrf.mxu1 }
 0x17a   : > { %v4731_v50 = vadd.f32 %v1516_v17, %v1301_v7  ;;  %v1304_v11 = vadd.f32 %v3644_v2, %v4616_v39  ;;  %v1519_v51 = vpop.f32.mrf.mxu0 }
 0x17b   : > { %v1225_v19 = vpop.f32.mrf.mxu1 }
 0x17c   : > { %v4734_v48 = vadd.f32 %v3678_v5, %v1304_v11  ;;  %v1302_v23 = vadd.f32 %v1225_v19, %v4623_v55  ;;  %v3681_v60 = vpop.f32.mrf.mxu0 }
 0x17d   : > { %v3647_v38 = vpop.f32.mrf.mxu1 }
 0x17e   : > { %5074 = vst [vmem:[#allocation9_spill] sm:$0xff] %v4734_v48  ;;  %v4737_v49 = vadd.f32 %v1519_v51, %v1302_v23  ;;  %v1307_v31 = vadd.f32 %v3647_v38, %v4632_v20  ;;  %v1532_v52 = vpop.f32.mrf.mxu0 }
 0x17f   : > { %v1238_v57 = vpop.f32.mrf.mxu1 }
 0x180   : > { %5075 = vst [vmem:[#allocation10_spill] sm:$0xff] %v4737_v49  ;;  %v4740_v37 = vadd.f32 %v3681_v60, %v1307_v31  ;;  %v1305_v41 = vadd.f32 %v1238_v57, %v4635_v21  ;;  %v3682_v39 = vpop.f32.mrf.mxu0 }
 0x181   : > { %v3648_v13 = vpop.f32.mrf.mxu1 }
 0x182   : > { %5076 = vst [vmem:[#allocation11_spill] sm:$0xff] %v4740_v37  ;;  %v4743_v8 = vadd.f32 %v1532_v52, %v1305_v41  ;;  %v1308_v43 = vadd.f32 %v3648_v13, %v4638_v42  ;;  %v1535_v55 = vpop.f32.mrf.mxu0 }
 0x183   : > { %v1241_v6 = vpop.f32.mrf.mxu1 }
 0x184   : > { %5077 = vst [vmem:[#allocation12_spill] sm:$0xff] %v4743_v8  ;;  %v4746_v54 = vadd.f32 %v3682_v39, %v1308_v43  ;;  %v1306_v15 = vadd.f32 %v1241_v6, %v4644_v62  ;;  %v3685_v20 = vpop.f32.mrf.mxu0 }
 0x185   : > { %v3651_v16 = vpop.f32.mrf.mxu1 }
 0x186   : > { %5078 = vst [vmem:[#allocation13_spill] sm:$0xff] %v4746_v54  ;;  %v4749_v44 = vadd.f32 %v1535_v55, %v1306_v15  ;;  %v1311_v35 = vadd.f32 %v3651_v16, %v4654_v9  ;;  %v1548_v21 = vpop.f32.mrf.mxu0 }
 0x187   : > { %v1254_v29 = vpop.f32.mrf.mxu1 }
 0x188   : > { %5079 = vst [vmem:[#allocation14_spill] sm:$0xff] %v4749_v44  ;;  %v4752_v45 = vadd.f32 %v3685_v20, %v1311_v35  ;;  %v1309_v40 = vadd.f32 %v1254_v29, %v4657_v27  ;;  %v3686_v42 = vpop.f32.mrf.mxu0 }
 0x189   : > { %v3652_v59 = vpop.f32.mrf.mxu1 }
 0x18a   : > { %5080 = vst [vmem:[#allocation15_spill] sm:$0xff] %v4752_v45  ;;  %v4755_v46 = vadd.f32 %v1548_v21, %v1309_v40  ;;  %v1312_v53 = vadd.f32 %v3652_v59, %v4660_v3  ;;  %v1551_v62 = vpop.f32.mrf.mxu0 }
 0x18b   : > { %v1257_v17 = vpop.f32.mrf.mxu1 }
 0x18c   : > { %5081 = vst [vmem:[#allocation16_spill] sm:$0xff] %v4755_v46  ;;  %v4758_v7 = vadd.f32 %v3686_v42, %v1312_v53  ;;  %v1310_v2 = vadd.f32 %v1257_v17, %v4665_v61  ;;  %v3689_v9 = vpop.f32.mrf.mxu0 }
 0x18d   : > { %v3655_v5 = vpop.f32.mrf.mxu1 }
 0x18e   : > { %5082 = vst [vmem:[#allocation17_spill] sm:$0xff] %v4758_v7  ;;  %v4761_v11 = vadd.f32 %v1551_v62, %v1310_v2  ;;  %v1315_v19 = vadd.f32 %v3655_v5, %v4668_v24  ;;  %v1564_v27 = vpop.f32.mrf.mxu0 }
 0x18f   : > { %v1270_v51 = vpop.f32.mrf.mxu1 }
 0x190   : > { %5083 = vst [vmem:[#allocation18_spill] sm:$0xff] %v4761_v11  ;;  %v4764_v23 = vadd.f32 %v3689_v9, %v1315_v19  ;;  %v1313_v38 = vadd.f32 %v1270_v51, %v4671_v18  ;;  %v3690_v3 = vpop.f32.mrf.mxu0 }
 0x191   : > { %v3656_v60 = vpop.f32.mrf.mxu1 }
 0x192   : > { %5084 = vst [vmem:[#allocation19_spill] sm:$0xff] %v4764_v23  ;;  %v4767_v31 = vadd.f32 %v1564_v27, %v1313_v38  ;;  %v1316_v57 = vadd.f32 %v3656_v60, %v4674_v26  ;;  %v1567_v61 = vpop.f32.mrf.mxu0 }
 0x193   : > { %v1273_v52 = vpop.f32.mrf.mxu1 }
 0x194   : > { %5085 = vst [vmem:[#allocation20_spill] sm:$0xff] %v4767_v31  ;;  %v4770_v41 = vadd.f32 %v3690_v3, %v1316_v57  ;;  %v1314_v13 = vadd.f32 %v1273_v52, %v4677_v33  ;;  %v4773_v24 = vpop.f32.mrf.mxu0 }
 0x195   : > { %v3695_v39 = vpop.f32.mrf.mxu1 }
 0x196   : > { %5086 = vst [vmem:[#allocation21_spill] sm:$0xff] %v4770_v41  ;;  %v4775_v43 = vadd.f32 %v1567_v61, %v1314_v13  ;;  %v4777_v55 = vpop.f32.mrf.mxu0 }
 0x197   : > { %v1746_v6 = vpop.f32.mrf.mxu1 }
 0x198   : > { %5087 = vst [vmem:[#allocation22_spill] sm:$0xff] %v4775_v43  ;;  %v4781_v15 = vpop.f32.mrf.mxu0 }
 0x199   : > { %v4779_v18 = vpop.f32.mrf.mxu1 }
 0x19a   : > { %v4785_v26 = vpop.f32.mrf.mxu0 }
 0x19b   : > { %v4783_v16 = vpop.f32.mrf.mxu1 }
 0x19c   : > { %v4789_v35 = vpop.f32.mrf.mxu0 }
 0x19d   : > { %v4787_v20 = vpop.f32.mrf.mxu1 }
 0x19e   : > { %v4793_v29 = vpop.f32.mrf.mxu0 }
 0x19f   : > { %v4791_v33 = vpop.f32.mrf.mxu1 }
 0x1a0   : > { %v4797_v40 = vpop.f32.mrf.mxu0 }
 0x1a1   : > { %v4795_v21 = vpop.f32.mrf.mxu1 }
 0x1a2   : > { %v4801_v42 = vpop.f32.mrf.mxu0 }
 0x1a3   : > { %v4799_v59 = vpop.f32.mrf.mxu1 }
 0x1a4   : > { %v4805_v17 = vpop.f32.mrf.mxu0 }
 0x1a5   : > { %v4803_v53 = vpop.f32.mrf.mxu1 }
 0x1a6   : > { %v4809_v2 = vpop.f32.mrf.mxu0 }
 0x1a7   : > { %v4807_v62 = vpop.f32.mrf.mxu1 }
 0x1a8   : > { %v4813_v9 = vpop.f32.mrf.mxu0 }
 0x1a9   : > { %v4811_v5 = vpop.f32.mrf.mxu1 }
 0x1aa   : > { %v4817_v51 = vpop.f32.mrf.mxu0 }
 0x1ab   : > { %v4815_v19 = vpop.f32.mrf.mxu1 }
 0x1ac   : > { %v4821_v38 = vpop.f32.mrf.mxu0 }
 0x1ad   : > { %v4819_v27 = vpop.f32.mrf.mxu1 }
 0x1ae   : > { %v4825_v3 = vpop.f32.mrf.mxu0 }
 0x1af   : > { %v4823_v60 = vpop.f32.mrf.mxu1 }
 0x1b0   : > { %v4829_v52 = vpop.f32.mrf.mxu0 }
 0x1b1   : > { %v4827_v57 = vpop.f32.mrf.mxu1 }
 0x1b2   : > { %v4833_v13 = vpop.f32.mrf.mxu0 }
 0x1b3   : > { %v4831_v61 = vpop.f32.mrf.mxu1 }
 0x1b4   : > { %v4837_v41 = vpop.f32.mrf.mxu0 }
 0x1b5   : > { %v4835_v43 = vpop.f32.mrf.mxu1 }
 0x1b6   : > { %v4841_v23 = vpop.f32.mrf.mxu0 }
 0x1b7   : > { %v4839_v31 = vpop.f32.mrf.mxu1  ;;  %5088 = vst [vmem:[#allocation23_spill] sm:$0xff] %v4841_v23 }
 0x1b8   : > { %v4845_v7 = vpop.f32.mrf.mxu0 }
 0x1b9   : > { %v4843_v11 = vpop.f32.mrf.mxu1  ;;  %5090 = vst [vmem:[#allocation25_spill] sm:$0xff] %v4845_v7 }
 0x1ba   : > { %5089 = vst [vmem:[#allocation24_spill] sm:$0xff] %v4843_v11  ;;  %v4849_v45 = vpop.f32.mrf.mxu0 }
 0x1bb   : > { %v4847_v46 = vpop.f32.mrf.mxu1  ;;  %5092 = vst [vmem:[#allocation27_spill] sm:$0xff] %v4849_v45 }
 0x1bc   : > { %5091 = vst [vmem:[#allocation26_spill] sm:$0xff] %v4847_v46  ;;  %v4853_v54 = vpop.f32.mrf.mxu0 }
 0x1bd   : > { %v4851_v44 = vpop.f32.mrf.mxu1  ;;  %5094 = vst [vmem:[#allocation29_spill] sm:$0xff] %v4853_v54 }
 0x1be   : > { %5093 = vst [vmem:[#allocation28_spill] sm:$0xff] %v4851_v44  ;;  %v4857_v37 = vpop.f32.mrf.mxu0 }
 0x1bf   : > { %v4855_v8 = vpop.f32.mrf.mxu1  ;;  %5096 = vst [vmem:[#allocation31_spill] sm:$0xff] %v4857_v37 }
 0x1c0   : > { %5095 = vst [vmem:[#allocation30_spill] sm:$0xff] %v4855_v8  ;;  %v4861_v48 = vpop.f32.mrf.mxu0 }
 0x1c1   : > { %v4859_v49 = vpop.f32.mrf.mxu1  ;;  %5098 = vst [vmem:[#allocation33_spill] sm:$0xff] %v4861_v48 }
 0x1c2   : > { %5097 = vst [vmem:[#allocation32_spill] sm:$0xff] %v4859_v49  ;;  %v4865_v11 = vpop.f32.mrf.mxu0 }
 0x1c3   : > { %v4863_v23 = vpop.f32.mrf.mxu1  ;;  %5100 = vst [vmem:[#allocation35_spill] sm:$0xff] %v4865_v11 }
 0x1c4   : > { %5099 = vst [vmem:[#allocation34_spill] sm:$0xff] %v4863_v23  ;;  %v4869_v46 = vpop.f32.mrf.mxu0 }
 0x1c5   : > { %v4867_v7 = vpop.f32.mrf.mxu1  ;;  %5102 = vst [vmem:[#allocation37_spill] sm:$0xff] %v4869_v46  ;;  %v1875_v46 = vadd.f32 %v3695_v39, %v4680_v47  ;;  %v1874_v47 = vadd.f32 %v4783_v16, %v4689_v36 }
 0x1c6   : > { %5101 = vst [vmem:[#allocation36_spill] sm:$0xff] %v4867_v7  ;;  %v4873_v44 = vpop.f32.mrf.mxu0 }
 0x1c7   : > { %v4871_v45 = vpop.f32.mrf.mxu1  ;;  %5104 = vst [vmem:[#allocation39_spill] sm:$0xff] %v4873_v44 }
 0x1c8   : > { %5103 = vst [vmem:[#allocation38_spill] sm:$0xff] %v4871_v45  ;;  %v4877_v8 = vpop.f32.mrf.mxu0 }
 0x1c9   : > { %v4875_v54 = vpop.f32.mrf.mxu1  ;;  %5106 = vst [vmem:[#allocation41_spill] sm:$0xff] %v4877_v8  ;;  %v1873_v8 = vadd.f32 %v1746_v6, %v4683_v58  ;;  %v1879_v58 = vadd.f32 %v4787_v20, %v4692_v30  ;;  %v4909_v6 = vld [vmem:[#allocation5] ss:$0 sm:$0xff]  ;;  %v1877_v30 = vadd.f32 %v4791_v33, %v4695_v25 }
 0x1ca   : > { %5105 = vst [vmem:[#allocation40_spill] sm:$0xff] %v4875_v54  ;;  %v4881_v49 = vpop.f32.mrf.mxu0 }
 0x1cb   : > { %v4879_v37 = vpop.f32.mrf.mxu1  ;;  %5108 = vst [vmem:[#allocation43_spill] sm:$0xff] %v4881_v49  ;;  %v2170_v49 = vadd.f32 %v4773_v24, %v1875_v46  ;;  %v2172_v33 = vadd.f32 %v4793_v29, %v1877_v30  ;;  %v1881_v29 = vadd.f32 %v4807_v62, %v4707_v34 }
 0x1cc   : > { %5107 = vst [vmem:[#allocation42_spill] sm:$0xff] %v4879_v37  ;;  %v4885_v23 = vpop.f32.mrf.mxu0 }
 0x1cd   : > { %v4883_v48 = vpop.f32.mrf.mxu1  ;;  %5110 = vst [vmem:[#allocation45_spill] sm:$0xff] %v4885_v23  ;;  %v1876_v23 = vadd.f32 %v4779_v18, %v4686_v28 }
 0x1ce   : > { %5109 = vst [vmem:[#allocation44_spill] sm:$0xff] %v4883_v48  ;;  %v4889_v7 = vpop.f32.mrf.mxu0 }
 0x1cf   : > { %v4887_v11 = vpop.f32.mrf.mxu1  ;;  %5112 = vst [vmem:[#allocation47_spill] sm:$0xff] %v4889_v7  ;;  %v2168_v7 = vadd.f32 %v4777_v55, %v1873_v8  ;;  %v2171_v46 = vadd.f32 %v4781_v15, %v1876_v23  ;;  %v1880_v23 = vadd.f32 %v4795_v21, %v4698_v1  ;;  %v1878_v15 = vadd.f32 %v4799_v59, %v4701_v10 }
 0x1d0   : > { %5111 = vst [vmem:[#allocation46_spill] sm:$0xff] %v4887_v11  ;;  %v4894_v44 = vpop.f32.mrf.mxu0  ;;  %v1883_v1 = vadd.f32 %v4803_v53, %v4704_v56 }
 0x1d1   : > { %v4892_v45 = vpop.f32.mrf.mxu1  ;;  %5114 = vst [vmem:[#allocation49_spill] sm:$0xff] %v4894_v44 }
 0x1d2   : > { %5113 = vst [vmem:[#allocation48_spill] sm:$0xff] %v4892_v45  ;;  %v4899_v37 = vpop.f32.mrf.mxu0  ;;  %v2169_v45 = vadd.f32 %v4785_v26, %v1874_v47 }
 0x1d3   : > { %v4897_v54 = vpop.f32.mrf.mxu1  ;;  %5116 = vst [vmem:[#allocation51_spill] sm:$0xff] %v4899_v37 }
 0x1d4   : > { %5115 = vst [vmem:[#allocation50_spill] sm:$0xff] %v4897_v54  ;;  %v3797_v48 = vpop.f32.mrf.mxu0 }
 0x1d5   : > { %v3763_v11 = vpop.f32.mrf.mxu1 }
 0x1d6   : > { %v2464_v39 = vadd.f32 %v3763_v11, %v2170_v49  ;;  %v2629_v37 = vpop.f32.mrf.mxu0  ;;  %v2174_v49 = vadd.f32 %v4789_v35, %v1879_v58 }
 0x1d7   : > { %v2335_v44 = vpop.f32.mrf.mxu1 }
 0x1d8   : > { %v2758_v24 = vadd.f32 %v3797_v48, %v2464_v39  ;;  %v2462_v54 = vadd.f32 %v2335_v44, %v2168_v7  ;;  %v3798_v18 = vpop.f32.mrf.mxu0 }
 0x1d9   : > { %v3764_v28 = vpop.f32.mrf.mxu1 }
 0x1da   : > { %v2797_v8 = vadd.f32 %v4909_v6, %v2758_v24  ;;  %v2756_v55 = vadd.f32 %v2629_v37, %v2462_v54  ;;  %v2465_v36 = vadd.f32 %v3764_v28, %v2171_v46  ;;  %v2632_v16 = vpop.f32.mrf.mxu0  ;;  %v2173_v46 = vadd.f32 %v4801_v42, %v1878_v15 }
 0x1db   : > { %v2338_v11 = vpop.f32.mrf.mxu1  ;;  %v1884_v42 = vadd.f32 %v4811_v5, %v4710_v4  ;;  %v1887_v4 = vadd.f32 %v4819_v27, %v4716_v63 }
 0x1dc   : > { %v2795_v48 = vadd.f32 %v4909_v6, %v2756_v55  ;;  %v2759_v44 = vadd.f32 %v3798_v18, %v2465_v36  ;;  %v2463_v7 = vadd.f32 %v2338_v11, %v2169_v45  ;;  %v2829_v26 = vmax.f32 %v2797_v8, 0.0  ;;  %v3801_v54 = vpop.f32.mrf.mxu0 }
 0x1dd   : > { %v3767_v37 = vpop.f32.mrf.mxu1  ;;  %v2175_v45 = vadd.f32 %v4797_v40, %v1880_v23  ;;  %v2178_v55 = vadd.f32 %v4805_v17, %v1883_v1 }
 0x1de   : > { %v2827_v20 = vmax.f32 %v2795_v48, 0.0  ;;  %v2798_v35 = vadd.f32 %v4909_v6, %v2759_v44  ;;  %v2757_v47 = vadd.f32 %v2632_v16, %v2463_v7  ;;  %v2468_v25 = vadd.f32 %v3767_v37, %v2174_v49  ;;  %v2645_v39 = vpop.f32.mrf.mxu0 }
 0x1df   : > { %v2351_v21 = vpop.f32.mrf.mxu1  ;;  %v2176_v44 = vadd.f32 %v4809_v2, %v1881_v29 }
 0x1e0   : > { %v2859_v58 = vmax.f32 %v2827_v20, %v2829_v26  ;;  %v2796_v10 = vadd.f32 %v4909_v6, %v2757_v47  ;;  %v2762_v59 = vadd.f32 %v3801_v54, %v2468_v25  ;;  %v2466_v24 = vadd.f32 %v2351_v21, %v2172_v33  ;;  %v3802_v18 = vpop.f32.mrf.mxu0 }
 0x1e1   : > { %v3768_v28 = vpop.f32.mrf.mxu1  ;;  %v2830_v56 = vmax.f32 %v2798_v35, 0.0  ;;  %v1882_v26 = vadd.f32 %v4815_v19, %v4713_v22  ;;  %v2179_v35 = vadd.f32 %v4813_v9, %v1884_v42  ;;  %v1885_v33 = vadd.f32 %v4823_v60, %v4719_v0 }
 0x1e2   : > { %2876 = vst.msk [vmem:[#allocation2] sm:$0xff] %vm2875_vm3, %v2859_v58  ;;  %v2828_v53 = vmax.f32 %v2796_v10, 0.0  ;;  %v2469_v8 = vadd.f32 %v3768_v28, %v2175_v45  ;;  %v2801_v40 = vadd.f32 %v4909_v6, %v2762_v59  ;;  %v2760_v36 = vadd.f32 %v2645_v39, %v2466_v24  ;;  %v2648_v30 = vpop.f32.mrf.mxu0 }
 0x1e3   : > { %v2354_v49 = vpop.f32.mrf.mxu1  ;;  %v2177_v58 = vadd.f32 %v4817_v51, %v1882_v26  ;;  %v2182_v9 = vadd.f32 %v4821_v38, %v1887_v4  ;;  %v1888_v0 = vadd.f32 %v4827_v57, %v4722_v14  ;;  %v2180_v28 = vadd.f32 %v4825_v3, %v1885_v33  ;;  %v5117_v4 = vld [vmem:[#allocation9_spill] sm:$0xff] }
 0x1e4   : > { %v2860_v11 = vmax.f32 %v2828_v53, %v2830_v56  ;;  %v2763_v16 = vadd.f32 %v3802_v18, %v2469_v8  ;;  %v2467_v23 = vadd.f32 %v2354_v49, %v2173_v46  ;;  %v2799_v34 = vadd.f32 %v4909_v6, %v2760_v36  ;;  %v3805_v48 = vpop.f32.mrf.mxu0 }
 0x1e5   : > { %v3771_v62 = vpop.f32.mrf.mxu1  ;;  %v2833_v5 = vmax.f32 %v2801_v40, 0.0  ;;  %v1886_v18 = vadd.f32 %v4831_v61, %v4725_v12  ;;  %v1891_v12 = vadd.f32 %v4835_v43, %v4728_v32  ;;  %v2183_v49 = vadd.f32 %v4829_v52, %v1888_v0 }
 0x1e6   : > { %2877 = vst.msk [vmem:[#allocation2 + $0x8] sm:$0xff] %vm2875_vm3, %v2860_v11  ;;  %v2802_v17 = vadd.f32 %v4909_v6, %v2763_v16  ;;  %v2761_v7 = vadd.f32 %v2648_v30, %v2467_v23  ;;  %v2472_v15 = vadd.f32 %v3771_v62, %v2178_v55  ;;  %v2831_v37 = vmax.f32 %v2799_v34, 0.0  ;;  %v2661_v20 = vpop.f32.mrf.mxu0 }
 0x1e7   : > { %v2367_v54 = vpop.f32.mrf.mxu1  ;;  %v1889_v16 = vadd.f32 %v4839_v31, %v4731_v50  ;;  %v2181_v32 = vadd.f32 %v4833_v13, %v1886_v18  ;;  %v5118_v50 = vld [vmem:[#allocation24_spill] sm:$0xff]  ;;  %v5119_v13 = vld [vmem:[#allocation23_spill] sm:$0xff] }
 0x1e8   : > { %v2800_v2 = vadd.f32 %v4909_v6, %v2761_v7  ;;  %v2766_v47 = vadd.f32 %v3805_v48, %v2472_v15  ;;  %v2470_v25 = vadd.f32 %v2367_v54, %v2176_v44  ;;  %v2861_v1 = vmax.f32 %v2831_v37, %v2833_v5  ;;  %v3806_v22 = vpop.f32.mrf.mxu0 }
 0x1e9   : > { %v2834_v21 = vmax.f32 %v2802_v17, 0.0  ;;  %v3772_v39 = vpop.f32.mrf.mxu1  ;;  %v2186_v44 = vadd.f32 %v4837_v41, %v1891_v12  ;;  %v1892_v31 = vadd.f32 %v5118_v50, %v5117_v4  ;;  %v5126_v12 = vld [vmem:[#allocation29_spill] sm:$0xff] }
 0x1ea   : > { %v2832_v19 = vmax.f32 %v2800_v2, 0.0  ;;  %v2805_v63 = vadd.f32 %v4909_v6, %v2766_v47  ;;  %v2764_v27 = vadd.f32 %v2661_v20, %v2470_v25  ;;  %v2473_v45 = vadd.f32 %v3772_v39, %v2179_v35  ;;  %2878 = vst.msk [vmem:[#allocation2 + $0x10] sm:$0xff] %vm2875_vm3, %v2861_v1  ;;  %v2664_v59 = vpop.f32.mrf.mxu0  ;;  %v5120_v35 = vld [vmem:[#allocation10_spill] sm:$0xff] }
 0x1eb   : > { %v2370_v10 = vpop.f32.mrf.mxu1  ;;  %v2184_v20 = vadd.f32 %v5119_v13, %v1889_v16  ;;  %v5121_v2 = vld [vmem:[#allocation26_spill] sm:$0xff] }
 0x1ec   : > { %v2862_v60 = vmax.f32 %v2832_v19, %v2834_v21  ;;  %v2803_v46 = vadd.f32 %v4909_v6, %v2764_v27  ;;  %v2767_v24 = vadd.f32 %v3806_v22, %v2473_v45  ;;  %v2471_v29 = vadd.f32 %v2370_v10, %v2177_v58  ;;  %v3809_v14 = vpop.f32.mrf.mxu0  ;;  %v5122_v45 = vld [vmem:[#allocation11_spill] sm:$0xff]  ;;  %v5123_v58 = vld [vmem:[#allocation28_spill] sm:$0xff] }
 0x1ed   : > { %v2892_v51 = vld [vmem:[#allocation2] ss:$2 sm:$0xff]  ;;  %v2908_v38 = vld [vmem:[#allocation2 + $0x1] ss:$2 sm:$0xff]  ;;  %v3775_v56 = vpop.f32.mrf.mxu1  ;;  %v2837_v53 = vmax.f32 %v2805_v63, 0.0  ;;  %v1890_v47 = vadd.f32 %v5121_v2, %v5120_v35 }
 0x1ee   : > { %v2923_v57 = vmax.f32 %v2892_v51, %v2908_v38  ;;  %2879 = vst.msk [vmem:[#allocation2 + $0x18] sm:$0xff] %vm2875_vm3, %v2862_v60  ;;  %v2835_v8 = vmax.f32 %v2803_v46, 0.0  ;;  %v2476_v3 = vadd.f32 %v3775_v56, %v2182_v9  ;;  %v2806_v61 = vadd.f32 %v4909_v6, %v2767_v24  ;;  %v2677_v36 = vpop.f32.mrf.mxu0  ;;  %v5124_v60 = vld [vmem:[#allocation25_spill] sm:$0xff]  ;;  %v5125_v51 = vld [vmem:[#allocation27_spill] sm:$0xff]  ;;  %v5135_v35 = vld [vmem:[#allocation36_spill] sm:$0xff] }
 0x1ef   : > { %v2765_v55 = vadd.f32 %v2664_v59, %v2471_v29  ;;  %v2383_v40 = vpop.f32.mrf.mxu1  ;;  %v1895_v9 = vadd.f32 %v5123_v58, %v5122_v45  ;;  %v2187_v46 = vadd.f32 %v5124_v60, %v1892_v31  ;;  %v2185_v38 = vadd.f32 %v5125_v51, %v1890_v47 }
 0x1f0   : > { %2931 = vst.msk [vmem:[%s4962_s9] sm:$0xff] %vm2875_vm3, %v2923_v57  ;;  %v2863_v30 = vmax.f32 %v2835_v8, %v2837_v53  ;;  %v2770_v42 = vadd.f32 %v3809_v14, %v2476_v3  ;;  %v2474_v11 = vadd.f32 %v2383_v40, %v2180_v28  ;;  %v3810_v62 = vpop.f32.mrf.mxu0  ;;  %v2838_v17 = vmax.f32 %v2806_v61, 0.0  ;;  %v5128_v40 = vld [vmem:[#allocation30_spill] sm:$0xff] }
 0x1f1   : > { %v2804_v23 = vadd.f32 %v4909_v6, %v2765_v55  ;;  %v3776_v34 = vpop.f32.mrf.mxu1  ;;  %v2190_v61 = vadd.f32 %v5126_v12, %v1895_v9  ;;  %v5127_v55 = vld [vmem:[#allocation12_spill] sm:$0xff]  ;;  %v5143_v12 = vld [vmem:[#allocation39_spill] sm:$0xff] }
 0x1f2   : > { %2880 = vst.msk [vmem:[#allocation2 + $0x20] sm:$0xff] %vm2875_vm3, %v2863_v30  ;;  %v2809_v43 = vadd.f32 %v4909_v6, %v2770_v42  ;;  %v2768_v48 = vadd.f32 %v2677_v36, %v2474_v11  ;;  %v2477_v52 = vadd.f32 %v3776_v34, %v2183_v49  ;;  %v2680_v26 = vpop.f32.mrf.mxu0  ;;  %v1893_v36 = vadd.f32 %v5128_v40, %v5127_v55  ;;  %v5129_v49 = vld [vmem:[#allocation13_spill] sm:$0xff]  ;;  %v5130_v30 = vld [vmem:[#allocation32_spill] sm:$0xff] }
 0x1f3   : > { %v2836_v7 = vmax.f32 %v2804_v23, 0.0  ;;  %v2386_v15 = vpop.f32.mrf.mxu1  ;;  %v1896_v42 = vadd.f32 %v5130_v30, %v5129_v49 }
 0x1f4   : > { %v2807_v5 = vadd.f32 %v4909_v6, %v2768_v48  ;;  %v2771_v37 = vadd.f32 %v3810_v62, %v2477_v52  ;;  %v2475_v54 = vadd.f32 %v2386_v15, %v2181_v32  ;;  %v2841_v1 = vmax.f32 %v2809_v43, 0.0  ;;  %v3813_v39 = vpop.f32.mrf.mxu0  ;;  %v5131_v48 = vld [vmem:[#allocation14_spill] sm:$0xff] }
 0x1f5   : > { %v2894_v25 = vld [vmem:[#allocation2 + $0x10] ss:$2 sm:$0xff]  ;;  %v2910_v33 = vld [vmem:[#allocation2 + $0x11] ss:$2 sm:$0xff]  ;;  %v2864_v41 = vmax.f32 %v2836_v7, %v2838_v17  ;;  %v3779_v21 = vpop.f32.mrf.mxu1 }
 0x1f6   : > { %v2924_v22 = vmax.f32 %v2894_v25, %v2910_v33  ;;  %v2839_v19 = vmax.f32 %v2807_v5, 0.0  ;;  %v2810_v63 = vadd.f32 %v4909_v6, %v2771_v37  ;;  %v2769_v27 = vadd.f32 %v2680_v26, %v2475_v54  ;;  %v2693_v0 = vpop.f32.mrf.mxu0  ;;  %v5132_v52 = vld [vmem:[#allocation34_spill] sm:$0xff]  ;;  %v5133_v54 = vld [vmem:[#allocation31_spill] sm:$0xff] }
 0x1f7   : > { %2881 = vst.msk [vmem:[#allocation2 + $0x28] sm:$0xff] %vm2875_vm3, %v2864_v41  ;;  %v2480_v10 = vadd.f32 %v3779_v21, %v2186_v44  ;;  %v2399_v59 = vpop.f32.mrf.mxu1  ;;  %v1894_v44 = vadd.f32 %v5132_v52, %v5131_v48  ;;  %v2188_v13 = vadd.f32 %v5133_v54, %v1893_v36  ;;  %v5136_v41 = vld [vmem:[#allocation33_spill] sm:$0xff]  ;;  %v5147_v48 = vld [vmem:[#allocation44_spill] sm:$0xff]  ;;  %v5150_v54 = vld [vmem:[#allocation46_spill] sm:$0xff] }
 0x1f8   : > { %2932 = vst.msk [vmem:[%s4962_s9 + $0x8] sm:$0xff] %vm2875_vm3, %v2924_v22  ;;  %v2865_v24 = vmax.f32 %v2839_v19, %v2841_v1  ;;  %v2808_v28 = vadd.f32 %v4909_v6, %v2769_v27  ;;  %v2478_v18 = vadd.f32 %v2399_v59, %v2184_v20  ;;  %v3814_v14 = vpop.f32.mrf.mxu0  ;;  %v2842_v57 = vmax.f32 %v2810_v63, 0.0  ;;  %v5134_v20 = vld [vmem:[#allocation15_spill] sm:$0xff]  ;;  %v5137_v19 = vld [vmem:[#allocation16_spill] sm:$0xff]  ;;  %v5138_v63 = vld [vmem:[#allocation38_spill] sm:$0xff] }
 0x1f9   : > { %v2774_v29 = vadd.f32 %v3813_v39, %v2480_v10  ;;  %v3780_v56 = vpop.f32.mrf.mxu1  ;;  %v1899_v2 = vadd.f32 %v5135_v35, %v5134_v20  ;;  %v2191_v1 = vadd.f32 %v5136_v41, %v1896_v42  ;;  %v1897_v27 = vadd.f32 %v5138_v63, %v5137_v19  ;;  %v5139_v10 = vld [vmem:[#allocation35_spill] sm:$0xff] }
 0x1fa   : > { %2882 = vst.msk [vmem:[#allocation2 + $0x30] sm:$0xff] %vm2875_vm3, %v2865_v24  ;;  %v2840_v53 = vmax.f32 %v2808_v28, 0.0  ;;  %v2772_v8 = vadd.f32 %v2693_v0, %v2478_v18  ;;  %v2481_v3 = vadd.f32 %v3780_v56, %v2187_v46  ;;  %v2696_v23 = vpop.f32.mrf.mxu0  ;;  %v2189_v59 = vadd.f32 %v5139_v10, %v1894_v44  ;;  %v5140_v24 = vld [vmem:[#allocation37_spill] sm:$0xff] }
 0x1fb   : > { %v2813_v11 = vadd.f32 %v4909_v6, %v2774_v29  ;;  %v2402_v16 = vpop.f32.mrf.mxu1  ;;  %v2194_v28 = vadd.f32 %v5140_v24, %v1899_v2  ;;  %v5141_v56 = vld [vmem:[#allocation17_spill] sm:$0xff]  ;;  %v5156_v24 = vld [vmem:[#allocation22_spill] sm:$0xff] }
 0x1fc   : > { %v2866_v34 = vmax.f32 %v2840_v53, %v2842_v57  ;;  %v2811_v62 = vadd.f32 %v4909_v6, %v2772_v8  ;;  %v2775_v32 = vadd.f32 %v3814_v14, %v2481_v3  ;;  %v2479_v43 = vadd.f32 %v2402_v16, %v2185_v38  ;;  %v3817_v15 = vpop.f32.mrf.mxu0  ;;  %v5142_v14 = vld [vmem:[#allocation40_spill] sm:$0xff] }
 0x1fd   : > { %v2845_v17 = vmax.f32 %v2813_v11, 0.0  ;;  %v3783_v7 = vpop.f32.mrf.mxu1  ;;  %v1900_v57 = vadd.f32 %v5142_v14, %v5141_v56 }
 0x1fe   : > { %v2896_v26 = vld [vmem:[#allocation2 + $0x20] ss:$2 sm:$0xff]  ;;  %v2912_v4 = vld [vmem:[#allocation2 + $0x21] ss:$2 sm:$0xff]  ;;  %2883 = vst.msk [vmem:[#allocation2 + $0x38] sm:$0xff] %vm2875_vm3, %v2866_v34  ;;  %v2843_v50 = vmax.f32 %v2811_v62, 0.0  ;;  %v2814_v31 = vadd.f32 %v4909_v6, %v2775_v32  ;;  %v2773_v5 = vadd.f32 %v2696_v23, %v2479_v43  ;;  %v2484_v37 = vadd.f32 %v3783_v7, %v2190_v61  ;;  %v2709_v33 = vpop.f32.mrf.mxu0 }
 0x1ff   : > { %v2925_v47 = vmax.f32 %v2896_v26, %v2912_v4  ;;  %v2415_v25 = vpop.f32.mrf.mxu1  ;;  %v2192_v61 = vadd.f32 %v5143_v12, %v1897_v27  ;;  %v5144_v34 = vld [vmem:[#allocation18_spill] sm:$0xff]  ;;  %v5146_v43 = vld [vmem:[#allocation19_spill] sm:$0xff]  ;;  %v5148_v26 = vld [vmem:[#allocation41_spill] sm:$0xff] }
 0x200   : > { %v2867_v21 = vmax.f32 %v2843_v50, %v2845_v17  ;;  %v2812_v39 = vadd.f32 %v4909_v6, %v2773_v5  ;;  %v2778_v22 = vadd.f32 %v3817_v15, %v2484_v37  ;;  %v2482_v45 = vadd.f32 %v2415_v25, %v2188_v13  ;;  %v3818_v9 = vpop.f32.mrf.mxu0  ;;  %v5145_v62 = vld [vmem:[#allocation42_spill] sm:$0xff]  ;;  %v5149_v37 = vld [vmem:[#allocation20_spill] sm:$0xff] }
 0x201   : > { %2933 = vst.msk [vmem:[%s4962_s9 + $0x10] sm:$0xff] %vm2875_vm3, %v2925_v47  ;;  %v3784_v58 = vpop.f32.mrf.mxu1  ;;  %v2846_v0 = vmax.f32 %v2814_v31, 0.0  ;;  %v1898_v32 = vadd.f32 %v5145_v62, %v5144_v34  ;;  %v1903_v52 = vadd.f32 %v5147_v48, %v5146_v43  ;;  %v2195_v4 = vadd.f32 %v5148_v26, %v1900_v57  ;;  %v5159_v62 = vld [vmem:[#allocation51_spill] sm:$0xff] }
 0x202   : > { %2884 = vst.msk [vmem:[#allocation2 + $0x40] sm:$0xff] %vm2875_vm3, %v2867_v21  ;;  %v2844_v60 = vmax.f32 %v2812_v39, 0.0  ;;  %v2485_v46 = vadd.f32 %v3784_v58, %v2191_v1  ;;  %v2817_v18 = vadd.f32 %v4909_v6, %v2778_v22  ;;  %v2776_v51 = vadd.f32 %v2709_v33, %v2482_v45  ;;  %v2712_v29 = vpop.f32.mrf.mxu0  ;;  %v5151_v21 = vld [vmem:[#allocation43_spill] sm:$0xff]  ;;  %v5152_v22 = vld [vmem:[#allocation45_spill] sm:$0xff]  ;;  %v5154_v58 = vld [vmem:[#allocation48_spill] sm:$0xff] }
 0x203   : > { %v2418_v38 = vpop.f32.mrf.mxu1  ;;  %v1901_v13 = vadd.f32 %v5150_v54, %v5149_v37  ;;  %v2193_v39 = vadd.f32 %v5151_v21, %v1898_v32  ;;  %v2198_v19 = vadd.f32 %v5152_v22, %v1903_v52  ;;  %v5153_v45 = vld [vmem:[#allocation21_spill] sm:$0xff] }
 0x204   : > { %v2868_v53 = vmax.f32 %v2844_v60, %v2846_v0  ;;  %v2779_v8 = vadd.f32 %v3818_v9, %v2485_v46  ;;  %v2483_v3 = vadd.f32 %v2418_v38, %v2189_v59  ;;  %v2815_v36 = vadd.f32 %v4909_v6, %v2776_v51  ;;  %v3821_v30 = vpop.f32.mrf.mxu0  ;;  %v5155_v60 = vld [vmem:[#allocation47_spill] sm:$0xff] }
 0x205   : > { %v2898_v55 = vld [vmem:[#allocation2 + $0x30] ss:$2 sm:$0xff]  ;;  %v2914_v40 = vld [vmem:[#allocation2 + $0x31] ss:$2 sm:$0xff]  ;;  %v3787_v49 = vpop.f32.mrf.mxu1  ;;  %v2849_v44 = vmax.f32 %v2817_v18, 0.0  ;;  %v1904_v9 = vadd.f32 %v5154_v58, %v5153_v45  ;;  %v2196_v46 = vadd.f32 %v5155_v60, %v1901_v13 }
 0x206   : > { %v2926_v42 = vmax.f32 %v2898_v55, %v2914_v40  ;;  %2885 = vst.msk [vmem:[#allocation2 + $0x48] sm:$0xff] %vm2875_vm3, %v2868_v53  ;;  %v2818_v11 = vadd.f32 %v4909_v6, %v2779_v8  ;;  %v2777_v16 = vadd.f32 %v2712_v29, %v2483_v3  ;;  %v2488_v23 = vadd.f32 %v3787_v49, %v2194_v28  ;;  %v2725_v15 = vpop.f32.mrf.mxu0  ;;  %v5157_v28 = vld [vmem:[#allocation50_spill] sm:$0xff] }
 0x207   : > { %v2847_v17 = vmax.f32 %v2815_v36, 0.0  ;;  %v2431_v7 = vpop.f32.mrf.mxu1  ;;  %v1902_v18 = vadd.f32 %v5157_v28, %v5156_v24  ;;  %v5158_v36 = vld [vmem:[#allocation49_spill] sm:$0xff] }
 0x208   : > { %2934 = vst.msk [vmem:[%s4962_s9 + $0x18] sm:$0xff] %vm2875_vm3, %v2926_v42  ;;  %v2816_v50 = vadd.f32 %v4909_v6, %v2777_v16  ;;  %v2782_v31 = vadd.f32 %v3821_v30, %v2488_v23  ;;  %v2486_v5 = vadd.f32 %v2431_v7, %v2192_v61  ;;  %v2850_v35 = vmax.f32 %v2818_v11, 0.0  ;;  %v3822_v47 = vpop.f32.mrf.mxu0 }
 0x209   : > { %v2869_v20 = vmax.f32 %v2847_v17, %v2849_v44  ;;  %v3788_v2 = vpop.f32.mrf.mxu1  ;;  %v2199_v49 = vadd.f32 %v5158_v36, %v1904_v9  ;;  %v2197_v32 = vadd.f32 %v5159_v62, %v1902_v18 }
 0x20a   : > { %v2848_v25 = vmax.f32 %v2816_v50, 0.0  ;;  %v2821_v33 = vadd.f32 %v4909_v6, %v2782_v31  ;;  %v2780_v41 = vadd.f32 %v2725_v15, %v2486_v5  ;;  %v2489_v1 = vadd.f32 %v3788_v2, %v2195_v4  ;;  %v2728_v27 = vpop.f32.mrf.mxu0 }
 0x20b   : > { %2886 = vst.msk [vmem:[#allocation2 + $0x50] sm:$0xff] %vm2875_vm3, %v2869_v20  ;;  %v2434_v63 = vpop.f32.mrf.mxu1 }
 0x20c   : > { %v2870_v10 = vmax.f32 %v2848_v25, %v2850_v35  ;;  %v2819_v59 = vadd.f32 %v4909_v6, %v2780_v41  ;;  %v2783_v0 = vadd.f32 %v3822_v47, %v2489_v1  ;;  %v2487_v29 = vadd.f32 %v2434_v63, %v2193_v39  ;;  %v3825_v14 = vpop.f32.mrf.mxu0 }
 0x20d   : > { %v2900_v51 = vld [vmem:[#allocation2 + $0x40] ss:$2 sm:$0xff]  ;;  %v2916_v38 = vld [vmem:[#allocation2 + $0x41] ss:$2 sm:$0xff]  ;;  %v3791_v56 = vpop.f32.mrf.mxu1  ;;  %v2853_v53 = vmax.f32 %v2821_v33, 0.0 }
 0x20e   : > { %v2927_v57 = vmax.f32 %v2900_v51, %v2916_v38  ;;  %2887 = vst.msk [vmem:[#allocation2 + $0x58] sm:$0xff] %vm2875_vm3, %v2870_v10  ;;  %v2851_v8 = vmax.f32 %v2819_v59, 0.0  ;;  %v2492_v3 = vadd.f32 %v3791_v56, %v2198_v19  ;;  %v2822_v12 = vadd.f32 %v4909_v6, %v2783_v0  ;;  %v2741_v40 = vpop.f32.mrf.mxu0 }
 0x20f   : > { %v2781_v61 = vadd.f32 %v2728_v27, %v2487_v29  ;;  %v2447_v55 = vpop.f32.mrf.mxu1 }
 0x210   : > { %2935 = vst.msk [vmem:[%s4962_s9 + $0x20] sm:$0xff] %vm2875_vm3, %v2927_v57  ;;  %v2871_v30 = vmax.f32 %v2851_v8, %v2853_v53  ;;  %v2786_v42 = vadd.f32 %v3825_v14, %v2492_v3  ;;  %v2490_v11 = vadd.f32 %v2447_v55, %v2196_v46  ;;  %v3826_v34 = vpop.f32.mrf.mxu0  ;;  %v2854_v44 = vmax.f32 %v2822_v12, 0.0 }
 0x211   : > { %v2820_v16 = vadd.f32 %v4909_v6, %v2781_v61  ;;  %v3792_v23 = vpop.f32.mrf.mxu1 }
 0x212   : > { %2888 = vst.msk [vmem:[#allocation2 + $0x60] sm:$0xff] %vm2875_vm3, %v2871_v30  ;;  %v2825_v43 = vadd.f32 %v4909_v6, %v2786_v42  ;;  %v2784_v48 = vadd.f32 %v2741_v40, %v2490_v11  ;;  %v2493_v52 = vadd.f32 %v3792_v23, %v2199_v49  ;;  %v2744_v54 = vpop.f32.mrf.mxu0 }
 0x213   : > { %v2852_v17 = vmax.f32 %v2820_v16, 0.0  ;;  %v2450_v7 = vpop.f32.mrf.mxu1 }
 0x214   : > { %v2823_v15 = vadd.f32 %v4909_v6, %v2784_v48  ;;  %v2787_v26 = vadd.f32 %v3826_v34, %v2493_v52  ;;  %v2491_v4 = vadd.f32 %v2450_v7, %v2197_v32  ;;  %v2857_v37 = vmax.f32 %v2825_v43, 0.0 }
 0x215   : > { %v2902_v50 = vld [vmem:[#allocation2 + $0x50] ss:$2 sm:$0xff]  ;;  %v2918_v31 = vld [vmem:[#allocation2 + $0x51] ss:$2 sm:$0xff]  ;;  %v2872_v5 = vmax.f32 %v2852_v17, %v2854_v44 }
 0x216   : > { %v2928_v13 = vmax.f32 %v2902_v50, %v2918_v31  ;;  %v2855_v20 = vmax.f32 %v2823_v15, 0.0  ;;  %v2826_v35 = vadd.f32 %v4909_v6, %v2787_v26  ;;  %v2785_v2 = vadd.f32 %v2744_v54, %v2491_v4 }
 0x217   : > { %2889 = vst.msk [vmem:[#allocation2 + $0x68] sm:$0xff] %vm2875_vm3, %v2872_v5 }
 0x218   : > { %2936 = vst.msk [vmem:[%s4962_s9 + $0x28] sm:$0xff] %vm2875_vm3, %v2928_v13  ;;  %v2873_v47 = vmax.f32 %v2855_v20, %v2857_v37  ;;  %v2824_v25 = vadd.f32 %v4909_v6, %v2785_v2  ;;  %v2858_v33 = vmax.f32 %v2826_v35, 0.0 }
 0x21a   : > { %2890 = vst.msk [vmem:[#allocation2 + $0x70] sm:$0xff] %vm2875_vm3, %v2873_v47  ;;  %v2856_v41 = vmax.f32 %v2824_v25, 0.0 }
 0x21c   : > { %v2874_v1 = vmax.f32 %v2856_v41, %v2858_v33 }
 0x21e   : > { %v2904_v21 = vld [vmem:[#allocation2 + $0x60] ss:$2 sm:$0xff]  ;;  %v2920_v39 = vld [vmem:[#allocation2 + $0x61] ss:$2 sm:$0xff]  ;;  %2891 = vst.msk [vmem:[#allocation2 + $0x78] sm:$0xff] %vm2875_vm3, %v2874_v1 }
 0x21f   : > { %v2929_v22 = vmax.f32 %v2904_v21, %v2920_v39 }
 0x221   : > { %2937 = vst.msk [vmem:[%s4962_s9 + $0x30] sm:$0xff] %vm2875_vm3, %v2929_v22 }
 0x225   : > { %v2906_v19 = vld [vmem:[#allocation2 + $0x70] ss:$2 sm:$0xff]  ;;  %v2922_v63 = vld [vmem:[#allocation2 + $0x71] ss:$2 sm:$0xff] }
 0x226   : > { %v2930_v27 = vmax.f32 %v2906_v19, %v2922_v63 }
 0x228   : > { %2938 = vst.msk [vmem:[%s4962_s9 + $0x38] sm:$0xff] %vm2875_vm3, %v2930_v27 }
 0x229 PF: > { %s15_s12 = sadd.s32 1, %s3928_s12  }
 0x22a   : > { %p12_p2 = scmp.ge.s32.totalorder %s15_s12, 4  }
 0x22c   :  { %14 = sbr.rel (!%p12_p2) target bundleno = 2 (0x2), region = 96 }
 0x231   :  { %2960 = vsyncpa [#allocation4], 1 }
 0x232   :  { %2962 = vsyncpa [#allocation4 + $0x1], 1 }
 0x233   :  { %2963 = vsyncpa [#allocation6], 1 }

// kernel: wall_detector_forward.5
= control target key start
LH: loop header
LB: loop body
LE: loop exit
PB: predicated region body
PF: predicated region fallthrough
CT: control target
= control target key end

     0   :  { %10 = vsyncpa [#allocation4], 0  ;;  %s3633_s18 = smov 0   ;;  %s4190_s0 = inlined_call_operand.vmem [shape: f32[2,1024], index: 0, kind: input, shape index: {}]   ;;  %s4191_s1 = inlined_call_operand.vmem [shape: bf16[1024,1024], index: 1, kind: input, shape index: {}]   ;;  %s4192_s2 = inlined_call_operand.vmem [shape: f32[1,1024], index: 2, kind: input, shape index: {}]   ;;  %s4193_s3 = inlined_call_operand.vmem [shape: bf16[1024,2], index: 3, kind: input, shape index: {}]   ;;  %s4194_s4 = inlined_call_operand.vmem [shape: f32[1,2], index: 4, kind: input, shape index: {}]   ;;  %s4195_s5 = inlined_call_operand.hbm [shape: f32[2,2], index: 5, kind: output, shape index: {}]  }
   0x1 LB: > { %s3639_s19 = sadd.s32 4294967295, %s3598_s18   ;;  %p3060_p0 = scmp.ge.s32.totalorder %s3598_s18, 1  ;;  %s3598_s18 = sphi %s3633_s18, %s16_s18  }
   0x2   : > { %p196_p1 = scmp.lt.s32.totalorder %s3598_s18, 3 }
   0x4   : > { %p197_p2 = pnand %p3060_p0, %p196_p1 }
   0x5   : > { %s3061_s20 = sshll.u32 (!%p197_p2), %s3639_s19, 2  ;;  %s3063_s21 = sshll.u32 (!%p197_p2), %s3639_s19, 6 }
   0x6   : > { %200 = sbr.rel (%p197_p2) target bundleno = 773 (0x305), region = 40  ;;  %p226_p3 = scmp.lt.s32.totalorder (!%p197_p2), %s3061_s20, 7 }
   0x7   : > { %p232_p4 = scmp.lt.s32.totalorder (!%p197_p2), %s3063_s21, 127  ;;  %p3066_p5 = scmp.ne.s32.totalorder (!%p197_p2), %s3639_s19, 0 }
   0xb   : > { %s4197_s20 = smov (!%p226_p3, %s3061_s20), 7  ;;  %s4199_s21 = smov (!%p232_p4, %s3063_s21), 127 }
   0xc   : > { %s3062_s22 = sshll.u32 %s4197_s20, 1  ;;  %s3393_s26 = sshll.u32 %s4199_s21, 5 }
   0xd   : > { %s3648_s25 = scalar_lea.vmem %s4190_s0, %s3062_s22  ;;  %s3653_s29 = scalar_lea.vmem %s4191_s1, %s3393_s26 }
   0xe   : > { %242 = sbr.rel (%p3066_p5) target bundleno = 21 (0x15), region = 44 }
  0x13   : > { %v3600_v0 = vmov 0.0  }
  0x14   : > { %243 = vst [vmem:[#allocation2] sm:$0xff] %v3600_v0  ;;  %244 = vst [vmem:[#allocation2 + $0x8] sm:$0xff] %v3600_v0 }
  0x15 PF: > { %v330_v1 = vld [vmem:[%s3653_s29 + $0x1c0] sm:$0xff]  ;;  %v3601_v33 = vmov 1983009808   ;;  %v253_v35 = vlaneseq  ;;  %p3323_p6 = scmp.ne.s32.totalorder %s3639_s19, 1 }
  0x16   : > { %v334_v2 = vld [vmem:[%s3653_s29 + $0x1e0] sm:$0xff]  ;;  %v251_v34 = vunpack.c.l.s4 %v3601_v33 }
  0x17   : > { %v458_v3 = vld [vmem:[%s3653_s29 + $0x5c0] sm:$0xff]  ;;  %v3124_v4 = vcombine.high %v330_v1, %v334_v2  ;;  %v3123_v6 = vcombine.low %v330_v1, %v334_v2  ;;  %v3678_v45 = vshrl.u32 %v253_v35, 7 }
  0x18   : > { %v462_v5 = vld [vmem:[%s3653_s29 + $0x5e0] sm:$0xff]  ;;  %v252_v44 = vunpack.c.0.s8 %v251_v34 }
  0x19   : > { %v322_v7 = vld [vmem:[%s3653_s29 + $0x180] sm:$0xff]  ;;  %v3252_v9 = vcombine.high %v458_v3, %v462_v5  ;;  %v3251_v10 = vcombine.low %v458_v3, %v462_v5  ;;  %1810 = vmatprep.subr.bf16.mxu0 %v3124_v4 }
  0x1a   : > { %v326_v8 = vld [vmem:[%s3653_s29 + $0x1a0] sm:$0xff]  ;;  %1811 = vmatpush1.bf16.msra.mxu0 %v3123_v6  ;;  %v3685_v54 = vsub.s32 %v252_v44, %v3678_v45 }
  0x1b   : > { %v3116_v11 = vcombine.high %v322_v7, %v326_v8  ;;  %v450_v12 = vld [vmem:[%s3653_s29 + $0x580] sm:$0xff]  ;;  %1851 = vmatprep.subr.bf16.mxu1 %v3252_v9  ;;  %v3115_v19 = vcombine.low %v322_v7, %v326_v8 }
  0x1c   : > { %v454_v13 = vld [vmem:[%s3653_s29 + $0x5a0] sm:$0xff]  ;;  %1852 = vmatpush1.bf16.msra.mxu1 %v3251_v10 }
  0x1d   : > { %v314_v14 = vld [vmem:[%s3653_s29 + $0x140] sm:$0xff]  ;;  %v3244_v15 = vcombine.high %v450_v12, %v454_v13  ;;  %1812 = vmatprep.subr.bf16.mxu0 %v3116_v11  ;;  %v3243_v20 = vcombine.low %v450_v12, %v454_v13 }
  0x1e   : > { %v318_v16 = vld [vmem:[%s3653_s29 + $0x160] sm:$0xff]  ;;  %1813 = vmatpush1.bf16.msra.mxu0 %v3115_v19 }
  0x1f   : > { %v442_v17 = vld [vmem:[%s3653_s29 + $0x540] sm:$0xff]  ;;  %v3108_v21 = vcombine.high %v314_v14, %v318_v16  ;;  %1853 = vmatprep.subr.bf16.mxu1 %v3244_v15  ;;  %v3107_v27 = vcombine.low %v314_v14, %v318_v16 }
  0x20   : > { %v446_v18 = vld [vmem:[%s3653_s29 + $0x560] sm:$0xff]  ;;  %1854 = vmatpush1.bf16.msra.mxu1 %v3243_v20 }
  0x21   : > { %v3236_v22 = vcombine.high %v442_v17, %v446_v18  ;;  %v306_v23 = vld [vmem:[%s3653_s29 + $0x100] sm:$0xff]  ;;  %1814 = vmatprep.subr.bf16.mxu0 %v3108_v21  ;;  %v3235_v28 = vcombine.low %v442_v17, %v446_v18 }
  0x22   : > { %v310_v24 = vld [vmem:[%s3653_s29 + $0x120] sm:$0xff]  ;;  %1815 = vmatpush1.bf16.msra.mxu0 %v3107_v27 }
  0x23   : > { %v434_v25 = vld [vmem:[%s3653_s29 + $0x500] sm:$0xff]  ;;  %v3100_v29 = vcombine.high %v306_v23, %v310_v24  ;;  %1855 = vmatprep.subr.bf16.mxu1 %v3236_v22  ;;  %v3099_v38 = vcombine.low %v306_v23, %v310_v24 }
  0x24   : > { %v438_v26 = vld [vmem:[%s3653_s29 + $0x520] sm:$0xff]  ;;  %1856 = vmatpush1.bf16.msra.mxu1 %v3235_v28 }
  0x25   : > { %v3228_v30 = vcombine.high %v434_v25, %v438_v26  ;;  %v298_v31 = vld [vmem:[%s3653_s29 + $0xc0] sm:$0xff]  ;;  %1816 = vmatprep.subr.bf16.mxu0 %v3100_v29  ;;  %v3227_v39 = vcombine.low %v434_v25, %v438_v26 }
  0x26   : > { %v302_v32 = vld [vmem:[%s3653_s29 + $0xe0] sm:$0xff]  ;;  %1817 = vmatpush1.bf16.msra.mxu0 %v3099_v38 }
  0x27   : > { %v426_v36 = vld [vmem:[%s3653_s29 + $0x4c0] sm:$0xff]  ;;  %v3092_v40 = vcombine.high %v298_v31, %v302_v32  ;;  %1857 = vmatprep.subr.bf16.mxu1 %v3228_v30  ;;  %v3091_v48 = vcombine.low %v298_v31, %v302_v32 }
  0x28   : > { %v430_v37 = vld [vmem:[%s3653_s29 + $0x4e0] sm:$0xff]  ;;  %1858 = vmatpush1.bf16.msra.mxu1 %v3227_v39 }
  0x29   : > { %v3220_v41 = vcombine.high %v426_v36, %v430_v37  ;;  %v290_v42 = vld [vmem:[%s3653_s29 + $0x80] sm:$0xff]  ;;  %1818 = vmatprep.subr.bf16.mxu0 %v3092_v40  ;;  %v3219_v49 = vcombine.low %v426_v36, %v430_v37 }
  0x2a   : > { %v294_v43 = vld [vmem:[%s3653_s29 + $0xa0] sm:$0xff]  ;;  %1819 = vmatpush1.bf16.msra.mxu0 %v3091_v48 }
  0x2b   : > { %v418_v46 = vld [vmem:[%s3653_s29 + $0x480] sm:$0xff]  ;;  %v3084_v50 = vcombine.high %v290_v42, %v294_v43  ;;  %1859 = vmatprep.subr.bf16.mxu1 %v3220_v41  ;;  %v3083_v57 = vcombine.low %v290_v42, %v294_v43 }
  0x2c   : > { %v422_v47 = vld [vmem:[%s3653_s29 + $0x4a0] sm:$0xff]  ;;  %1860 = vmatpush1.bf16.msra.mxu1 %v3219_v49 }
  0x2d   : > { %v3212_v51 = vcombine.high %v418_v46, %v422_v47  ;;  %v282_v52 = vld [vmem:[%s3653_s29 + $0x40] sm:$0xff]  ;;  %1820 = vmatprep.subr.bf16.mxu0 %v3084_v50  ;;  %v3211_v58 = vcombine.low %v418_v46, %v422_v47 }
  0x2e   : > { %v286_v53 = vld [vmem:[%s3653_s29 + $0x60] sm:$0xff]  ;;  %1821 = vmatpush1.bf16.msra.mxu0 %v3083_v57 }
  0x2f   : > { %v410_v55 = vld [vmem:[%s3653_s29 + $0x440] sm:$0xff]  ;;  %v3076_v59 = vcombine.high %v282_v52, %v286_v53  ;;  %1861 = vmatprep.subr.bf16.mxu1 %v3212_v51  ;;  %v3075_v4 = vcombine.low %v282_v52, %v286_v53 }
  0x30   : > { %v414_v56 = vld [vmem:[%s3653_s29 + $0x460] sm:$0xff]  ;;  %1862 = vmatpush1.bf16.msra.mxu1 %v3211_v58 }
  0x31   : > { %v247_v60 = vld [vmem:[%s3648_s25] sm:$0xff]  ;;  %v3204_v61 = vcombine.high %v410_v55, %v414_v56  ;;  %1822 = vmatprep.subr.bf16.mxu0 %v3076_v59  ;;  %v3203_v7 = vcombine.low %v410_v55, %v414_v56 }
  0x32   : > { %v274_v62 = vld [vmem:[%s3653_s29] sm:$0xff]  ;;  %v3693_v0 = vrot.slane %v247_v60, %v3685_v54  ;;  %v249_v1 = vcombine.high %v247_v60, %v247_v60  ;;  %1823 = vmatpush1.bf16.msra.mxu0 %v3075_v4 }
  0x33   : > { %v278_v63 = vld [vmem:[%s3653_s29 + $0x20] sm:$0xff]  ;;  %1863 = vmatprep.subr.bf16.mxu1 %v3204_v61 }
  0x34   : > { %v402_v2 = vld [vmem:[%s3653_s29 + $0x400] sm:$0xff]  ;;  %v264_v5 = vcombine.high %v3693_v0, %v3693_v0  ;;  %v3700_v6 = vrot.slane %v249_v1, %v3685_v54  ;;  %v3068_v8 = vcombine.high %v274_v62, %v278_v63  ;;  %v3067_v16 = vcombine.low %v274_v62, %v278_v63  ;;  %1864 = vmatpush1.bf16.msra.mxu1 %v3203_v7 }
  0x35   : > { %v406_v3 = vld [vmem:[%s3653_s29 + $0x420] sm:$0xff] }
  0x36   : > { %v3196_v9 = vcombine.high %v402_v2, %v406_v3  ;;  %v394_v10 = vld [vmem:[%s3653_s29 + $0x3c0] sm:$0xff]  ;;  %v3704_v12 = vpack.c.bf16 %v264_v5, %v264_v5  ;;  %v265_v13 = vcombine.high %v3700_v6, %v3700_v6  ;;  %1824 = vmatprep.subr.bf16.mxu0 %v3068_v8  ;;  %v3195_v18 = vcombine.low %v402_v2, %v406_v3 }
  0x37   : > { %v398_v11 = vld [vmem:[%s3653_s29 + $0x3e0] sm:$0xff]  ;;  %1825 = vmatpush1.bf16.msra.mxu0 %v3067_v16 }
  0x38   : > { %v522_v14 = vld [vmem:[%s3653_s29 + $0x7c0] sm:$0xff]  ;;  %1842 = vmatprep.mubr.bf16.mxu0 %v3704_v12  ;;  %v3711_v17 = vpack.c.bf16 %v265_v13, %v265_v13  ;;  %v3188_v19 = vcombine.high %v394_v10, %v398_v11  ;;  %1865 = vmatprep.subr.bf16.mxu1 %v3196_v9  ;;  %v3187_v25 = vcombine.low %v394_v10, %v398_v11 }
  0x39   : > { %v526_v15 = vld [vmem:[%s3653_s29 + $0x7e0] sm:$0xff]  ;;  %1866 = vmatpush1.bf16.msra.mxu1 %v3195_v18 }
  0x3a   : > { %v3316_v20 = vcombine.high %v522_v14, %v526_v15  ;;  %v386_v21 = vld [vmem:[%s3653_s29 + $0x380] sm:$0xff]  ;;  %1883 = vmatprep.mubr.bf16.mxu1 %v3711_v17  ;;  %1826 = vmatprep.subr.bf16.mxu0 %v3188_v19  ;;  %v3315_v26 = vcombine.low %v522_v14, %v526_v15  ;;  %v331_v19 = vld [vmem:[%s3653_s29 + $0x1c8] sm:$0xff] }
  0x3b   : > { %v390_v22 = vld [vmem:[%s3653_s29 + $0x3a0] sm:$0xff]  ;;  %1827 = vmatpush2.bf16.msra.mxu0 %v3187_v25 }
  0x3c   : > { %v514_v23 = vld [vmem:[%s3653_s29 + $0x780] sm:$0xff]  ;;  %v3180_v27 = vcombine.high %v386_v21, %v390_v22  ;;  %1867 = vmatprep.subr.bf16.mxu1 %v3316_v20  ;;  %v3179_v33 = vcombine.low %v386_v21, %v390_v22  ;;  %v335_v20 = vld [vmem:[%s3653_s29 + $0x1e8] sm:$0xff] }
  0x3d   : > { %v518_v24 = vld [vmem:[%s3653_s29 + $0x7a0] sm:$0xff]  ;;  %1868 = vmatpush2.bf16.msra.mxu1 %v3315_v26  ;;  %v459_v21 = vld [vmem:[%s3653_s29 + $0x5c8] sm:$0xff]  ;;  %v3126_v25 = vcombine.high %v331_v19, %v335_v20 }
  0x3e   : > { %v3308_v28 = vcombine.high %v514_v23, %v518_v24  ;;  %v378_v29 = vld [vmem:[%s3653_s29 + $0x340] sm:$0xff]  ;;  %1828 = vmatprep.subr.bf16.mxu0 %v3180_v27  ;;  %v3307_v34 = vcombine.low %v514_v23, %v518_v24  ;;  %v463_v22 = vld [vmem:[%s3653_s29 + $0x5e8] sm:$0xff] }
  0x3f   : > { %v382_v30 = vld [vmem:[%s3653_s29 + $0x360] sm:$0xff]  ;;  %1829 = vmatpush2.bf16.msra.mxu0 %v3179_v33  ;;  %v3254_v26 = vcombine.high %v459_v21, %v463_v22  ;;  %v323_v27 = vld [vmem:[%s3653_s29 + $0x188] sm:$0xff]  ;;  %v3125_v33 = vcombine.low %v331_v19, %v335_v20 }
  0x40   : > { %v506_v31 = vld [vmem:[%s3653_s29 + $0x740] sm:$0xff]  ;;  %v3172_v35 = vcombine.high %v378_v29, %v382_v30  ;;  %1869 = vmatprep.subr.bf16.mxu1 %v3308_v28  ;;  %v3171_v41 = vcombine.low %v378_v29, %v382_v30  ;;  %v327_v28 = vld [vmem:[%s3653_s29 + $0x1a8] sm:$0xff]  ;;  %v3750_v29 = vpack.c.bf16 %v3693_v0, %v3693_v0 }
  0x41   : > { %v510_v32 = vld [vmem:[%s3653_s29 + $0x760] sm:$0xff]  ;;  %1870 = vmatpush2.bf16.msra.mxu1 %v3307_v34  ;;  %v451_v30 = vld [vmem:[%s3653_s29 + $0x588] sm:$0xff]  ;;  %v3253_v34 = vcombine.low %v459_v21, %v463_v22 }
  0x42   : > { %v3300_v36 = vcombine.high %v506_v31, %v510_v32  ;;  %v370_v37 = vld [vmem:[%s3653_s29 + $0x300] sm:$0xff]  ;;  %1830 = vmatprep.subr.bf16.mxu0 %v3172_v35  ;;  %v3299_v42 = vcombine.low %v506_v31, %v510_v32  ;;  %v455_v31 = vld [vmem:[%s3653_s29 + $0x5a8] sm:$0xff]  ;;  %v3756_v32 = vpack.c.bf16 %v3700_v6, %v3700_v6  ;;  %v3118_v35 = vcombine.high %v323_v27, %v327_v28 }
  0x43   : > { %v374_v38 = vld [vmem:[%s3653_s29 + $0x320] sm:$0xff]  ;;  %1831 = vmatpush2.bf16.msra.mxu0 %v3171_v41  ;;  %v319_v0 = vld [vmem:[%s3653_s29 + $0x168] sm:$0xff]  ;;  %v3117_v6 = vcombine.low %v323_v27, %v327_v28 }
  0x44   : > { %v498_v39 = vld [vmem:[%s3653_s29 + $0x700] sm:$0xff]  ;;  %v3164_v43 = vcombine.high %v370_v37, %v374_v38  ;;  %1871 = vmatprep.subr.bf16.mxu1 %v3300_v36  ;;  %v3163_v50 = vcombine.low %v370_v37, %v374_v38  ;;  %v3246_v36 = vcombine.high %v451_v30, %v455_v31  ;;  %v315_v37 = vld [vmem:[%s3653_s29 + $0x148] sm:$0xff] }
  0x45   : > { %v502_v40 = vld [vmem:[%s3653_s29 + $0x720] sm:$0xff]  ;;  %1872 = vmatpush2.bf16.msra.mxu1 %v3299_v42  ;;  %v443_v38 = vld [vmem:[%s3653_s29 + $0x548] sm:$0xff]  ;;  %v3110_v41 = vcombine.high %v315_v37, %v319_v0 }
  0x46   : > { %v3292_v44 = vcombine.high %v498_v39, %v502_v40  ;;  %v362_v46 = vld [vmem:[%s3653_s29 + $0x2c0] sm:$0xff]  ;;  %1832 = vmatprep.subr.bf16.mxu0 %v3164_v43  ;;  %v3291_v51 = vcombine.low %v498_v39, %v502_v40  ;;  %v447_v39 = vld [vmem:[%s3653_s29 + $0x568] sm:$0xff]  ;;  %v3245_v40 = vcombine.low %v451_v30, %v455_v31 }
  0x47   : > { %v366_v47 = vld [vmem:[%s3653_s29 + $0x2e0] sm:$0xff]  ;;  %1833 = vmatpush2.bf16.msra.mxu0 %v3163_v50  ;;  %v3238_v42 = vcombine.high %v443_v38, %v447_v39  ;;  %v307_v43 = vld [vmem:[%s3653_s29 + $0x108] sm:$0xff] }
  0x48   : > { %v490_v48 = vld [vmem:[%s3653_s29 + $0x6c0] sm:$0xff]  ;;  %v3156_v52 = vcombine.high %v362_v46, %v366_v47  ;;  %1873 = vmatprep.subr.bf16.mxu1 %v3292_v44  ;;  %v3155_v59 = vcombine.low %v362_v46, %v366_v47  ;;  %v311_v44 = vld [vmem:[%s3653_s29 + $0x128] sm:$0xff] }
  0x49   : > { %v494_v49 = vld [vmem:[%s3653_s29 + $0x6e0] sm:$0xff]  ;;  %1874 = vmatpush2.bf16.msra.mxu1 %v3291_v51  ;;  %v435_v46 = vld [vmem:[%s3653_s29 + $0x508] sm:$0xff]  ;;  %v3102_v50 = vcombine.high %v307_v43, %v311_v44 }
  0x4a   : > { %v3284_v53 = vcombine.high %v490_v48, %v494_v49  ;;  %v354_v55 = vld [vmem:[%s3653_s29 + $0x280] sm:$0xff]  ;;  %1834 = vmatprep.subr.bf16.mxu0 %v3156_v52  ;;  %v3283_v60 = vcombine.low %v490_v48, %v494_v49  ;;  %v439_v47 = vld [vmem:[%s3653_s29 + $0x528] sm:$0xff]  ;;  %v3109_v48 = vcombine.low %v315_v37, %v319_v0  ;;  %v3237_v49 = vcombine.low %v443_v38, %v447_v39 }
  0x4b   : > { %v358_v56 = vld [vmem:[%s3653_s29 + $0x2a0] sm:$0xff]  ;;  %1835 = vmatpush2.bf16.msra.mxu0 %v3155_v59  ;;  %v3230_v51 = vcombine.high %v435_v46, %v439_v47  ;;  %v299_v52 = vld [vmem:[%s3653_s29 + $0xc8] sm:$0xff] }
  0x4c   : > { %v482_v57 = vld [vmem:[%s3653_s29 + $0x680] sm:$0xff]  ;;  %v3148_v61 = vcombine.high %v354_v55, %v358_v56  ;;  %1875 = vmatprep.subr.bf16.mxu1 %v3284_v53  ;;  %v3147_v4 = vcombine.low %v354_v55, %v358_v56  ;;  %v303_v53 = vld [vmem:[%s3653_s29 + $0xe8] sm:$0xff] }
  0x4d   : > { %v486_v58 = vld [vmem:[%s3653_s29 + $0x6a0] sm:$0xff]  ;;  %1876 = vmatpush2.bf16.msra.mxu1 %v3283_v60  ;;  %v427_v55 = vld [vmem:[%s3653_s29 + $0x4c8] sm:$0xff]  ;;  %v3094_v59 = vcombine.high %v299_v52, %v303_v53 }
  0x4e   : > { %v3276_v62 = vcombine.high %v482_v57, %v486_v58  ;;  %v346_v63 = vld [vmem:[%s3653_s29 + $0x240] sm:$0xff]  ;;  %1836 = vmatprep.subr.bf16.mxu0 %v3148_v61  ;;  %v3275_v5 = vcombine.low %v482_v57, %v486_v58  ;;  %v431_v56 = vld [vmem:[%s3653_s29 + $0x4e8] sm:$0xff]  ;;  %v3101_v57 = vcombine.low %v307_v43, %v311_v44  ;;  %v3229_v58 = vcombine.low %v435_v46, %v439_v47 }
  0x4f   : > { %v350_v1 = vld [vmem:[%s3653_s29 + $0x260] sm:$0xff]  ;;  %1837 = vmatpush2.bf16.msra.mxu0 %v3147_v4  ;;  %v3222_v60 = vcombine.high %v427_v55, %v431_v56  ;;  %v291_v61 = vld [vmem:[%s3653_s29 + $0x88] sm:$0xff] }
  0x50   : > { %v474_v2 = vld [vmem:[%s3653_s29 + $0x640] sm:$0xff]  ;;  %v3140_v7 = vcombine.high %v346_v63, %v350_v1  ;;  %1877 = vmatprep.subr.bf16.mxu1 %v3276_v62  ;;  %v3139_v14 = vcombine.low %v346_v63, %v350_v1  ;;  %v295_v62 = vld [vmem:[%s3653_s29 + $0xa8] sm:$0xff] }
  0x51   : > { %v478_v3 = vld [vmem:[%s3653_s29 + $0x660] sm:$0xff]  ;;  %1878 = vmatpush2.bf16.msra.mxu1 %v3275_v5  ;;  %v419_v63 = vld [vmem:[%s3653_s29 + $0x488] sm:$0xff]  ;;  %v3086_v4 = vcombine.high %v291_v61, %v295_v62 }
  0x52   : > { %v3268_v8 = vcombine.high %v474_v2, %v478_v3  ;;  %v338_v9 = vld [vmem:[%s3653_s29 + $0x200] sm:$0xff]  ;;  %1838 = vmatprep.subr.bf16.mxu0 %v3140_v7  ;;  %v3267_v15 = vcombine.low %v474_v2, %v478_v3  ;;  %v423_v1 = vld [vmem:[%s3653_s29 + $0x4a8] sm:$0xff]  ;;  %v3093_v2 = vcombine.low %v299_v52, %v303_v53  ;;  %v3221_v3 = vcombine.low %v427_v55, %v431_v56 }
  0x53   : > { %v342_v10 = vld [vmem:[%s3653_s29 + $0x220] sm:$0xff]  ;;  %1839 = vmatpush2.bf16.msra.mxu0 %v3139_v14  ;;  %v3214_v5 = vcombine.high %v419_v63, %v423_v1  ;;  %v283_v7 = vld [vmem:[%s3653_s29 + $0x48] sm:$0xff] }
  0x54   : > { %v466_v11 = vld [vmem:[%s3653_s29 + $0x600] sm:$0xff]  ;;  %v3132_v16 = vcombine.high %v338_v9, %v342_v10  ;;  %1879 = vmatprep.subr.bf16.mxu1 %v3268_v8  ;;  %v3131_v23 = vcombine.low %v338_v9, %v342_v10  ;;  %v287_v8 = vld [vmem:[%s3653_s29 + $0x68] sm:$0xff] }
  0x55   : > { %v470_v13 = vld [vmem:[%s3653_s29 + $0x620] sm:$0xff]  ;;  %1880 = vmatpush2.bf16.msra.mxu1 %v3267_v15  ;;  %v411_v9 = vld [vmem:[%s3653_s29 + $0x448] sm:$0xff]  ;;  %v3078_v14 = vcombine.high %v283_v7, %v287_v8  ;;  %v3077_v21 = vcombine.low %v283_v7, %v287_v8 }
  0x56   : > { %v3260_v18 = vcombine.high %v466_v11, %v470_v13  ;;  %1840 = vmatprep.subr.bf16.mxu0 %v3132_v16  ;;  %v3259_v24 = vcombine.low %v466_v11, %v470_v13  ;;  %v415_v10 = vld [vmem:[%s3653_s29 + $0x468] sm:$0xff]  ;;  %v3085_v11 = vcombine.low %v291_v61, %v295_v62  ;;  %v3213_v13 = vcombine.low %v419_v63, %v423_v1 }
  0x57   : > { %1841 = vmatpush2.bf16.msra.mxu0 %v3131_v23  ;;  %v3206_v15 = vcombine.high %v411_v9, %v415_v10  ;;  %v275_v16 = vld [vmem:[%s3653_s29 + $0x8] sm:$0xff]  ;;  %v3205_v22 = vcombine.low %v411_v9, %v415_v10 }
  0x58   : > { %1881 = vmatprep.subr.bf16.mxu1 %v3260_v18  ;;  %1892 = vmatprep.subr.bf16.mxu0 %v3126_v25  ;;  %v279_v18 = vld [vmem:[%s3653_s29 + $0x28] sm:$0xff] }
  0x59   : > { %1882 = vmatpush2.bf16.msra.mxu1 %v3259_v24  ;;  %v403_v19 = vld [vmem:[%s3653_s29 + $0x408] sm:$0xff]  ;;  %v3070_v23 = vcombine.high %v275_v16, %v279_v18  ;;  %v3069_v30 = vcombine.low %v275_v16, %v279_v18 }
  0x5a   : > { %1933 = vmatprep.subr.bf16.mxu1 %v3254_v26  ;;  %1843 = vmatmul.mubr.bf16.vlgmr.msra.gmra.mxu0 %v3750_v29  ;;  %v407_v20 = vld [vmem:[%s3653_s29 + $0x428] sm:$0xff] }
  0x5b   : > { %1893 = vmatpush1.bf16.msra.mxu0 %v3125_v33  ;;  %1924 = vmatprep.mubr.bf16.mxu0 %v3704_v12  ;;  %v3198_v24 = vcombine.high %v403_v19, %v407_v20  ;;  %v395_v25 = vld [vmem:[%s3653_s29 + $0x3c8] sm:$0xff]  ;;  %v3197_v31 = vcombine.low %v403_v19, %v407_v20 }
  0x5c   : > { %1884 = vmatmul.mubr.bf16.vlgmr.msra.gmra.mxu1 %v3756_v32  ;;  %1894 = vmatprep.subr.bf16.mxu0 %v3118_v35  ;;  %v399_v26 = vld [vmem:[%s3653_s29 + $0x3e8] sm:$0xff] }
  0x5d   : > { %1934 = vmatpush1.bf16.msra.mxu1 %v3253_v34  ;;  %1965 = vmatprep.mubr.bf16.mxu1 %v3711_v17  ;;  %v523_v27 = vld [vmem:[%s3653_s29 + $0x7c8] sm:$0xff]  ;;  %v3190_v33 = vcombine.high %v395_v25, %v399_v26  ;;  %v3189_v38 = vcombine.low %v395_v25, %v399_v26 }
  0x5e   : > { %1935 = vmatprep.subr.bf16.mxu1 %v3246_v36  ;;  %v527_v28 = vld [vmem:[%s3653_s29 + $0x7e8] sm:$0xff] }
  0x5f   : > { %1895 = vmatpush1.bf16.msra.mxu0 %v3117_v6  ;;  %v3318_v34 = vcombine.high %v523_v27, %v527_v28  ;;  %v387_v35 = vld [vmem:[%s3653_s29 + $0x388] sm:$0xff]  ;;  %v3317_v39 = vcombine.low %v523_v27, %v527_v28 }
  0x60   : > { %1896 = vmatprep.subr.bf16.mxu0 %v3110_v41  ;;  %v391_v36 = vld [vmem:[%s3653_s29 + $0x3a8] sm:$0xff] }
  0x61   : > { %1936 = vmatpush1.bf16.msra.mxu1 %v3245_v40  ;;  %v515_v37 = vld [vmem:[%s3653_s29 + $0x788] sm:$0xff]  ;;  %v3182_v6 = vcombine.high %v387_v35, %v391_v36  ;;  %v3181_v46 = vcombine.low %v387_v35, %v391_v36  ;;  %v460_v35 = vld [vmem:[%s3653_s29 + $0x5d0] sm:$0xff] }
  0x62   : > { %1937 = vmatprep.subr.bf16.mxu1 %v3238_v42  ;;  %v519_v0 = vld [vmem:[%s3653_s29 + $0x7a8] sm:$0xff]  ;;  %v464_v36 = vld [vmem:[%s3653_s29 + $0x5f0] sm:$0xff] }
  0x63   : > { %1897 = vmatpush1.bf16.msra.mxu0 %v3109_v48  ;;  %v3310_v40 = vcombine.high %v515_v37, %v519_v0  ;;  %v379_v41 = vld [vmem:[%s3653_s29 + $0x348] sm:$0xff]  ;;  %v3309_v47 = vcombine.low %v515_v37, %v519_v0 }
  0x64   : > { %1898 = vmatprep.subr.bf16.mxu0 %v3102_v50  ;;  %v383_v42 = vld [vmem:[%s3653_s29 + $0x368] sm:$0xff] }
  0x65   : > { %1938 = vmatpush1.bf16.msra.mxu1 %v3237_v49  ;;  %v507_v43 = vld [vmem:[%s3653_s29 + $0x748] sm:$0xff]  ;;  %v3174_v48 = vcombine.high %v379_v41, %v383_v42  ;;  %v3173_v55 = vcombine.low %v379_v41, %v383_v42  ;;  %v452_v41 = vld [vmem:[%s3653_s29 + $0x590] sm:$0xff] }
  0x66   : > { %1939 = vmatprep.subr.bf16.mxu1 %v3230_v51  ;;  %v511_v44 = vld [vmem:[%s3653_s29 + $0x768] sm:$0xff]  ;;  %v456_v42 = vld [vmem:[%s3653_s29 + $0x5b0] sm:$0xff] }
  0x67   : > { %1899 = vmatpush1.bf16.msra.mxu0 %v3101_v57  ;;  %v3302_v49 = vcombine.high %v507_v43, %v511_v44  ;;  %v371_v50 = vld [vmem:[%s3653_s29 + $0x308] sm:$0xff]  ;;  %v3301_v56 = vcombine.low %v507_v43, %v511_v44  ;;  %v3255_v44 = vcombine.low %v460_v35, %v464_v36 }
  0x68   : > { %1900 = vmatprep.subr.bf16.mxu0 %v3094_v59  ;;  %v375_v51 = vld [vmem:[%s3653_s29 + $0x328] sm:$0xff] }
  0x69   : > { %1940 = vmatpush1.bf16.msra.mxu1 %v3229_v58  ;;  %v499_v52 = vld [vmem:[%s3653_s29 + $0x708] sm:$0xff]  ;;  %v3166_v57 = vcombine.high %v371_v50, %v375_v51  ;;  %v3165_v63 = vcombine.low %v371_v50, %v375_v51  ;;  %v444_v50 = vld [vmem:[%s3653_s29 + $0x550] sm:$0xff] }
  0x6a   : > { %1941 = vmatprep.subr.bf16.mxu1 %v3222_v60  ;;  %v503_v53 = vld [vmem:[%s3653_s29 + $0x728] sm:$0xff]  ;;  %v448_v51 = vld [vmem:[%s3653_s29 + $0x570] sm:$0xff] }
  0x6b   : > { %1901 = vmatpush1.bf16.msra.mxu0 %v3093_v2  ;;  %v3294_v58 = vcombine.high %v499_v52, %v503_v53  ;;  %v363_v59 = vld [vmem:[%s3653_s29 + $0x2c8] sm:$0xff]  ;;  %v3293_v1 = vcombine.low %v499_v52, %v503_v53  ;;  %v3247_v53 = vcombine.low %v452_v41, %v456_v42 }
  0x6c   : > { %1902 = vmatprep.subr.bf16.mxu0 %v3086_v4  ;;  %v367_v60 = vld [vmem:[%s3653_s29 + $0x2e8] sm:$0xff] }
  0x6d   : > { %1942 = vmatpush1.bf16.msra.mxu1 %v3221_v3  ;;  %v491_v61 = vld [vmem:[%s3653_s29 + $0x6c8] sm:$0xff]  ;;  %v3158_v2 = vcombine.high %v363_v59, %v367_v60  ;;  %v3157_v9 = vcombine.low %v363_v59, %v367_v60  ;;  %v436_v59 = vld [vmem:[%s3653_s29 + $0x510] sm:$0xff] }
  0x6e   : > { %1943 = vmatprep.subr.bf16.mxu1 %v3214_v5  ;;  %v495_v62 = vld [vmem:[%s3653_s29 + $0x6e8] sm:$0xff]  ;;  %v440_v60 = vld [vmem:[%s3653_s29 + $0x530] sm:$0xff] }
  0x6f   : > { %1903 = vmatpush1.bf16.msra.mxu0 %v3085_v11  ;;  %v3286_v3 = vcombine.high %v491_v61, %v495_v62  ;;  %v355_v4 = vld [vmem:[%s3653_s29 + $0x288] sm:$0xff]  ;;  %v3285_v10 = vcombine.low %v491_v61, %v495_v62  ;;  %v3239_v62 = vcombine.low %v444_v50, %v448_v51 }
  0x70   : > { %1904 = vmatprep.subr.bf16.mxu0 %v3078_v14  ;;  %v359_v5 = vld [vmem:[%s3653_s29 + $0x2a8] sm:$0xff] }
  0x71   : > { %1944 = vmatpush1.bf16.msra.mxu1 %v3213_v13  ;;  %v483_v7 = vld [vmem:[%s3653_s29 + $0x688] sm:$0xff]  ;;  %v3150_v11 = vcombine.high %v355_v4, %v359_v5  ;;  %v3149_v19 = vcombine.low %v355_v4, %v359_v5  ;;  %v428_v4 = vld [vmem:[%s3653_s29 + $0x4d0] sm:$0xff] }
  0x72   : > { %1945 = vmatprep.subr.bf16.mxu1 %v3206_v15  ;;  %v487_v8 = vld [vmem:[%s3653_s29 + $0x6a8] sm:$0xff]  ;;  %v432_v5 = vld [vmem:[%s3653_s29 + $0x4f0] sm:$0xff] }
  0x73   : > { %1905 = vmatpush1.bf16.msra.mxu0 %v3077_v21  ;;  %v3278_v13 = vcombine.high %v483_v7, %v487_v8  ;;  %v347_v14 = vld [vmem:[%s3653_s29 + $0x248] sm:$0xff]  ;;  %v3277_v20 = vcombine.low %v483_v7, %v487_v8  ;;  %v3231_v8 = vcombine.low %v436_v59, %v440_v60 }
  0x74   : > { %1906 = vmatprep.subr.bf16.mxu0 %v3070_v23  ;;  %v351_v15 = vld [vmem:[%s3653_s29 + $0x268] sm:$0xff] }
  0x75   : > { %1946 = vmatpush1.bf16.msra.mxu1 %v3205_v22  ;;  %v475_v16 = vld [vmem:[%s3653_s29 + $0x648] sm:$0xff]  ;;  %v3142_v21 = vcombine.high %v347_v14, %v351_v15  ;;  %v3141_v27 = vcombine.low %v347_v14, %v351_v15  ;;  %v420_v14 = vld [vmem:[%s3653_s29 + $0x490] sm:$0xff] }
  0x76   : > { %1947 = vmatprep.subr.bf16.mxu1 %v3198_v24  ;;  %v479_v18 = vld [vmem:[%s3653_s29 + $0x668] sm:$0xff]  ;;  %v424_v15 = vld [vmem:[%s3653_s29 + $0x4b0] sm:$0xff] }
  0x77   : > { %1907 = vmatpush1.bf16.msra.mxu0 %v3069_v30  ;;  %v3270_v22 = vcombine.high %v475_v16, %v479_v18  ;;  %v339_v23 = vld [vmem:[%s3653_s29 + $0x208] sm:$0xff]  ;;  %v3269_v28 = vcombine.low %v475_v16, %v479_v18  ;;  %v3223_v18 = vcombine.low %v428_v4, %v432_v5 }
  0x78   : > { %1908 = vmatprep.subr.bf16.mxu0 %v3190_v33  ;;  %v343_v24 = vld [vmem:[%s3653_s29 + $0x228] sm:$0xff]  ;;  %v332_v33 = vld [vmem:[%s3653_s29 + $0x1d0] sm:$0xff] }
  0x79   : > { %1948 = vmatpush1.bf16.msra.mxu1 %v3197_v31  ;;  %v467_v25 = vld [vmem:[%s3653_s29 + $0x608] sm:$0xff]  ;;  %v3134_v30 = vcombine.high %v339_v23, %v343_v24  ;;  %v3133_v37 = vcombine.low %v339_v23, %v343_v24  ;;  %v412_v23 = vld [vmem:[%s3653_s29 + $0x450] sm:$0xff] }
  0x7a   : > { %1949 = vmatprep.subr.bf16.mxu1 %v3318_v34  ;;  %v471_v26 = vld [vmem:[%s3653_s29 + $0x628] sm:$0xff]  ;;  %v336_v34 = vld [vmem:[%s3653_s29 + $0x1f0] sm:$0xff] }
  0x7b   : > { %1909 = vmatpush2.bf16.msra.mxu0 %v3189_v38  ;;  %v3262_v31 = vcombine.high %v467_v25, %v471_v26  ;;  %v3261_v0 = vcombine.low %v467_v25, %v471_v26  ;;  %v3128_v38 = vcombine.high %v332_v33, %v336_v34  ;;  %v3127_v43 = vcombine.low %v332_v33, %v336_v34  ;;  %v416_v24 = vld [vmem:[%s3653_s29 + $0x470] sm:$0xff] }
  0x7c   : > { %1910 = vmatprep.subr.bf16.mxu0 %v3182_v6  ;;  %v324_v6 = vld [vmem:[%s3653_s29 + $0x190] sm:$0xff]  ;;  %v3215_v26 = vcombine.low %v420_v14, %v424_v15 }
  0x7d   : > { %1950 = vmatpush2.bf16.msra.mxu1 %v3317_v39  ;;  %v3256_v39 = vcombine.high %v460_v35, %v464_v36  ;;  %v404_v33 = vld [vmem:[%s3653_s29 + $0x410] sm:$0xff]  ;;  %v3207_v36 = vcombine.low %v412_v23, %v416_v24 }
  0x7e   : > { %1951 = vmatprep.subr.bf16.mxu1 %v3310_v40  ;;  %v328_v40 = vld [vmem:[%s3653_s29 + $0x1b0] sm:$0xff] }
  0x7f   : > { %1911 = vmatpush2.bf16.msra.mxu0 %v3181_v46  ;;  %v3120_v46 = vcombine.high %v324_v6, %v328_v40  ;;  %v3119_v52 = vcombine.low %v324_v6, %v328_v40  ;;  %v408_v34 = vld [vmem:[%s3653_s29 + $0x430] sm:$0xff] }
  0x80   : > { %1912 = vmatprep.subr.bf16.mxu0 %v3174_v48  ;;  %v316_v48 = vld [vmem:[%s3653_s29 + $0x150] sm:$0xff] }
  0x81   : > { %1952 = vmatpush2.bf16.msra.mxu1 %v3309_v47  ;;  %v3248_v47 = vcombine.high %v452_v41, %v456_v42  ;;  %v524_v6 = vld [vmem:[%s3653_s29 + $0x7d0] sm:$0xff]  ;;  %v3199_v42 = vcombine.low %v404_v33, %v408_v34 }
  0x82   : > { %1953 = vmatprep.subr.bf16.mxu1 %v3302_v49  ;;  %v320_v49 = vld [vmem:[%s3653_s29 + $0x170] sm:$0xff] }
  0x83   : > { %1913 = vmatpush2.bf16.msra.mxu0 %v3173_v55  ;;  %v3112_v55 = vcombine.high %v316_v48, %v320_v49  ;;  %v3111_v61 = vcombine.low %v316_v48, %v320_v49  ;;  %v528_v40 = vld [vmem:[%s3653_s29 + $0x7f0] sm:$0xff] }
  0x84   : > { %1914 = vmatprep.subr.bf16.mxu0 %v3166_v57  ;;  %v308_v57 = vld [vmem:[%s3653_s29 + $0x110] sm:$0xff] }
  0x85   : > { %1954 = vmatpush2.bf16.msra.mxu1 %v3301_v56  ;;  %v3240_v56 = vcombine.high %v444_v50, %v448_v51  ;;  %v516_v48 = vld [vmem:[%s3653_s29 + $0x790] sm:$0xff]  ;;  %v3319_v51 = vcombine.low %v524_v6, %v528_v40 }
  0x86   : > { %1955 = vmatprep.subr.bf16.mxu1 %v3294_v58  ;;  %v312_v58 = vld [vmem:[%s3653_s29 + $0x130] sm:$0xff] }
  0x87   : > { %1915 = vmatpush2.bf16.msra.mxu0 %v3165_v63  ;;  %v3104_v63 = vcombine.high %v308_v57, %v312_v58  ;;  %v3103_v7 = vcombine.low %v308_v57, %v312_v58  ;;  %v520_v49 = vld [vmem:[%s3653_s29 + $0x7b0] sm:$0xff] }
  0x88   : > { %1916 = vmatprep.subr.bf16.mxu0 %v3158_v2  ;;  %v300_v2 = vld [vmem:[%s3653_s29 + $0xd0] sm:$0xff] }
  0x89   : > { %1956 = vmatpush2.bf16.msra.mxu1 %v3293_v1  ;;  %v3232_v1 = vcombine.high %v436_v59, %v440_v60  ;;  %v508_v57 = vld [vmem:[%s3653_s29 + $0x750] sm:$0xff]  ;;  %v3311_v60 = vcombine.low %v516_v48, %v520_v49 }
  0x8a   : > { %1957 = vmatprep.subr.bf16.mxu1 %v3286_v3  ;;  %v304_v3 = vld [vmem:[%s3653_s29 + $0xf0] sm:$0xff] }
  0x8b   : > { %1917 = vmatpush2.bf16.msra.mxu0 %v3157_v9  ;;  %v3096_v9 = vcombine.high %v300_v2, %v304_v3  ;;  %v3095_v16 = vcombine.low %v300_v2, %v304_v3  ;;  %v512_v58 = vld [vmem:[%s3653_s29 + $0x770] sm:$0xff] }
  0x8c   : > { %1918 = vmatprep.subr.bf16.mxu0 %v3150_v11  ;;  %v292_v11 = vld [vmem:[%s3653_s29 + $0x90] sm:$0xff] }
  0x8d   : > { %1958 = vmatpush2.bf16.msra.mxu1 %v3285_v10  ;;  %v3224_v10 = vcombine.high %v428_v4, %v432_v5  ;;  %v500_v2 = vld [vmem:[%s3653_s29 + $0x710] sm:$0xff]  ;;  %v3303_v5 = vcombine.low %v508_v57, %v512_v58 }
  0x8e   : > { %1959 = vmatprep.subr.bf16.mxu1 %v3278_v13  ;;  %v296_v13 = vld [vmem:[%s3653_s29 + $0xb0] sm:$0xff] }
  0x8f   : > { %1919 = vmatpush2.bf16.msra.mxu0 %v3149_v19  ;;  %v3088_v19 = vcombine.high %v292_v11, %v296_v13  ;;  %v3087_v25 = vcombine.low %v292_v11, %v296_v13  ;;  %v504_v3 = vld [vmem:[%s3653_s29 + $0x730] sm:$0xff] }
  0x90   : > { %1920 = vmatprep.subr.bf16.mxu0 %v3142_v21  ;;  %v284_v21 = vld [vmem:[%s3653_s29 + $0x50] sm:$0xff] }
  0x91   : > { %1960 = vmatpush2.bf16.msra.mxu1 %v3277_v20  ;;  %v3216_v20 = vcombine.high %v420_v14, %v424_v15  ;;  %v492_v11 = vld [vmem:[%s3653_s29 + $0x6d0] sm:$0xff]  ;;  %v3295_v15 = vcombine.low %v500_v2, %v504_v3 }
  0x92   : > { %1961 = vmatprep.subr.bf16.mxu1 %v3270_v22  ;;  %v288_v22 = vld [vmem:[%s3653_s29 + $0x70] sm:$0xff] }
  0x93   : > { %1921 = vmatpush2.bf16.msra.mxu0 %v3141_v27  ;;  %v3080_v27 = vcombine.high %v284_v21, %v288_v22  ;;  %v3079_v35 = vcombine.low %v284_v21, %v288_v22  ;;  %v496_v13 = vld [vmem:[%s3653_s29 + $0x6f0] sm:$0xff] }
  0x94   : > { %1922 = vmatprep.subr.bf16.mxu0 %v3134_v30  ;;  %v276_v30 = vld [vmem:[%s3653_s29 + $0x10] sm:$0xff] }
  0x95   : > { %1962 = vmatpush2.bf16.msra.mxu1 %v3269_v28  ;;  %v3208_v28 = vcombine.high %v412_v23, %v416_v24  ;;  %v484_v21 = vld [vmem:[%s3653_s29 + $0x690] sm:$0xff]  ;;  %v3287_v24 = vcombine.low %v492_v11, %v496_v13 }
  0x96   : > { %1963 = vmatprep.subr.bf16.mxu1 %v3262_v31  ;;  %v280_v31 = vld [vmem:[%s3653_s29 + $0x30] sm:$0xff] }
  0x97   : > { %1923 = vmatpush2.bf16.msra.mxu0 %v3133_v37  ;;  %v3072_v37 = vcombine.high %v276_v30, %v280_v31  ;;  %v3071_v41 = vcombine.low %v276_v30, %v280_v31  ;;  %v488_v22 = vld [vmem:[%s3653_s29 + $0x6b0] sm:$0xff] }
  0x98   : > { %1974 = vmatprep.subr.bf16.mxu0 %v3128_v38  ;;  %v396_v38 = vld [vmem:[%s3653_s29 + $0x3d0] sm:$0xff] }
  0x99   : > { %1964 = vmatpush2.bf16.msra.mxu1 %v3261_v0  ;;  %v3200_v0 = vcombine.high %v404_v33, %v408_v34  ;;  %v476_v30 = vld [vmem:[%s3653_s29 + $0x650] sm:$0xff]  ;;  %v3279_v34 = vcombine.low %v484_v21, %v488_v22 }
  0x9a   : > { %2015 = vmatprep.subr.bf16.mxu1 %v3256_v39  ;;  %1925 = vmatmul.mubr.bf16.vlgmr.msra.gmra.mxu0 %v3750_v29  ;;  %v400_v39 = vld [vmem:[%s3653_s29 + $0x3f0] sm:$0xff] }
  0x9b   : > { %1975 = vmatpush1.bf16.msra.mxu0 %v3127_v43  ;;  %2006 = vmatprep.mubr.bf16.mxu0 %v3704_v12  ;;  %v3192_v43 = vcombine.high %v396_v38, %v400_v39  ;;  %v3191_v50 = vcombine.low %v396_v38, %v400_v39  ;;  %v480_v31 = vld [vmem:[%s3653_s29 + $0x670] sm:$0xff] }
  0x9c   : > { %1966 = vmatmul.mubr.bf16.vlgmr.msra.gmra.mxu1 %v3756_v32  ;;  %1976 = vmatprep.subr.bf16.mxu0 %v3120_v46  ;;  %v388_v46 = vld [vmem:[%s3653_s29 + $0x390] sm:$0xff] }
  0x9d   : > { %2016 = vmatpush1.bf16.msra.mxu1 %v3255_v44  ;;  %2047 = vmatprep.mubr.bf16.mxu1 %v3711_v17  ;;  %v3320_v44 = vcombine.high %v524_v6, %v528_v40  ;;  %v468_v38 = vld [vmem:[%s3653_s29 + $0x610] sm:$0xff]  ;;  %v3271_v40 = vcombine.low %v476_v30, %v480_v31 }
  0x9e   : > { %2017 = vmatprep.subr.bf16.mxu1 %v3248_v47  ;;  %v392_v47 = vld [vmem:[%s3653_s29 + $0x3b0] sm:$0xff] }
  0x9f   : > { %1977 = vmatpush1.bf16.msra.mxu0 %v3119_v52  ;;  %v3184_v52 = vcombine.high %v388_v46, %v392_v47  ;;  %v3183_v59 = vcombine.low %v388_v46, %v392_v47  ;;  %v472_v39 = vld [vmem:[%s3653_s29 + $0x630] sm:$0xff]  ;;  %v461_v46 = vld [vmem:[%s3653_s29 + $0x5d8] sm:$0xff] }
  0xa0   : > { %1978 = vmatprep.subr.bf16.mxu0 %v3112_v55  ;;  %v380_v55 = vld [vmem:[%s3653_s29 + $0x350] sm:$0xff]  ;;  %v465_v47 = vld [vmem:[%s3653_s29 + $0x5f8] sm:$0xff] }
  0xa1   : > { %2018 = vmatpush1.bf16.msra.mxu1 %v3247_v53  ;;  %v3312_v53 = vcombine.high %v516_v48, %v520_v49  ;;  %v3263_v49 = vcombine.low %v468_v38, %v472_v39 }
  0xa2   : > { %2019 = vmatprep.subr.bf16.mxu1 %v3240_v56  ;;  %v384_v56 = vld [vmem:[%s3653_s29 + $0x370] sm:$0xff] }
  0xa3   : > { %1979 = vmatpush1.bf16.msra.mxu0 %v3111_v61  ;;  %v3176_v61 = vcombine.high %v380_v55, %v384_v56  ;;  %v3175_v4 = vcombine.low %v380_v55, %v384_v56  ;;  %v453_v55 = vld [vmem:[%s3653_s29 + $0x598] sm:$0xff] }
  0xa4   : > { %1980 = vmatprep.subr.bf16.mxu0 %v3104_v63  ;;  %v372_v63 = vld [vmem:[%s3653_s29 + $0x310] sm:$0xff]  ;;  %v457_v56 = vld [vmem:[%s3653_s29 + $0x5b8] sm:$0xff] }
  0xa5   : > { %2020 = vmatpush1.bf16.msra.mxu1 %v3239_v62  ;;  %v3304_v62 = vcombine.high %v508_v57, %v512_v58  ;;  %v3257_v58 = vcombine.low %v461_v46, %v465_v47 }
  0xa6   : > { %2021 = vmatprep.subr.bf16.mxu1 %v3232_v1  ;;  %v376_v1 = vld [vmem:[%s3653_s29 + $0x330] sm:$0xff] }
  0xa7   : > { %1981 = vmatpush1.bf16.msra.mxu0 %v3103_v7  ;;  %v3168_v7 = vcombine.high %v372_v63, %v376_v1  ;;  %v3167_v14 = vcombine.low %v372_v63, %v376_v1  ;;  %v445_v63 = vld [vmem:[%s3653_s29 + $0x558] sm:$0xff] }
  0xa8   : > { %1982 = vmatprep.subr.bf16.mxu0 %v3096_v9  ;;  %v364_v9 = vld [vmem:[%s3653_s29 + $0x2d0] sm:$0xff]  ;;  %v449_v1 = vld [vmem:[%s3653_s29 + $0x578] sm:$0xff] }
  0xa9   : > { %2022 = vmatpush1.bf16.msra.mxu1 %v3231_v8  ;;  %v3296_v8 = vcombine.high %v500_v2, %v504_v3  ;;  %v3249_v3 = vcombine.low %v453_v55, %v457_v56 }
  0xaa   : > { %2023 = vmatprep.subr.bf16.mxu1 %v3224_v10  ;;  %v368_v10 = vld [vmem:[%s3653_s29 + $0x2f0] sm:$0xff] }
  0xab   : > { %1983 = vmatpush1.bf16.msra.mxu0 %v3095_v16  ;;  %v3160_v16 = vcombine.high %v364_v9, %v368_v10  ;;  %v3159_v23 = vcombine.low %v364_v9, %v368_v10  ;;  %v437_v9 = vld [vmem:[%s3653_s29 + $0x518] sm:$0xff] }
  0xac   : > { %1984 = vmatprep.subr.bf16.mxu0 %v3088_v19  ;;  %v356_v19 = vld [vmem:[%s3653_s29 + $0x290] sm:$0xff]  ;;  %v441_v10 = vld [vmem:[%s3653_s29 + $0x538] sm:$0xff] }
  0xad   : > { %2024 = vmatpush1.bf16.msra.mxu1 %v3223_v18  ;;  %v3288_v18 = vcombine.high %v492_v11, %v496_v13  ;;  %v3241_v13 = vcombine.low %v445_v63, %v449_v1 }
  0xae   : > { %2025 = vmatprep.subr.bf16.mxu1 %v3216_v20  ;;  %v360_v20 = vld [vmem:[%s3653_s29 + $0x2b0] sm:$0xff] }
  0xaf   : > { %1985 = vmatpush1.bf16.msra.mxu0 %v3087_v25  ;;  %v3152_v25 = vcombine.high %v356_v19, %v360_v20  ;;  %v3151_v33 = vcombine.low %v356_v19, %v360_v20  ;;  %v429_v19 = vld [vmem:[%s3653_s29 + $0x4d8] sm:$0xff] }
  0xb0   : > { %1986 = vmatprep.subr.bf16.mxu0 %v3080_v27  ;;  %v348_v27 = vld [vmem:[%s3653_s29 + $0x250] sm:$0xff] }
  0xb1   : > { %2026 = vmatpush1.bf16.msra.mxu1 %v3215_v26  ;;  %v3280_v26 = vcombine.high %v484_v21, %v488_v22 }
  0xb2   : > { %2027 = vmatprep.subr.bf16.mxu1 %v3208_v28  ;;  %v352_v28 = vld [vmem:[%s3653_s29 + $0x270] sm:$0xff] }
  0xb3   : > { %1987 = vmatpush1.bf16.msra.mxu0 %v3079_v35  ;;  %v3144_v35 = vcombine.high %v348_v27, %v352_v28  ;;  %v3143_v6 = vcombine.low %v348_v27, %v352_v28 }
  0xb4   : > { %1988 = vmatprep.subr.bf16.mxu0 %v3072_v37  ;;  %v340_v37 = vld [vmem:[%s3653_s29 + $0x210] sm:$0xff] }
  0xb5   : > { %2028 = vmatpush1.bf16.msra.mxu1 %v3207_v36  ;;  %v3272_v36 = vcombine.high %v476_v30, %v480_v31 }
  0xb6   : > { %2029 = vmatprep.subr.bf16.mxu1 %v3200_v0  ;;  %v344_v0 = vld [vmem:[%s3653_s29 + $0x230] sm:$0xff] }
  0xb7   : > { %1989 = vmatpush1.bf16.msra.mxu0 %v3071_v41  ;;  %v3136_v41 = vcombine.high %v340_v37, %v344_v0  ;;  %v3135_v48 = vcombine.low %v340_v37, %v344_v0 }
  0xb8   : > { %1990 = vmatprep.subr.bf16.mxu0 %v3192_v43  ;;  %v333_v43 = vld [vmem:[%s3653_s29 + $0x1d8] sm:$0xff] }
  0xb9   : > { %2030 = vmatpush1.bf16.msra.mxu1 %v3199_v42  ;;  %v3264_v42 = vcombine.high %v468_v38, %v472_v39 }
  0xba   : > { %2031 = vmatprep.subr.bf16.mxu1 %v3320_v44  ;;  %v337_v44 = vld [vmem:[%s3653_s29 + $0x1f8] sm:$0xff] }
  0xbb   : > { %1991 = vmatpush2.bf16.msra.mxu0 %v3191_v50  ;;  %v3130_v50 = vcombine.high %v333_v43, %v337_v44  ;;  %v3129_v57 = vcombine.low %v333_v43, %v337_v44 }
  0xbc   : > { %1992 = vmatprep.subr.bf16.mxu0 %v3184_v52  ;;  %v325_v52 = vld [vmem:[%s3653_s29 + $0x198] sm:$0xff] }
  0xbd   : > { %2032 = vmatpush2.bf16.msra.mxu1 %v3319_v51  ;;  %v3258_v51 = vcombine.high %v461_v46, %v465_v47 }
  0xbe   : > { %2033 = vmatprep.subr.bf16.mxu1 %v3312_v53  ;;  %v329_v53 = vld [vmem:[%s3653_s29 + $0x1b8] sm:$0xff] }
  0xbf   : > { %1993 = vmatpush2.bf16.msra.mxu0 %v3183_v59  ;;  %v3122_v59 = vcombine.high %v325_v52, %v329_v53  ;;  %v3121_v2 = vcombine.low %v325_v52, %v329_v53 }
  0xc0   : > { %1994 = vmatprep.subr.bf16.mxu0 %v3176_v61  ;;  %v317_v61 = vld [vmem:[%s3653_s29 + $0x158] sm:$0xff] }
  0xc1   : > { %2034 = vmatpush2.bf16.msra.mxu1 %v3311_v60  ;;  %v3250_v60 = vcombine.high %v453_v55, %v457_v56 }
  0xc2   : > { %2035 = vmatprep.subr.bf16.mxu1 %v3304_v62  ;;  %v321_v62 = vld [vmem:[%s3653_s29 + $0x178] sm:$0xff] }
  0xc3   : > { %1995 = vmatpush2.bf16.msra.mxu0 %v3175_v4  ;;  %v3114_v4 = vcombine.high %v317_v61, %v321_v62  ;;  %v3113_v11 = vcombine.low %v317_v61, %v321_v62 }
  0xc4   : > { %1996 = vmatprep.subr.bf16.mxu0 %v3168_v7  ;;  %v309_v7 = vld [vmem:[%s3653_s29 + $0x118] sm:$0xff] }
  0xc5   : > { %2036 = vmatpush2.bf16.msra.mxu1 %v3303_v5  ;;  %v3242_v5 = vcombine.high %v445_v63, %v449_v1 }
  0xc6   : > { %2037 = vmatprep.subr.bf16.mxu1 %v3296_v8  ;;  %v313_v8 = vld [vmem:[%s3653_s29 + $0x138] sm:$0xff] }
  0xc7   : > { %1997 = vmatpush2.bf16.msra.mxu0 %v3167_v14  ;;  %v3106_v14 = vcombine.high %v309_v7, %v313_v8  ;;  %v3105_v20 = vcombine.low %v309_v7, %v313_v8 }
  0xc8   : > { %1998 = vmatprep.subr.bf16.mxu0 %v3160_v16  ;;  %v301_v16 = vld [vmem:[%s3653_s29 + $0xd8] sm:$0xff] }
  0xc9   : > { %2038 = vmatpush2.bf16.msra.mxu1 %v3295_v15  ;;  %v3234_v15 = vcombine.high %v437_v9, %v441_v10 }
  0xca   : > { %2039 = vmatprep.subr.bf16.mxu1 %v3288_v18  ;;  %v305_v18 = vld [vmem:[%s3653_s29 + $0xf8] sm:$0xff] }
  0xcb   : > { %1999 = vmatpush2.bf16.msra.mxu0 %v3159_v23  ;;  %v3098_v21 = vcombine.high %v301_v16, %v305_v18  ;;  %v293_v23 = vld [vmem:[%s3653_s29 + $0x98] sm:$0xff]  ;;  %v3097_v27 = vcombine.low %v301_v16, %v305_v18 }
  0xcc   : > { %2000 = vmatprep.subr.bf16.mxu0 %v3152_v25  ;;  %v421_v25 = vld [vmem:[%s3653_s29 + $0x498] sm:$0xff] }
  0xcd   : > { %2040 = vmatpush2.bf16.msra.mxu1 %v3287_v24  ;;  %v297_v24 = vld [vmem:[%s3653_s29 + $0xb8] sm:$0xff] }
  0xce   : > { %2041 = vmatprep.subr.bf16.mxu1 %v3280_v26  ;;  %v425_v26 = vld [vmem:[%s3653_s29 + $0x4b8] sm:$0xff]  ;;  %v3090_v30 = vcombine.high %v293_v23, %v297_v24  ;;  %v3089_v37 = vcombine.low %v293_v23, %v297_v24 }
  0xcf   : > { %2001 = vmatpush2.bf16.msra.mxu0 %v3151_v33  ;;  %v3218_v31 = vcombine.high %v421_v25, %v425_v26  ;;  %v285_v33 = vld [vmem:[%s3653_s29 + $0x58] sm:$0xff]  ;;  %v3217_v0 = vcombine.low %v421_v25, %v425_v26 }
  0xd0   : > { %2002 = vmatprep.subr.bf16.mxu0 %v3144_v35  ;;  %v413_v35 = vld [vmem:[%s3653_s29 + $0x458] sm:$0xff] }
  0xd1   : > { %2042 = vmatpush2.bf16.msra.mxu1 %v3279_v34  ;;  %v289_v34 = vld [vmem:[%s3653_s29 + $0x78] sm:$0xff] }
  0xd2   : > { %2043 = vmatprep.subr.bf16.mxu1 %v3272_v36  ;;  %v417_v36 = vld [vmem:[%s3653_s29 + $0x478] sm:$0xff]  ;;  %v3082_v38 = vcombine.high %v285_v33, %v289_v34  ;;  %v3081_v43 = vcombine.low %v285_v33, %v289_v34 }
  0xd3   : > { %2003 = vmatpush2.bf16.msra.mxu0 %v3143_v6  ;;  %v3210_v39 = vcombine.high %v413_v35, %v417_v36  ;;  %v277_v6 = vld [vmem:[%s3653_s29 + $0x18] sm:$0xff]  ;;  %v3209_v44 = vcombine.low %v413_v35, %v417_v36 }
  0xd4   : > { %2004 = vmatprep.subr.bf16.mxu0 %v3136_v41  ;;  %v405_v41 = vld [vmem:[%s3653_s29 + $0x418] sm:$0xff] }
  0xd5   : > { %2044 = vmatpush2.bf16.msra.mxu1 %v3271_v40  ;;  %v281_v40 = vld [vmem:[%s3653_s29 + $0x38] sm:$0xff] }
  0xd6   : > { %2045 = vmatprep.subr.bf16.mxu1 %v3264_v42  ;;  %v409_v42 = vld [vmem:[%s3653_s29 + $0x438] sm:$0xff]  ;;  %v3074_v46 = vcombine.high %v277_v6, %v281_v40  ;;  %v3073_v52 = vcombine.low %v277_v6, %v281_v40 }
  0xd7   : > { %2005 = vmatpush2.bf16.msra.mxu0 %v3135_v48  ;;  %v3202_v47 = vcombine.high %v405_v41, %v409_v42  ;;  %v397_v48 = vld [vmem:[%s3653_s29 + $0x3d8] sm:$0xff]  ;;  %v3201_v53 = vcombine.low %v405_v41, %v409_v42 }
  0xd8   : > { %2056 = vmatprep.subr.bf16.mxu0 %v3130_v50  ;;  %v525_v50 = vld [vmem:[%s3653_s29 + $0x7d8] sm:$0xff] }
  0xd9   : > { %2046 = vmatpush2.bf16.msra.mxu1 %v3263_v49  ;;  %v401_v49 = vld [vmem:[%s3653_s29 + $0x3f8] sm:$0xff] }
  0xda   : > { %2097 = vmatprep.subr.bf16.mxu1 %v3258_v51  ;;  %2007 = vmatmul.mubr.bf16.vlgmr.msra.gmra.mxu0 %v3750_v29  ;;  %v529_v51 = vld [vmem:[%s3653_s29 + $0x7f8] sm:$0xff]  ;;  %v3194_v55 = vcombine.high %v397_v48, %v401_v49  ;;  %v3193_v61 = vcombine.low %v397_v48, %v401_v49 }
  0xdb   : > { %2057 = vmatpush1.bf16.msra.mxu0 %v3129_v57  ;;  %2088 = vmatprep.mubr.bf16.mxu0 %v3704_v12  ;;  %v433_v12 = vld [vmem:[%s3653_s29 + $0x4f8] sm:$0xff]  ;;  %v3322_v56 = vcombine.high %v525_v50, %v529_v51  ;;  %v3321_v62 = vcombine.low %v525_v50, %v529_v51 }
  0xdc   : > { %2048 = vmatmul.mubr.bf16.vlgmr.msra.gmra.mxu1 %v3756_v32  ;;  %2058 = vmatprep.subr.bf16.mxu0 %v3122_v59  ;;  %v3226_v22 = vcombine.high %v429_v19, %v433_v12  ;;  %v3225_v28 = vcombine.low %v429_v19, %v433_v12  ;;  %v389_v57 = vld [vmem:[%s3653_s29 + $0x398] sm:$0xff] }
  0xdd   : > { %2098 = vmatpush1.bf16.msra.mxu1 %v3257_v58  ;;  %2129 = vmatprep.mubr.bf16.mxu1 %v3711_v17  ;;  %v3233_v17 = vcombine.low %v437_v9, %v441_v10  ;;  %v393_v58 = vld [vmem:[%s3653_s29 + $0x3b8] sm:$0xff] }
  0xde   : > { %2099 = vmatprep.subr.bf16.mxu1 %v3250_v60  ;;  %v517_v59 = vld [vmem:[%s3653_s29 + $0x798] sm:$0xff]  ;;  %v3186_v63 = vcombine.high %v389_v57, %v393_v58  ;;  %v3185_v7 = vcombine.low %v389_v57, %v393_v58 }
  0xdf   : > { %2059 = vmatpush1.bf16.msra.mxu0 %v3121_v2  ;;  %v521_v60 = vld [vmem:[%s3653_s29 + $0x7b8] sm:$0xff] }
  0xe0   : > { %2060 = vmatprep.subr.bf16.mxu0 %v3114_v4  ;;  %v3314_v1 = vcombine.high %v517_v59, %v521_v60  ;;  %v381_v2 = vld [vmem:[%s3653_s29 + $0x358] sm:$0xff]  ;;  %v3313_v8 = vcombine.low %v517_v59, %v521_v60 }
  0xe1   : > { %2100 = vmatpush1.bf16.msra.mxu1 %v3249_v3  ;;  %v385_v3 = vld [vmem:[%s3653_s29 + $0x378] sm:$0xff] }
  0xe2   : > { %2101 = vmatprep.subr.bf16.mxu1 %v3242_v5  ;;  %v509_v4 = vld [vmem:[%s3653_s29 + $0x758] sm:$0xff]  ;;  %v3178_v9 = vcombine.high %v381_v2, %v385_v3  ;;  %v3177_v16 = vcombine.low %v381_v2, %v385_v3 }
  0xe3   : > { %2061 = vmatpush1.bf16.msra.mxu0 %v3113_v11  ;;  %v513_v5 = vld [vmem:[%s3653_s29 + $0x778] sm:$0xff] }
  0xe4   : > { %2062 = vmatprep.subr.bf16.mxu0 %v3106_v14  ;;  %v3306_v10 = vcombine.high %v509_v4, %v513_v5  ;;  %v373_v11 = vld [vmem:[%s3653_s29 + $0x318] sm:$0xff]  ;;  %v3305_v18 = vcombine.low %v509_v4, %v513_v5 }
  0xe5   : > { %2102 = vmatpush1.bf16.msra.mxu1 %v3241_v13  ;;  %v377_v13 = vld [vmem:[%s3653_s29 + $0x338] sm:$0xff] }
  0xe6   : > { %2103 = vmatprep.subr.bf16.mxu1 %v3234_v15  ;;  %v501_v14 = vld [vmem:[%s3653_s29 + $0x718] sm:$0xff]  ;;  %v3170_v19 = vcombine.high %v373_v11, %v377_v13  ;;  %v3169_v23 = vcombine.low %v373_v11, %v377_v13 }
  0xe7   : > { %2063 = vmatpush1.bf16.msra.mxu0 %v3105_v20  ;;  %v505_v15 = vld [vmem:[%s3653_s29 + $0x738] sm:$0xff] }
  0xe8   : > { %2064 = vmatprep.subr.bf16.mxu0 %v3098_v21  ;;  %v3298_v12 = vcombine.high %v501_v14, %v505_v15  ;;  %v365_v20 = vld [vmem:[%s3653_s29 + $0x2d8] sm:$0xff]  ;;  %v3297_v24 = vcombine.low %v501_v14, %v505_v15 }
  0xe9   : > { %2104 = vmatpush1.bf16.msra.mxu1 %v3233_v17  ;;  %v369_v17 = vld [vmem:[%s3653_s29 + $0x2f8] sm:$0xff] }
  0xea   : > { %2105 = vmatprep.subr.bf16.mxu1 %v3226_v22  ;;  %v493_v21 = vld [vmem:[%s3653_s29 + $0x6d8] sm:$0xff]  ;;  %v3162_v25 = vcombine.high %v365_v20, %v369_v17  ;;  %v3161_v33 = vcombine.low %v365_v20, %v369_v17 }
  0xeb   : > { %2065 = vmatpush1.bf16.msra.mxu0 %v3097_v27  ;;  %v497_v22 = vld [vmem:[%s3653_s29 + $0x6f8] sm:$0xff] }
  0xec   : > { %2066 = vmatprep.subr.bf16.mxu0 %v3090_v30  ;;  %v3290_v26 = vcombine.high %v493_v21, %v497_v22  ;;  %v357_v27 = vld [vmem:[%s3653_s29 + $0x298] sm:$0xff]  ;;  %v3289_v34 = vcombine.low %v493_v21, %v497_v22 }
  0xed   : > { %2106 = vmatpush1.bf16.msra.mxu1 %v3225_v28  ;;  %v361_v28 = vld [vmem:[%s3653_s29 + $0x2b8] sm:$0xff] }
  0xee   : > { %2107 = vmatprep.subr.bf16.mxu1 %v3218_v31  ;;  %v485_v30 = vld [vmem:[%s3653_s29 + $0x698] sm:$0xff]  ;;  %v3154_v35 = vcombine.high %v357_v27, %v361_v28  ;;  %v3153_v6 = vcombine.low %v357_v27, %v361_v28 }
  0xef   : > { %2067 = vmatpush1.bf16.msra.mxu0 %v3089_v37  ;;  %v489_v31 = vld [vmem:[%s3653_s29 + $0x6b8] sm:$0xff] }
  0xf0   : > { %2068 = vmatprep.subr.bf16.mxu0 %v3082_v38  ;;  %v3282_v36 = vcombine.high %v485_v30, %v489_v31  ;;  %v349_v37 = vld [vmem:[%s3653_s29 + $0x258] sm:$0xff]  ;;  %v3281_v40 = vcombine.low %v485_v30, %v489_v31 }
  0xf1   : > { %2108 = vmatpush1.bf16.msra.mxu1 %v3217_v0  ;;  %v353_v0 = vld [vmem:[%s3653_s29 + $0x278] sm:$0xff] }
  0xf2   : > { %2109 = vmatprep.subr.bf16.mxu1 %v3210_v39  ;;  %v477_v38 = vld [vmem:[%s3653_s29 + $0x658] sm:$0xff]  ;;  %v3146_v41 = vcombine.high %v349_v37, %v353_v0  ;;  %v3145_v48 = vcombine.low %v349_v37, %v353_v0 }
  0xf3   : > { %2069 = vmatpush1.bf16.msra.mxu0 %v3081_v43  ;;  %v481_v39 = vld [vmem:[%s3653_s29 + $0x678] sm:$0xff] }
  0xf4   : > { %2070 = vmatprep.subr.bf16.mxu0 %v3074_v46  ;;  %v3274_v42 = vcombine.high %v477_v38, %v481_v39  ;;  %v341_v43 = vld [vmem:[%s3653_s29 + $0x218] sm:$0xff]  ;;  %v3273_v49 = vcombine.low %v477_v38, %v481_v39 }
  0xf5   : > { %2110 = vmatpush1.bf16.msra.mxu1 %v3209_v44  ;;  %v345_v44 = vld [vmem:[%s3653_s29 + $0x238] sm:$0xff] }
  0xf6   : > { %2111 = vmatprep.subr.bf16.mxu1 %v3202_v47  ;;  %v469_v46 = vld [vmem:[%s3653_s29 + $0x618] sm:$0xff]  ;;  %v3138_v50 = vcombine.high %v341_v43, %v345_v44 }
  0xf7   : > { %2071 = vmatpush1.bf16.msra.mxu0 %v3073_v52  ;;  %v473_v47 = vld [vmem:[%s3653_s29 + $0x638] sm:$0xff]  ;;  %v3137_v52 = vcombine.low %v341_v43, %v345_v44 }
  0xf8   : > { %2072 = vmatprep.subr.bf16.mxu0 %v3194_v55  ;;  %v3266_v51 = vcombine.high %v469_v46, %v473_v47 }
  0xf9   : > { %2112 = vmatpush1.bf16.msra.mxu1 %v3201_v53  ;;  %v3265_v53 = vcombine.low %v469_v46, %v473_v47 }
  0xfa   : > { %2113 = vmatprep.subr.bf16.mxu1 %v3322_v56 }
  0xfb   : > { %2073 = vmatpush2.bf16.msra.mxu0 %v3193_v61 }
  0xfc   : > { %2074 = vmatprep.subr.bf16.mxu0 %v3186_v63 }
  0xfd   : > { %2114 = vmatpush2.bf16.msra.mxu1 %v3321_v62 }
  0xfe   : > { %2115 = vmatprep.subr.bf16.mxu1 %v3314_v1 }
  0xff   : > { %2075 = vmatpush2.bf16.msra.mxu0 %v3185_v7 }
 0x100   : > { %2076 = vmatprep.subr.bf16.mxu0 %v3178_v9 }
 0x101   : > { %2116 = vmatpush2.bf16.msra.mxu1 %v3313_v8 }
 0x102   : > { %2117 = vmatprep.subr.bf16.mxu1 %v3306_v10 }
 0x103   : > { %2077 = vmatpush2.bf16.msra.mxu0 %v3177_v16  ;;  %v245_v16 = vld [vmem:[#allocation2] sm:$0xff] }
 0x104   : > { %2078 = vmatprep.subr.bf16.mxu0 %v3170_v19 }
 0x105   : > { %2118 = vmatpush2.bf16.msra.mxu1 %v3305_v18 }
 0x106   : > { %2119 = vmatprep.subr.bf16.mxu1 %v3298_v12 }
 0x107   : > { %2079 = vmatpush2.bf16.msra.mxu0 %v3169_v23 }
 0x108   : > { %2080 = vmatprep.subr.bf16.mxu0 %v3162_v25 }
 0x109   : > { %2120 = vmatpush2.bf16.msra.mxu1 %v3297_v24 }
 0x10a   : > { %2121 = vmatprep.subr.bf16.mxu1 %v3290_v26 }
 0x10b   : > { %2081 = vmatpush2.bf16.msra.mxu0 %v3161_v33 }
 0x10c   : > { %2082 = vmatprep.subr.bf16.mxu0 %v3154_v35 }
 0x10d   : > { %2122 = vmatpush2.bf16.msra.mxu1 %v3289_v34 }
 0x10e   : > { %2123 = vmatprep.subr.bf16.mxu1 %v3282_v36 }
 0x10f   : > { %2083 = vmatpush2.bf16.msra.mxu0 %v3153_v6 }
 0x110   : > { %2084 = vmatprep.subr.bf16.mxu0 %v3146_v41 }
 0x111   : > { %2124 = vmatpush2.bf16.msra.mxu1 %v3281_v40 }
 0x112   : > { %2125 = vmatprep.subr.bf16.mxu1 %v3274_v42  ;;  %v246_v42 = vld [vmem:[#allocation2 + $0x8] sm:$0xff] }
 0x113   : > { %2085 = vmatpush2.bf16.msra.mxu0 %v3145_v48 }
 0x114   : > { %2086 = vmatprep.subr.bf16.mxu0 %v3138_v50 }
 0x115   : > { %2126 = vmatpush2.bf16.msra.mxu1 %v3273_v49 }
 0x116   : > { %2127 = vmatprep.subr.bf16.mxu1 %v3266_v51 }
 0x117   : > { %2087 = vmatpush2.bf16.msra.mxu0 %v3137_v52 }
 0x119   : > { %2128 = vmatpush2.bf16.msra.mxu1 %v3265_v53 }
 0x11a   : > { %v1844_v55 = vpop.f32.mrf.mxu0  ;;  %2089 = vmatmul.mubr.bf16.vlgmr.msra.gmra.mxu0 %v3750_v29 }
 0x11c   : > { %v1885_v56 = vpop.f32.mrf.mxu1  ;;  %2130 = vmatmul.mubr.bf16.vlgmr.msra.gmra.mxu1 %v3756_v32  ;;  %v1846_v58 = vpop.f32.mrf.mxu0 }
 0x11d   : > { %v1886_v57 = vadd.f32 %v1885_v56, %v1844_v55 }
 0x11e   : > { %v1887_v59 = vpop.f32.mrf.mxu1  ;;  %v1848_v61 = vpop.f32.mrf.mxu0 }
 0x11f   : > { %v1888_v60 = vadd.f32 %v1887_v59, %v1846_v58 }
 0x120   : > { %v1889_v62 = vpop.f32.mrf.mxu1  ;;  %v1849_v1 = vpop.f32.mrf.mxu0 }
 0x121   : > { %v2146_v63 = vcombine.low %v1886_v57, %v1888_v60 }
 0x122   : > { %v1890_v2 = vpop.f32.mrf.mxu1 }
 0x123   : > { %v2154_v14 = vrot.slane %v2146_v63, %v3685_v54 }
 0x15a   : > { %v1926_v3 = vpop.f32.mrf.mxu0 }
 0x15c   : > { %v1967_v4 = vpop.f32.mrf.mxu1  ;;  %v1928_v7 = vpop.f32.mrf.mxu0 }
 0x15d   : > { %v1968_v5 = vadd.f32 %v1967_v4, %v1926_v3 }
 0x15e   : > { %v1969_v8 = vpop.f32.mrf.mxu1  ;;  %v1930_v10 = vpop.f32.mrf.mxu0 }
 0x15f   : > { %v1970_v9 = vadd.f32 %v1969_v8, %v1928_v7 }
 0x160   : > { %v1971_v29 = vpop.f32.mrf.mxu1  ;;  %v1931_v13 = vpop.f32.mrf.mxu0 }
 0x161   : > { %v2147_v11 = vcombine.low %v1968_v5, %v1970_v9 }
 0x162   : > { %v1972_v32 = vpop.f32.mrf.mxu1 }
 0x163   : > { %v2161_v15 = vrot.slane %v2147_v11, %v3685_v54 }
 0x165   : > { %v2162_v18 = vcombine.low %v2154_v14, %v2161_v15 }
 0x167   : > { %v2182_v19 = vadd.f32 %v2162_v18, %v245_v16 }
 0x169   : > { %2184 = vst [vmem:[#allocation2] sm:$0xff] %v2182_v19 }
 0x19a   : > { %v2008_v12 = vpop.f32.mrf.mxu0 }
 0x19c   : > { %v2049_v20 = vpop.f32.mrf.mxu1  ;;  %v2010_v21 = vpop.f32.mrf.mxu0 }
 0x19d   : > { %v2050_v17 = vadd.f32 %v2049_v20, %v2008_v12 }
 0x19e   : > { %v2051_v22 = vpop.f32.mrf.mxu1  ;;  %v2012_v24 = vpop.f32.mrf.mxu0 }
 0x19f   : > { %v2052_v23 = vadd.f32 %v2051_v22, %v2010_v21 }
 0x1a0   : > { %v2053_v25 = vpop.f32.mrf.mxu1  ;;  %v2013_v27 = vpop.f32.mrf.mxu0 }
 0x1a1   : > { %v2163_v26 = vcombine.low %v2050_v17, %v2052_v23 }
 0x1a2   : > { %v2054_v28 = vpop.f32.mrf.mxu1 }
 0x1a3   : > { %v2171_v40 = vrot.slane %v2163_v26, %v3685_v54 }
 0x1da   : > { %v2090_v30 = vpop.f32.mrf.mxu0 }
 0x1dc   : > { %v2131_v31 = vpop.f32.mrf.mxu1  ;;  %v2092_v33 = vpop.f32.mrf.mxu0 }
 0x1dd   : > { %v2132_v35 = vadd.f32 %v2131_v31, %v2090_v30 }
 0x1de   : > { %v2133_v34 = vpop.f32.mrf.mxu1  ;;  %v2094_v37 = vpop.f32.mrf.mxu0 }
 0x1df   : > { %v2134_v36 = vadd.f32 %v2133_v34, %v2092_v33 }
 0x1e0   : > { %v2135_v0 = vpop.f32.mrf.mxu1  ;;  %v2095_v39 = vpop.f32.mrf.mxu0 }
 0x1e1   : > { %v2164_v38 = vcombine.low %v2132_v35, %v2134_v36 }
 0x1e2   : > { %v2136_v6 = vpop.f32.mrf.mxu1 }
 0x1e3   : > { %v2178_v41 = vrot.slane %v2164_v38, %v3685_v54 }
 0x1e5   : > { %v2179_v43 = vcombine.low %v2171_v40, %v2178_v41  ;;  %2189 = sbr.rel (%p3323_p6) target bundleno = 758 (0x2f6), region = 48 }
 0x1e7   : > { %v2183_v44 = vadd.f32 %v2179_v43, %v246_v42 }
 0x1e9   : > { %2185 = vst [vmem:[#allocation2 + $0x8] sm:$0xff] %v2183_v44 }
 0x1ea   : > { %v3500_v46 = vld [vmem:[%s4193_s3 + $0x78] sm:$0xff]   ;;  %v3504_v50 = vld [vmem:[%s4193_s3 + $0x70] sm:$0xff]   ;;  %v3508_v55 = vld [vmem:[%s4193_s3 + $0x68] sm:$0xff]   ;;  %v2196_v11 = vsub.s32 0, %v3678_v45  ;;  %v2200_v32 = vsub.s32 1, %v3678_v45  ;;  %v2204_v15 = vsub.s32 2, %v3678_v45 }
 0x1eb   : > { %v3501_v47 = vld [vmem:[%s4193_s3 + $0xf8] sm:$0xff]   ;;  %3394 = vmatprep.subr.bf16.mxu0 %v3500_v46  ;;  %v3505_v51 = vld [vmem:[%s4193_s3 + $0xf0] sm:$0xff]   ;;  %v3509_v56 = vld [vmem:[%s4193_s3 + $0xe8] sm:$0xff]   ;;  %v2208_v18 = vsub.s32 3, %v3678_v45  ;;  %v2212_v36 = vsub.s32 4, %v3678_v45  ;;  %v2216_v37 = vsub.s32 5, %v3678_v45 }
 0x1ec   : > { %v3502_v48 = vld [vmem:[%s4193_s3 + $0x38] sm:$0xff]   ;;  %3416 = vmatprep.subr.bf16.mxu1 %v3501_v47  ;;  %v3506_v52 = vld [vmem:[%s4193_s3 + $0x30] sm:$0xff]   ;;  %v3510_v57 = vld [vmem:[%s4193_s3 + $0x28] sm:$0xff]   ;;  %v2220_v39 = vsub.s32 6, %v3678_v45  ;;  %v2224_v6 = vsub.s32 7, %v3678_v45  ;;  %vm2997_vm0 = vcmask 9216  }
 0x1ed   : > { %v3503_v49 = vld [vmem:[%s4193_s3 + $0xb8] sm:$0xff]   ;;  %3395 = vmatpush3.bf16.msra.mxu0 %v3502_v48  ;;  %v3507_v53 = vld [vmem:[%s4193_s3 + $0xb0] sm:$0xff]   ;;  %v3511_v58 = vld [vmem:[%s4193_s3 + $0xa8] sm:$0xff]  }
 0x1ee   : > { %3417 = vmatpush3.bf16.msra.mxu1 %v3503_v49  ;;  %3396 = vmatprep.subr.bf16.mxu0 %v3504_v50  ;;  %v3512_v59 = vld [vmem:[%s4193_s3 + $0x60] sm:$0xff]   ;;  %v3516_v63 = vld [vmem:[%s4193_s3 + $0x58] sm:$0xff]   ;;  %v3520_v4 = vld [vmem:[%s4193_s3 + $0x50] sm:$0xff]  }
 0x1ef   : > { %3418 = vmatprep.subr.bf16.mxu1 %v3505_v51  ;;  %v3513_v60 = vld [vmem:[%s4193_s3 + $0xe0] sm:$0xff]   ;;  %v3517_v1 = vld [vmem:[%s4193_s3 + $0xd8] sm:$0xff]   ;;  %v3521_v5 = vld [vmem:[%s4193_s3 + $0xd0] sm:$0xff]  }
 0x1f0   : > { %v3514_v61 = vld [vmem:[%s4193_s3 + $0x20] sm:$0xff]   ;;  %v3518_v2 = vld [vmem:[%s4193_s3 + $0x18] sm:$0xff]   ;;  %v3522_v7 = vld [vmem:[%s4193_s3 + $0x10] sm:$0xff]  }
 0x1f1   : > { %3397 = vmatpush3.bf16.msra.mxu0 %v3506_v52  ;;  %v3515_v62 = vld [vmem:[%s4193_s3 + $0xa0] sm:$0xff]   ;;  %v3519_v3 = vld [vmem:[%s4193_s3 + $0x98] sm:$0xff]   ;;  %v3523_v8 = vld [vmem:[%s4193_s3 + $0x90] sm:$0xff]  }
 0x1f2   : > { %3419 = vmatpush3.bf16.msra.mxu1 %v3507_v53  ;;  %3398 = vmatprep.subr.bf16.mxu0 %v3508_v55  ;;  %v3524_v9 = vld [vmem:[%s4193_s3 + $0x48] sm:$0xff]   ;;  %v3528_v14 = vld [vmem:[%s4193_s3 + $0x40] sm:$0xff]   ;;  %v3532_v24 = vld [vmem:[%s4193_s3 + $0x178] sm:$0xff]  }
 0x1f3   : > { %3420 = vmatprep.subr.bf16.mxu1 %v3509_v56  ;;  %v3525_v10 = vld [vmem:[%s4193_s3 + $0xc8] sm:$0xff]   ;;  %v3529_v16 = vld [vmem:[%s4193_s3 + $0xc0] sm:$0xff]   ;;  %v3533_v25 = vld [vmem:[%s4193_s3 + $0x1f8] sm:$0xff]  }
 0x1f4   : > { %v3526_v29 = vld [vmem:[%s4193_s3 + $0x8] sm:$0xff]   ;;  %v3530_v19 = vld [vmem:[%s4193_s3] sm:$0xff]   ;;  %v3534_v48 = vld [vmem:[%s4193_s3 + $0x138] sm:$0xff]  }
 0x1f5   : > { %3399 = vmatpush3.bf16.msra.mxu0 %v3510_v57  ;;  %v3527_v13 = vld [vmem:[%s4193_s3 + $0x88] sm:$0xff]   ;;  %v3531_v12 = vld [vmem:[%s4193_s3 + $0x80] sm:$0xff]   ;;  %v3536_v52 = vld [vmem:[%s4193_s3 + $0x170] sm:$0xff]  }
 0x1f6   : > { %3421 = vmatpush3.bf16.msra.mxu1 %v3511_v58  ;;  %3400 = vmatprep.subr.bf16.mxu0 %v3512_v59  ;;  %v2192_v20 = vld [vmem:[%s4192_s2] sm:$0xff]  ;;  %v3535_v53 = vld [vmem:[%s4193_s3 + $0x1b8] sm:$0xff]   ;;  %v3537_v55 = vld [vmem:[%s4193_s3 + $0x1f0] sm:$0xff]  }
 0x1f7   : > { %3422 = vmatprep.subr.bf16.mxu1 %v3513_v60  ;;  %v2197_v17 = vrot.slane %v2192_v20, %v2196_v11  ;;  %v2201_v21 = vrot.slane %v2192_v20, %v2200_v32  ;;  %v2205_v22 = vrot.slane %v2192_v20, %v2204_v15  ;;  %v2209_v23 = vrot.slane %v2192_v20, %v2208_v18  ;;  %v2190_v31 = vld [vmem:[#allocation2] sm:$0xff]  ;;  %v3538_v56 = vld [vmem:[%s4193_s3 + $0x130] sm:$0xff]   ;;  %v3540_v59 = vld [vmem:[%s4193_s3 + $0x168] sm:$0xff]  }
 0x1f8   : > { %v2213_v43 = vrot.slane %v2192_v20, %v2212_v36  ;;  %v2217_v44 = vrot.slane %v2192_v20, %v2216_v37  ;;  %v2221_v49 = vrot.slane %v2192_v20, %v2220_v39  ;;  %v2225_v50 = vrot.slane %v2192_v20, %v2224_v6  ;;  %v3539_v60 = vld [vmem:[%s4193_s3 + $0x1b0] sm:$0xff]   ;;  %v3550_v11 = vld [vmem:[%s4193_s3 + $0x118] sm:$0xff]   ;;  %v3556_v20 = vld [vmem:[%s4193_s3 + $0x148] sm:$0xff]  }
 0x1f9   : > { %3401 = vmatpush3.bf16.msra.mxu0 %v3514_v61  ;;  %v2226_v26 = vcombine.low %v2197_v17, %v2201_v21  ;;  %v2227_v27 = vcombine.low %v2205_v22, %v2209_v23  ;;  %v3541_v61 = vld [vmem:[%s4193_s3 + $0x1e8] sm:$0xff]   ;;  %v3552_v32 = vld [vmem:[%s4193_s3 + $0x150] sm:$0xff]  }
 0x1fa   : > { %3423 = vmatpush3.bf16.msra.mxu1 %v3515_v62  ;;  %3402 = vmatprep.subr.bf16.mxu0 %v3516_v63  ;;  %v2243_v57 = vcombine.low %v2213_v43, %v2217_v44  ;;  %v2244_v58 = vcombine.low %v2221_v49, %v2225_v50  ;;  %v3542_v62 = vld [vmem:[%s4193_s3 + $0x128] sm:$0xff]   ;;  %v3554_v18 = vld [vmem:[%s4193_s3 + $0x110] sm:$0xff]   ;;  %v3324_v43 = vld [vmem:[%s4194_s4] ss:$0 sm:$0xff] }
 0x1fb   : > { %3424 = vmatprep.subr.bf16.mxu1 %v3517_v1  ;;  %v2234_v28 = vrot.slane %v2226_v26, %v3685_v54  ;;  %v2241_v30 = vrot.slane %v2227_v27, %v3685_v54  ;;  %v3555_v17 = vld [vmem:[%s4193_s3 + $0x190] sm:$0xff]   ;;  %v3557_v23 = vld [vmem:[%s4193_s3 + $0x1c8] sm:$0xff]   ;;  %v3560_v27 = vld [vmem:[%s4193_s3 + $0x140] sm:$0xff]  }
 0x1fc   : > { %v2251_v63 = vrot.slane %v2243_v57, %v3685_v54  ;;  %v2258_v1 = vrot.slane %v2244_v58, %v3685_v54 }
 0x1fd   : > { %3403 = vmatpush3.bf16.msra.mxu0 %v3518_v2  ;;  %v2242_v33 = vcombine.low %v2234_v28, %v2241_v30  ;;  %v3544_v2 = vld [vmem:[%s4193_s3 + $0x160] sm:$0xff]  }
 0x1fe   : > { %3425 = vmatpush3.bf16.msra.mxu1 %v3519_v3  ;;  %3404 = vmatprep.subr.bf16.mxu0 %v3520_v4  ;;  %v3543_v3 = vld [vmem:[%s4193_s3 + $0x1a8] sm:$0xff]   ;;  %v3545_v4 = vld [vmem:[%s4193_s3 + $0x1e0] sm:$0xff]  }
 0x1ff   : > { %3426 = vmatprep.subr.bf16.mxu1 %v3521_v5  ;;  %v2262_v34 = vadd.f32 %v2242_v33, %v2190_v31  ;;  %v3546_v5 = vld [vmem:[%s4193_s3 + $0x120] sm:$0xff]  }
 0x200   : > { %v3561_v30 = vld [vmem:[%s4193_s3 + $0x1c0] sm:$0xff]  }
 0x201   : > { %3405 = vmatpush3.bf16.msra.mxu0 %v3522_v7  ;;  %v2264_v35 = vmax.f32 %v2262_v34, 0.0  ;;  %v2259_v7 = vcombine.low %v2251_v63, %v2258_v1  ;;  %v3562_v31 = vld [vmem:[%s4193_s3 + $0x100] sm:$0xff]  }
 0x202   : > { %3427 = vmatpush3.bf16.msra.mxu1 %v3523_v8  ;;  %3406 = vmatprep.subr.bf16.mxu0 %v3524_v9  ;;  %v3548_v8 = vld [vmem:[%s4193_s3 + $0x158] sm:$0xff]   ;;  %v3547_v9 = vld [vmem:[%s4193_s3 + $0x1a0] sm:$0xff]  }
 0x203   : > { %3428 = vmatprep.subr.bf16.mxu1 %v3525_v10  ;;  %v2275_v0 = vrot.slane %v2264_v35, %v3685_v54  ;;  %v2268_v38 = vcombine.high %v2264_v35, %v2264_v35  ;;  %v3549_v10 = vld [vmem:[%s4193_s3 + $0x1d8] sm:$0xff]   ;;  %v3563_v33 = vld [vmem:[%s4193_s3 + $0x180] sm:$0xff]  }
 0x205   : > { %3407 = vmatpush3.bf16.msra.mxu0 %v3526_v29  ;;  %v2283_v40 = vcombine.high %v2275_v0, %v2275_v0  ;;  %v2282_v41 = vrot.slane %v2268_v38, %v3685_v54  ;;  %v2310_v42 = vpack.c.bf16 %v2275_v0, %v2275_v0  ;;  %v2191_v29 = vld [vmem:[#allocation2 + $0x8] sm:$0xff] }
 0x206   : > { %3429 = vmatpush3.bf16.msra.mxu1 %v3527_v13  ;;  %3408 = vmatprep.subr.bf16.mxu0 %v3528_v14  ;;  %v2263_v13 = vadd.f32 %v2259_v7, %v2191_v29  ;;  %v3551_v14 = vld [vmem:[%s4193_s3 + $0x198] sm:$0xff]  }
 0x207   : > { %3430 = vmatprep.subr.bf16.mxu1 %v3529_v16  ;;  %v2311_v46 = vpack.c.bf16 %v2283_v40, %v2283_v40  ;;  %v2284_v47 = vcombine.high %v2282_v41, %v2282_v41  ;;  %v2312_v51 = vpack.c.bf16 %v2282_v41, %v2282_v41  ;;  %v3553_v16 = vld [vmem:[%s4193_s3 + $0x1d0] sm:$0xff]  }
 0x208   : > { %v2265_v15 = vmax.f32 %v2263_v13, 0.0 }
 0x209   : > { %3409 = vmatpush3.bf16.msra.mxu0 %v3530_v19  ;;  %2869 = vmatprep.mubr.bf16.mxu0 %v2311_v46  ;;  %v2313_v45 = vpack.c.bf16 %v2284_v47, %v2284_v47 }
 0x20a   : > { %3431 = vmatpush3.bf16.msra.mxu1 %v3531_v12  ;;  %3438 = vmatprep.subr.bf16.mxu0 %v3532_v24  ;;  %v2292_v19 = vrot.slane %v2265_v15, %v3685_v54  ;;  %v2285_v12 = vcombine.high %v2265_v15, %v2265_v15  ;;  %v3558_v24 = vld [vmem:[%s4193_s3 + $0x108] sm:$0xff]  }
 0x20b   : > { %3460 = vmatprep.subr.bf16.mxu1 %v3533_v25  ;;  %2909 = vmatprep.mubr.bf16.mxu1 %v2313_v45 }
 0x20c   : > { %2870 = vmatmul.mubr.bf16.vlgmr.msra.gmra.mxu0 %v2310_v42  ;;  %v2300_v21 = vcombine.high %v2292_v19, %v2292_v19  ;;  %v2299_v22 = vrot.slane %v2285_v12, %v3685_v54  ;;  %v3559_v54 = vld [vmem:[%s4193_s3 + $0x188] sm:$0xff]   ;;  %v2314_v34 = vpack.c.bf16 %v2292_v19, %v2292_v19 }
 0x20d   : > { %3439 = vmatpush3.bf16.msra.mxu0 %v3534_v48  ;;  %2910 = vmatmul.mubr.bf16.vlgmr.msra.gmra.mxu1 %v2312_v51 }
 0x20e   : > { %3440 = vmatprep.subr.bf16.mxu0 %v3536_v52  ;;  %3461 = vmatpush3.bf16.msra.mxu1 %v3535_v53  ;;  %v2315_v25 = vpack.c.bf16 %v2300_v21, %v2300_v21  ;;  %v2301_v26 = vcombine.high %v2299_v22, %v2299_v22  ;;  %v2316_v35 = vpack.c.bf16 %v2299_v22, %v2299_v22 }
 0x20f   : > { %3462 = vmatprep.subr.bf16.mxu1 %v3537_v55 }
 0x210   : > { %2949 = vmatprep.mubr.bf16.mxu0 %v2315_v25  ;;  %v2317_v28 = vpack.c.bf16 %v2301_v26, %v2301_v26 }
 0x211   : > { %3441 = vmatpush3.bf16.msra.mxu0 %v3538_v56 }
 0x212   : > { %3442 = vmatprep.subr.bf16.mxu0 %v3540_v59  ;;  %3463 = vmatpush3.bf16.msra.mxu1 %v3539_v60 }
 0x213   : > { %3464 = vmatprep.subr.bf16.mxu1 %v3541_v61  ;;  %2989 = vmatprep.mubr.bf16.mxu1 %v2317_v28 }
 0x215   : > { %3443 = vmatpush3.bf16.msra.mxu0 %v3542_v62 }
 0x216   : > { %3444 = vmatprep.subr.bf16.mxu0 %v3544_v2  ;;  %3465 = vmatpush3.bf16.msra.mxu1 %v3543_v3 }
 0x217   : > { %3466 = vmatprep.subr.bf16.mxu1 %v3545_v4 }
 0x219   : > { %3445 = vmatpush3.bf16.msra.mxu0 %v3546_v5 }
 0x21a   : > { %3446 = vmatprep.subr.bf16.mxu0 %v3548_v8  ;;  %3467 = vmatpush3.bf16.msra.mxu1 %v3547_v9 }
 0x21b   : > { %3468 = vmatprep.subr.bf16.mxu1 %v3549_v10 }
 0x21d   : > { %3447 = vmatpush3.bf16.msra.mxu0 %v3550_v11 }
 0x21e   : > { %3448 = vmatprep.subr.bf16.mxu0 %v3552_v32  ;;  %3469 = vmatpush3.bf16.msra.mxu1 %v3551_v14 }
 0x21f   : > { %3470 = vmatprep.subr.bf16.mxu1 %v3553_v16 }
 0x221   : > { %3449 = vmatpush3.bf16.msra.mxu0 %v3554_v18 }
 0x222   : > { %3450 = vmatprep.subr.bf16.mxu0 %v3556_v20  ;;  %3471 = vmatpush3.bf16.msra.mxu1 %v3555_v17 }
 0x223   : > { %3472 = vmatprep.subr.bf16.mxu1 %v3557_v23 }
 0x225   : > { %3451 = vmatpush3.bf16.msra.mxu0 %v3558_v24 }
 0x226   : > { %3452 = vmatprep.subr.bf16.mxu0 %v3560_v27  ;;  %3473 = vmatpush3.bf16.msra.mxu1 %v3559_v54 }
 0x227   : > { %3474 = vmatprep.subr.bf16.mxu1 %v3561_v30 }
 0x229   : > { %3453 = vmatpush3.bf16.msra.mxu0 %v3562_v31 }
 0x22a   : > { %3475 = vmatpush3.bf16.msra.mxu1 %v3563_v33 }
 0x22c   : > { %2950 = vmatmul.mubr.bf16.vlgmr.msra.gmra.mxu0 %v2314_v34 }
 0x22d   : > { %2990 = vmatmul.mubr.bf16.vlgmr.msra.gmra.mxu1 %v2316_v35 }
 0x2cc   : > { %v3410_v36 = vpop.f32.mrf.mxu0 }
 0x2cd   : > { %v3432_v37 = vpop.f32.mrf.mxu1 }
 0x2ce   : > { %v3411_v0 = vpop.f32.mrf.mxu0 }
 0x2cf   : > { %v3433_v38 = vpop.f32.mrf.mxu1  ;;  %v3412_v42 = vadd.f32 %v3411_v0, %v3410_v36 }
 0x2d0   : > { %v3413_v39 = vpop.f32.mrf.mxu0  ;;  %v3434_v46 = vadd.f32 %v3433_v38, %v3432_v37 }
 0x2d1   : > { %v3435_v6 = vpop.f32.mrf.mxu1  ;;  %v2872_v44 = vadd.f32 %v3412_v42, %v3324_v43 }
 0x2d2   : > { %v3414_v40 = vpop.f32.mrf.mxu0 }
 0x2d3   : > { %v3436_v41 = vpop.f32.mrf.mxu1  ;;  %v2912_v50 = vadd.f32 %v3434_v46, %v2872_v44 }
 0x2ec   : > { %v3454_v47 = vpop.f32.mrf.mxu0 }
 0x2ed   : > { %v3476_v48 = vpop.f32.mrf.mxu1 }
 0x2ee   : > { %v3455_v49 = vpop.f32.mrf.mxu0 }
 0x2ef   : > { %v3456_v51 = vadd.f32 %v3455_v49, %v3454_v47  ;;  %v3477_v52 = vpop.f32.mrf.mxu1 }
 0x2f0   : > { %v3457_v45 = vpop.f32.mrf.mxu0  ;;  %v3478_v55 = vadd.f32 %v3477_v52, %v3476_v48 }
 0x2f1   : > { %v2952_v53 = vadd.f32 %v3456_v51, %v2912_v50  ;;  %v3479_v56 = vpop.f32.mrf.mxu1 }
 0x2f2   : > { %v3458_v57 = vpop.f32.mrf.mxu0 }
 0x2f3   : > { %v2992_v58 = vadd.f32 %v3478_v55, %v2952_v53  ;;  %v3480_v59 = vpop.f32.mrf.mxu1 }
 0x2f5   : > { %2998 = vst.msk [vmem:[#allocation3] sm:$0x3] %vm2997_vm0, %v2992_v58 }
 0x2f6 PF: > { %p3486_p7 = scmp.eq.s32.totalorder %s3639_s19, 1  ;;  %s3602_s24 = smov [#allocation3]  }
 0x2f7   : > { %s3006_s25 = sshll.u32 %s3602_s24, 4  ;;  %s3007_s25 = int_to_ptr.vmem [resolvable:$true] %s3006_s25 }
 0x2f8   : > { %s3564_s26 = scalar_lea.vmem %s3007_s25, 32  ;;  %p3571_p11 = scmp.lt.s32.totalorder %s3007_s25, %s3007_s25 }
 0x2f9   : > { %p3565_p8 = scmp.ne.s32.totalorder %s3007_s25, %s3564_s26  ;;  %p3572_p12 = scmp.lt.s32.totalorder %s3564_s26, %s3564_s26 }
 0x2fb   : > { %p3566_p9 = pnand %p3565_p8, %p3486_p7  ;;  %p3573_p13 = por %p3572_p12, %p3571_p11 }
 0x2fd   : > { %p3567_p10 = pneg %p3566_p9 }
 0x2ff   : > { %p3574_p0 = pnand %p3573_p13, %p3567_p10 }
 0x301   : > { %3577 = shalt.err (!%p3574_p0)
}
 0x302   : > { %3483 = dma.vmem_to_hbm [thread:$0]  (%p3486_p7), %s3007_s25, 32, %s4195_s5, [#allocation4]  }
 0x303   : > { %3593 = dma.done.wait (%p3486_p7), [#allocation4], 32  }
 0x304   : > { %3595 = vsyncadd (%p3486_p7), [#allocation4], 4294967264 }
 0x305 PF: > { %s16_s18 = sadd.s32 1, %s3598_s18  }
 0x306   : > { %p13_p1 = scmp.ge.s32.totalorder %s16_s18, 4  }
 0x308   :  { %15 = sbr.rel (!%p13_p1) target bundleno = 1 (0x1), region = 78 }
 0x30d   :  { %3019 = vsyncpa [#allocation4], 1 }
 0x30e   :  { %3021 = vsyncpa [#allocation4 + $0x1], 1 }

</bundles_post_ra>
